<compile_context>
chip_gen: v7x
topology: tpu7x:2x2x1
jax: 0.10.0
libtpu: 0.0.40
codegen_flags: <defaults>
</compile_context>

<pallas_src>
import functools

import jax
import jax.numpy as jnp
from jax.experimental import pallas as pl
from jax.experimental.pallas import tpu as pltpu


# ----------------------------------------------------------------------------
# Fused forward kernel
# ----------------------------------------------------------------------------
def _ginru_fused_kernel(*refs, num_layers, nhead):
    it = iter(refs)
    # ---- inputs (order must match ginru_forward) -----------------------------
    adj_ref = next(it)          # (N, N)  dense adjacency A[dst, src]
    x_ref = next(it)            # (N, input_dim)
    pool_ref = next(it)         # (G, N)  one-hot graph assignment
    eps_ref = next(it)          # (num_layers,) in SMEM
    gin = [[next(it) for _ in range(5)] for _ in range(num_layers)]  # w1,b1,w2,b2,jkw
    jk_b = next(it)
    fco_w1, fco_b1, fco_w2, fco_b2 = [next(it) for _ in range(4)]
    fce_w1, fce_b1, fce_w2, fce_b2 = [next(it) for _ in range(4)]
    wq, bq, wk, bk, wv, bv = [next(it) for _ in range(6)]
    wo, bo = next(it), next(it)
    g1, be1 = next(it), next(it)
    wf1, bf1, wf2, bf2 = [next(it) for _ in range(4)]   # wf1/wf2 are bf16
    g2, be2 = next(it), next(it)
    # ---- outputs -------------------------------------------------------------
    pred_o_ref, pred_e_ref, emb_o_ref, emb_e_ref = [next(it) for _ in range(4)]

    f32 = jnp.float32
    adj = adj_ref[...]
    h = x_ref[...]
    D = g1.shape[1]                       # hidden_dim

    # ---- GIN stack (train_eps), jk='cat' folded into a sum of per-layer dots.
    # GINConv: h = MLP((1+eps)*x + sum_{j->i} x_j), MLP = Lin-ReLU-Lin,
    # followed by BasicGNN's per-layer ReLU (jk mode => applied on every layer).
    hk = None
    for l in range(num_layers):
        w1_ref, b1_ref, w2_ref, b2_ref, jkw_ref = gin[l]
        eps = eps_ref[l]                                         # SMEM scalar
        agg = jnp.dot(adj, h, preferred_element_type=f32)        # neighbour sum
        z = (1.0 + eps) * h + agg
        z = jnp.dot(z, w1_ref[...], preferred_element_type=f32) + b1_ref[...]
        z = jnp.maximum(z, 0.0)
        z = jnp.dot(z, w2_ref[...], preferred_element_type=f32) + b2_ref[...]
        h = jnp.maximum(z, 0.0)
        # cat([h_0 .. h_{L-1}]) @ jk_w  ==  sum_l h_l @ jk_w[l*D:(l+1)*D, :]
        part = jnp.dot(h, jkw_ref[...], preferred_element_type=f32)
        hk = part if hk is None else hk + part
    hk = hk + jk_b[...]                                          # (N, D)

    # ---- global_add_pool (one-hot assignment matmul).
    emb_o = jnp.dot(pool_ref[...], hk, preferred_element_type=f32)   # (G, D)
    emb_o_ref[...] = emb_o

    # ---- fc_o : Linear -> ReLU -> (Dropout id) -> Linear
    t = jnp.maximum(
        jnp.dot(emb_o, fco_w1[...], preferred_element_type=f32) + fco_b1[...], 0.0)
    pred_o_ref[...] = jnp.dot(t, fco_w2[...], preferred_element_type=f32) + fco_b2[...]

    # ---- TransformerEncoderLayer (post-norm, ReLU, batch of 1, dropout id).
    x = emb_o                              # (S, D), S = num_graphs
    S = x.shape[0]
    dh = D // nhead
    scale = 1.0 / (float(dh) ** 0.5)

    q = jnp.dot(x, wq[...], preferred_element_type=f32) + bq[...]
    k = jnp.dot(x, wk[...], preferred_element_type=f32) + bk[...]
    v = jnp.dot(x, wv[...], preferred_element_type=f32) + bv[...]

    # Per-head attention via lane masks: no lane slicing, no concatenate.
    lane = jax.lax.broadcasted_iota(jnp.int32, (1, D), 1)
    dims = (((1,), (1,)), ((), ()))        # contract last dims: q @ k^T w/o transpose
    attn = jnp.zeros((S, D), f32)
    for hd in range(nhead):                # static head loop
        m = jnp.where((lane >= hd * dh) & (lane < (hd + 1) * dh), 1.0, 0.0)
        s = jax.lax.dot_general(q * m, k, dims, preferred_element_type=f32) * scale
        s = s - jnp.max(s, axis=-1, keepdims=True)
        p = jnp.exp(s)
        p = p * pl.reciprocal(jnp.sum(p, axis=-1, keepdims=True), approx=True)
        attn = attn + jnp.dot(p, v, preferred_element_type=f32) * m
    attn = jnp.dot(attn, wo[...], preferred_element_type=f32) + bo[...]

    def layernorm(y, g, b):
        mu = jnp.mean(y, axis=-1, keepdims=True)
        var = jnp.mean((y - mu) ** 2, axis=-1, keepdims=True)
        return (y - mu) * jax.lax.rsqrt(var + 1e-5) * g + b

    x1 = layernorm(x + attn, g1[...], be1[...])
    # FFN: bf16 weights, f32 accumulation, f32 element-wise path.
    ff = jnp.dot(x1.astype(jnp.bfloat16), wf1[...],
                 preferred_element_type=f32) + bf1[...]
    ff = jnp.maximum(ff, 0.0)
    ff = jnp.dot(ff.astype(jnp.bfloat16), wf2[...],
                 preferred_element_type=f32) + bf2[...]
    emb_e = layernorm(x1 + ff, g2[...], be2[...])
    emb_e_ref[...] = emb_e

    # ---- fc_e
    t = jnp.maximum(
        jnp.dot(emb_e, fce_w1[...], preferred_element_type=f32) + fce_b1[...], 0.0)
    pred_e_ref[...] = jnp.dot(t, fce_w2[...], preferred_element_type=f32) + fce_b2[...]


def ginru_forward(params, x, adj, pool_mat, nhead):
    """Single fused pallas_call for the whole GINRU forward (training outputs)."""
    gin = params["gin"]
    num_layers = len(gin)
    G = pool_mat.shape[0]
    hidden = params["jk_w"].shape[1]
    out_dim = params["fco_w2"].shape[1]
    ru = params["ru"]

    r2 = lambda a: a.reshape(1, -1)
    eps = jnp.concatenate([lp["eps"] for lp in gin]).astype(jnp.float32)  # (L,)

    inputs = [adj, x, pool_mat, eps]
    for l, lp in enumerate(gin):
        jkw_l = params["jk_w"][l * hidden:(l + 1) * hidden, :]
        inputs += [lp["w1"], r2(lp["b1"]), lp["w2"], r2(lp["b2"]), jkw_l]
    inputs += [r2(params["jk_b"])]
    inputs += [params["fco_w1"], r2(params["fco_b1"]),
               params["fco_w2"], r2(params["fco_b2"])]
    inputs += [params["fce_w1"], r2(params["fce_b1"]),
               params["fce_w2"], r2(params["fce_b2"])]
    inputs += [ru["wq"], r2(ru["bq"]), ru["wk"], r2(ru["bk"]), ru["wv"], r2(ru["bv"])]
    inputs += [ru["wo"], r2(ru["bo"]), r2(ru["g1"]), r2(ru["be1"])]
    inputs += [ru["wf1"], r2(ru["bf1"]), ru["wf2"], r2(ru["bf2"])]
    inputs += [r2(ru["g2"]), r2(ru["be2"])]

    vmem_spec = pl.BlockSpec(memory_space=pltpu.MemorySpace.VMEM)
    smem_spec = pl.BlockSpec(memory_space=pltpu.MemorySpace.SMEM)
    in_specs = [vmem_spec] * len(inputs)
    in_specs[3] = smem_spec               # eps scalars -> SMEM

    out_shape = (
        jax.ShapeDtypeStruct((G, out_dim), jnp.float32),   # pred_o
        jax.ShapeDtypeStruct((G, out_dim), jnp.float32),   # pred_e
        jax.ShapeDtypeStruct((G, hidden), jnp.float32),    # emb_o
        jax.ShapeDtypeStruct((G, hidden), jnp.float32),    # emb_e
    )
    out_specs = (vmem_spec, vmem_spec, vmem_spec, vmem_spec)

    fn = pl.pallas_call(
        functools.partial(_ginru_fused_kernel, num_layers=num_layers, nhead=nhead),
        out_shape=out_shape,
        in_specs=in_specs,
        out_specs=out_specs,
        compiler_params=pltpu.CompilerParams(vmem_limit_bytes=32 * 1024 * 1024),
    )
    pred_o, pred_e, emb_o, emb_e = fn(*inputs)
    return pred_o, pred_e, emb_o, emb_e


# ----------------------------------------------------------------------------
# Parameter construction (deterministic, synthetic)
# ----------------------------------------------------------------------------
def _dense(key, fan_in, fan_out):
    kw, kb = jax.random.split(key)
    lim = 1.0 / jnp.sqrt(jnp.float32(fan_in))
    w = jax.random.uniform(kw, (fan_in, fan_out), jnp.float32, -lim, lim)
    b = jax.random.uniform(kb, (fan_out,), jnp.float32, -lim, lim)
    return w, b


def init_params(key, input_dim, hidden_dim, out_dim, num_layers, dim_ff=2048):
    keys = iter(jax.random.split(key, 64))
    params = {}

    # GIN conv stack (each conv MLP: [in, hidden, hidden]), train_eps -> eps=0.
    gin = []
    in_dim = input_dim
    for _ in range(num_layers):
        w1, b1 = _dense(next(keys), in_dim, hidden_dim)
        w2, b2 = _dense(next(keys), hidden_dim, hidden_dim)
        gin.append(dict(eps=jnp.zeros((1,), jnp.float32), w1=w1, b1=b1, w2=w2, b2=b2))
        in_dim = hidden_dim
    params["gin"] = gin

    # Jumping-knowledge 'cat' projection: Linear(num_layers*hidden -> hidden).
    params["jk_w"], params["jk_b"] = _dense(next(keys), num_layers * hidden_dim, hidden_dim)

    # fc_o / fc_e : MLP([hidden, hidden, out_dim])
    params["fco_w1"], params["fco_b1"] = _dense(next(keys), hidden_dim, hidden_dim)
    params["fco_w2"], params["fco_b2"] = _dense(next(keys), hidden_dim, out_dim)
    params["fce_w1"], params["fce_b1"] = _dense(next(keys), hidden_dim, hidden_dim)
    params["fce_w2"], params["fce_b2"] = _dense(next(keys), hidden_dim, out_dim)

    # TransformerEncoderLayer (d_model=hidden, dim_feedforward=2048 default).
    # NOTE: stored as [D, D] for x @ W; PyTorch's in_proj_weight is [3D, D] applied
    # as x @ W^T — porting real weights requires a transpose + split.
    H = hidden_dim
    wqkv, bqkv = _dense(next(keys), hidden_dim, 3 * hidden_dim)
    wo, bo = _dense(next(keys), hidden_dim, hidden_dim)
    wf1, bf1 = _dense(next(keys), hidden_dim, dim_ff)
    wf2, bf2 = _dense(next(keys), dim_ff, hidden_dim)
    params["ru"] = dict(
        wq=wqkv[:, 0:H], wk=wqkv[:, H:2 * H], wv=wqkv[:, 2 * H:3 * H],
        bq=bqkv[0:H], bk=bqkv[H:2 * H], bv=bqkv[2 * H:3 * H],
        wo=wo, bo=bo,
        wf1=wf1.astype(jnp.bfloat16), bf1=bf1,
        wf2=wf2.astype(jnp.bfloat16), bf2=bf2,
        g1=jnp.ones((H,), jnp.float32), be1=jnp.zeros((H,), jnp.float32),
        g2=jnp.ones((H,), jnp.float32), be2=jnp.zeros((H,), jnp.float32),
    )
    return params


# ----------------------------------------------------------------------------
if __name__ == "__main__":
    INPUT_DIM, HIDDEN_DIM, OUT_DIM = 16, 32, 8
    NUM_LAYERS, NHEAD = 3, 4
    NUM_GRAPHS, NODES_PER_GRAPH = 8, 8
    N = NUM_GRAPHS * NODES_PER_GRAPH          # 64 nodes
    E = 256                                   # edges

    root = jax.random.PRNGKey(0)
    k_x, k_src, k_off, k_par = jax.random.split(root, 4)

    # Node features and graph-membership vector.
    x = jax.random.normal(k_x, (N, INPUT_DIM), jnp.float32)
    batch = jnp.arange(N, dtype=jnp.int32) // NODES_PER_GRAPH

    # Random intra-graph directed edges -> dense adjacency A[dst, src].
    src = jax.random.randint(k_src, (E,), 0, N)
    dst = (src // NODES_PER_GRAPH) * NODES_PER_GRAPH + jax.random.randint(
        k_off, (E,), 0, NODES_PER_GRAPH)
    edge_index = jnp.stack([src, dst], axis=0)
    adj = jnp.zeros((N, N), jnp.float32).at[dst, src].add(1.0)

    # global_add_pool as a (G, N) one-hot assignment matrix.
    pool_mat = (batch[None, :] == jnp.arange(NUM_GRAPHS, dtype=jnp.int32)[:, None]
                ).astype(jnp.float32)

    params = init_params(k_par, INPUT_DIM, HIDDEN_DIM, OUT_DIM, NUM_LAYERS)

    pred_o, pred_e, emb_o, emb_e = ginru_forward(params, x, adj, pool_mat, NHEAD)
    jax.block_until_ready((pred_o, pred_e, emb_o, emb_e))

    assert pred_o.shape == (NUM_GRAPHS, OUT_DIM)
    assert pred_e.shape == (NUM_GRAPHS, OUT_DIM)
    assert emb_o.shape == (NUM_GRAPHS, HIDDEN_DIM)
    assert emb_e.shape == (NUM_GRAPHS, HIDDEN_DIM)
    assert bool(jnp.all(jnp.isfinite(pred_o))) and bool(jnp.all(jnp.isfinite(pred_e)))
    _ = edge_index  # kept to mirror the PyG Data fields
    print("KERNEL_OK")
</pallas_src>

<mosaic_0001>
module attributes {stable_mosaic.version = 11 : i64} {
  func.func @_ginru_fused_kernel(%arg0: memref<64x64xf32, #tpu.memory_space<vmem>>, %arg1: memref<64x16xf32, #tpu.memory_space<vmem>>, %arg2: memref<8x64xf32, #tpu.memory_space<vmem>>, %arg3: memref<3xf32, #tpu.memory_space<smem>>, %arg4: memref<16x32xf32, #tpu.memory_space<vmem>>, %arg5: memref<1x32xf32, #tpu.memory_space<vmem>>, %arg6: memref<32x32xf32, #tpu.memory_space<vmem>>, %arg7: memref<1x32xf32, #tpu.memory_space<vmem>>, %arg8: memref<32x32xf32, #tpu.memory_space<vmem>>, %arg9: memref<32x32xf32, #tpu.memory_space<vmem>>, %arg10: memref<1x32xf32, #tpu.memory_space<vmem>>, %arg11: memref<32x32xf32, #tpu.memory_space<vmem>>, %arg12: memref<1x32xf32, #tpu.memory_space<vmem>>, %arg13: memref<32x32xf32, #tpu.memory_space<vmem>>, %arg14: memref<32x32xf32, #tpu.memory_space<vmem>>, %arg15: memref<1x32xf32, #tpu.memory_space<vmem>>, %arg16: memref<32x32xf32, #tpu.memory_space<vmem>>, %arg17: memref<1x32xf32, #tpu.memory_space<vmem>>, %arg18: memref<32x32xf32, #tpu.memory_space<vmem>>, %arg19: memref<1x32xf32, #tpu.memory_space<vmem>>, %arg20: memref<32x32xf32, #tpu.memory_space<vmem>>, %arg21: memref<1x32xf32, #tpu.memory_space<vmem>>, %arg22: memref<32x8xf32, #tpu.memory_space<vmem>>, %arg23: memref<1x8xf32, #tpu.memory_space<vmem>>, %arg24: memref<32x32xf32, #tpu.memory_space<vmem>>, %arg25: memref<1x32xf32, #tpu.memory_space<vmem>>, %arg26: memref<32x8xf32, #tpu.memory_space<vmem>>, %arg27: memref<1x8xf32, #tpu.memory_space<vmem>>, %arg28: memref<32x32xf32, #tpu.memory_space<vmem>>, %arg29: memref<1x32xf32, #tpu.memory_space<vmem>>, %arg30: memref<32x32xf32, #tpu.memory_space<vmem>>, %arg31: memref<1x32xf32, #tpu.memory_space<vmem>>, %arg32: memref<32x32xf32, #tpu.memory_space<vmem>>, %arg33: memref<1x32xf32, #tpu.memory_space<vmem>>, %arg34: memref<32x32xf32, #tpu.memory_space<vmem>>, %arg35: memref<1x32xf32, #tpu.memory_space<vmem>>, %arg36: memref<1x32xf32, #tpu.memory_space<vmem>>, %arg37: memref<1x32xf32, #tpu.memory_space<vmem>>, %arg38: memref<32x2048xbf16, #tpu.memory_space<vmem>>, %arg39: memref<1x2048xf32, #tpu.memory_space<vmem>>, %arg40: memref<2048x32xbf16, #tpu.memory_space<vmem>>, %arg41: memref<1x32xf32, #tpu.memory_space<vmem>>, %arg42: memref<1x32xf32, #tpu.memory_space<vmem>>, %arg43: memref<1x32xf32, #tpu.memory_space<vmem>>, %arg44: memref<8x8xf32, #tpu.memory_space<vmem>>, %arg45: memref<8x8xf32, #tpu.memory_space<vmem>>, %arg46: memref<8x32xf32, #tpu.memory_space<vmem>>, %arg47: memref<8x32xf32, #tpu.memory_space<vmem>>) attributes {dimension_semantics = [], scalar_prefetch = 0 : i64, scratch_operands = 0 : i64, tpu.core_type = #tpu.core_type<tc>} {
    %c0 = arith.constant 0 : index
    %c0_0 = arith.constant 0 : index
    %0 = vector.load %arg0[%c0, %c0_0] : memref<64x64xf32, #tpu.memory_space<vmem>>, vector<64x64xf32>
    %c0_1 = arith.constant 0 : index
    %c0_2 = arith.constant 0 : index
    %1 = vector.load %arg1[%c0_1, %c0_2] : memref<64x16xf32, #tpu.memory_space<vmem>>, vector<64x16xf32>
    %c0_3 = arith.constant 0 : index
    %2 = memref.load %arg3[%c0_3] : memref<3xf32, #tpu.memory_space<smem>>
    %cst = arith.constant dense<0.000000e+00> : vector<64x16xf32>
    %3 = tpu.matmul %0, %1, %cst {dimension_numbers = #tpu.dot_dimension_numbers<[1], [0], [0], [1], [0, 0, 1, 1], [], []>} : vector<64x64xf32>, vector<64x16xf32>, vector<64x16xf32> -> vector<64x16xf32>
    %cst_4 = arith.constant 1.000000e+00 : f32
    %4 = arith.addf %cst_4, %2 : f32
    %5 = vector.broadcast %4 : f32 to vector<64x16xf32>
    %6 = arith.mulf %5, %1 : vector<64x16xf32>
    %7 = arith.addf %6, %3 : vector<64x16xf32>
    %c0_5 = arith.constant 0 : index
    %c0_6 = arith.constant 0 : index
    %8 = vector.load %arg4[%c0_5, %c0_6] : memref<16x32xf32, #tpu.memory_space<vmem>>, vector<16x32xf32>
    %cst_7 = arith.constant dense<0.000000e+00> : vector<64x32xf32>
    %9 = tpu.matmul %7, %8, %cst_7 {dimension_numbers = #tpu.dot_dimension_numbers<[1], [0], [0], [1], [0, 0, 1, 1], [], []>} : vector<64x16xf32>, vector<16x32xf32>, vector<64x32xf32> -> vector<64x32xf32>
    %c0_8 = arith.constant 0 : index
    %c0_9 = arith.constant 0 : index
    %10 = vector.load %arg5[%c0_8, %c0_9] : memref<1x32xf32, #tpu.memory_space<vmem>>, vector<1x32xf32>
    %11 = vector.broadcast %10 : vector<1x32xf32> to vector<64x32xf32>
    %12 = arith.addf %9, %11 : vector<64x32xf32>
    %cst_10 = arith.constant 0.000000e+00 : f32
    %13 = vector.broadcast %cst_10 : f32 to vector<64x32xf32>
    %14 = arith.maximumf %12, %13 : vector<64x32xf32>
    %c0_11 = arith.constant 0 : index
    %c0_12 = arith.constant 0 : index
    %15 = vector.load %arg6[%c0_11, %c0_12] : memref<32x32xf32, #tpu.memory_space<vmem>>, vector<32x32xf32>
    %cst_13 = arith.constant dense<0.000000e+00> : vector<64x32xf32>
    %16 = tpu.matmul %14, %15, %cst_13 {dimension_numbers = #tpu.dot_dimension_numbers<[1], [0], [0], [1], [0, 0, 1, 1], [], []>} : vector<64x32xf32>, vector<32x32xf32>, vector<64x32xf32> -> vector<64x32xf32>
    %c0_14 = arith.constant 0 : index
    %c0_15 = arith.constant 0 : index
    %17 = vector.load %arg7[%c0_14, %c0_15] : memref<1x32xf32, #tpu.memory_space<vmem>>, vector<1x32xf32>
    %18 = vector.broadcast %17 : vector<1x32xf32> to vector<64x32xf32>
    %19 = arith.addf %16, %18 : vector<64x32xf32>
    %cst_16 = arith.constant 0.000000e+00 : f32
    %20 = vector.broadcast %cst_16 : f32 to vector<64x32xf32>
    %21 = arith.maximumf %19, %20 : vector<64x32xf32>
    %c0_17 = arith.constant 0 : index
    %c0_18 = arith.constant 0 : index
    %22 = vector.load %arg8[%c0_17, %c0_18] : memref<32x32xf32, #tpu.memory_space<vmem>>, vector<32x32xf32>
    %cst_19 = arith.constant dense<0.000000e+00> : vector<64x32xf32>
    %23 = tpu.matmul %21, %22, %cst_19 {dimension_numbers = #tpu.dot_dimension_numbers<[1], [0], [0], [1], [0, 0, 1, 1], [], []>} : vector<64x32xf32>, vector<32x32xf32>, vector<64x32xf32> -> vector<64x32xf32>
    %c1 = arith.constant 1 : index
    %24 = memref.load %arg3[%c1] : memref<3xf32, #tpu.memory_space<smem>>
    %cst_20 = arith.constant dense<0.000000e+00> : vector<64x32xf32>
    %25 = tpu.matmul %0, %21, %cst_20 {dimension_numbers = #tpu.dot_dimension_numbers<[1], [0], [0], [1], [0, 0, 1, 1], [], []>} : vector<64x64xf32>, vector<64x32xf32>, vector<64x32xf32> -> vector<64x32xf32>
    %cst_21 = arith.constant 1.000000e+00 : f32
    %26 = arith.addf %cst_21, %24 : f32
    %27 = vector.broadcast %26 : f32 to vector<64x32xf32>
    %28 = arith.mulf %27, %21 : vector<64x32xf32>
    %29 = arith.addf %28, %25 : vector<64x32xf32>
    %c0_22 = arith.constant 0 : index
    %c0_23 = arith.constant 0 : index
    %30 = vector.load %arg9[%c0_22, %c0_23] : memref<32x32xf32, #tpu.memory_space<vmem>>, vector<32x32xf32>
    %cst_24 = arith.constant dense<0.000000e+00> : vector<64x32xf32>
    %31 = tpu.matmul %29, %30, %cst_24 {dimension_numbers = #tpu.dot_dimension_numbers<[1], [0], [0], [1], [0, 0, 1, 1], [], []>} : vector<64x32xf32>, vector<32x32xf32>, vector<64x32xf32> -> vector<64x32xf32>
    %c0_25 = arith.constant 0 : index
    %c0_26 = arith.constant 0 : index
    %32 = vector.load %arg10[%c0_25, %c0_26] : memref<1x32xf32, #tpu.memory_space<vmem>>, vector<1x32xf32>
    %33 = vector.broadcast %32 : vector<1x32xf32> to vector<64x32xf32>
    %34 = arith.addf %31, %33 : vector<64x32xf32>
    %cst_27 = arith.constant 0.000000e+00 : f32
    %35 = vector.broadcast %cst_27 : f32 to vector<64x32xf32>
    %36 = arith.maximumf %34, %35 : vector<64x32xf32>
    %c0_28 = arith.constant 0 : index
    %c0_29 = arith.constant 0 : index
    %37 = vector.load %arg11[%c0_28, %c0_29] : memref<32x32xf32, #tpu.memory_space<vmem>>, vector<32x32xf32>
    %cst_30 = arith.constant dense<0.000000e+00> : vector<64x32xf32>
    %38 = tpu.matmul %36, %37, %cst_30 {dimension_numbers = #tpu.dot_dimension_numbers<[1], [0], [0], [1], [0, 0, 1, 1], [], []>} : vector<64x32xf32>, vector<32x32xf32>, vector<64x32xf32> -> vector<64x32xf32>
    %c0_31 = arith.constant 0 : index
    %c0_32 = arith.constant 0 : index
    %39 = vector.load %arg12[%c0_31, %c0_32] : memref<1x32xf32, #tpu.memory_space<vmem>>, vector<1x32xf32>
    %40 = vector.broadcast %39 : vector<1x32xf32> to vector<64x32xf32>
    %41 = arith.addf %38, %40 : vector<64x32xf32>
    %cst_33 = arith.constant 0.000000e+00 : f32
    %42 = vector.broadcast %cst_33 : f32 to vector<64x32xf32>
    %43 = arith.maximumf %41, %42 : vector<64x32xf32>
    %c0_34 = arith.constant 0 : index
    %c0_35 = arith.constant 0 : index
    %44 = vector.load %arg13[%c0_34, %c0_35] : memref<32x32xf32, #tpu.memory_space<vmem>>, vector<32x32xf32>
    %cst_36 = arith.constant dense<0.000000e+00> : vector<64x32xf32>
    %45 = tpu.matmul %43, %44, %cst_36 {dimension_numbers = #tpu.dot_dimension_numbers<[1], [0], [0], [1], [0, 0, 1, 1], [], []>} : vector<64x32xf32>, vector<32x32xf32>, vector<64x32xf32> -> vector<64x32xf32>
    %46 = arith.addf %23, %45 : vector<64x32xf32>
    %c2 = arith.constant 2 : index
    %47 = memref.load %arg3[%c2] : memref<3xf32, #tpu.memory_space<smem>>
    %cst_37 = arith.constant dense<0.000000e+00> : vector<64x32xf32>
    %48 = tpu.matmul %0, %43, %cst_37 {dimension_numbers = #tpu.dot_dimension_numbers<[1], [0], [0], [1], [0, 0, 1, 1], [], []>} : vector<64x64xf32>, vector<64x32xf32>, vector<64x32xf32> -> vector<64x32xf32>
    %cst_38 = arith.constant 1.000000e+00 : f32
    %49 = arith.addf %cst_38, %47 : f32
    %50 = vector.broadcast %49 : f32 to vector<64x32xf32>
    %51 = arith.mulf %50, %43 : vector<64x32xf32>
    %52 = arith.addf %51, %48 : vector<64x32xf32>
    %c0_39 = arith.constant 0 : index
    %c0_40 = arith.constant 0 : index
    %53 = vector.load %arg14[%c0_39, %c0_40] : memref<32x32xf32, #tpu.memory_space<vmem>>, vector<32x32xf32>
    %cst_41 = arith.constant dense<0.000000e+00> : vector<64x32xf32>
    %54 = tpu.matmul %52, %53, %cst_41 {dimension_numbers = #tpu.dot_dimension_numbers<[1], [0], [0], [1], [0, 0, 1, 1], [], []>} : vector<64x32xf32>, vector<32x32xf32>, vector<64x32xf32> -> vector<64x32xf32>
    %c0_42 = arith.constant 0 : index
    %c0_43 = arith.constant 0 : index
    %55 = vector.load %arg15[%c0_42, %c0_43] : memref<1x32xf32, #tpu.memory_space<vmem>>, vector<1x32xf32>
    %56 = vector.broadcast %55 : vector<1x32xf32> to vector<64x32xf32>
    %57 = arith.addf %54, %56 : vector<64x32xf32>
    %cst_44 = arith.constant 0.000000e+00 : f32
    %58 = vector.broadcast %cst_44 : f32 to vector<64x32xf32>
    %59 = arith.maximumf %57, %58 : vector<64x32xf32>
    %c0_45 = arith.constant 0 : index
    %c0_46 = arith.constant 0 : index
    %60 = vector.load %arg16[%c0_45, %c0_46] : memref<32x32xf32, #tpu.memory_space<vmem>>, vector<32x32xf32>
    %cst_47 = arith.constant dense<0.000000e+00> : vector<64x32xf32>
    %61 = tpu.matmul %59, %60, %cst_47 {dimension_numbers = #tpu.dot_dimension_numbers<[1], [0], [0], [1], [0, 0, 1, 1], [], []>} : vector<64x32xf32>, vector<32x32xf32>, vector<64x32xf32> -> vector<64x32xf32>
    %c0_48 = arith.constant 0 : index
    %c0_49 = arith.constant 0 : index
    %62 = vector.load %arg17[%c0_48, %c0_49] : memref<1x32xf32, #tpu.memory_space<vmem>>, vector<1x32xf32>
    %63 = vector.broadcast %62 : vector<1x32xf32> to vector<64x32xf32>
    %64 = arith.addf %61, %63 : vector<64x32xf32>
    %cst_50 = arith.constant 0.000000e+00 : f32
    %65 = vector.broadcast %cst_50 : f32 to vector<64x32xf32>
    %66 = arith.maximumf %64, %65 : vector<64x32xf32>
    %c0_51 = arith.constant 0 : index
    %c0_52 = arith.constant 0 : index
    %67 = vector.load %arg18[%c0_51, %c0_52] : memref<32x32xf32, #tpu.memory_space<vmem>>, vector<32x32xf32>
    %cst_53 = arith.constant dense<0.000000e+00> : vector<64x32xf32>
    %68 = tpu.matmul %66, %67, %cst_53 {dimension_numbers = #tpu.dot_dimension_numbers<[1], [0], [0], [1], [0, 0, 1, 1], [], []>} : vector<64x32xf32>, vector<32x32xf32>, vector<64x32xf32> -> vector<64x32xf32>
    %69 = arith.addf %46, %68 : vector<64x32xf32>
    %c0_54 = arith.constant 0 : index
    %c0_55 = arith.constant 0 : index
    %70 = vector.load %arg19[%c0_54, %c0_55] : memref<1x32xf32, #tpu.memory_space<vmem>>, vector<1x32xf32>
    %71 = vector.broadcast %70 : vector<1x32xf32> to vector<64x32xf32>
    %72 = arith.addf %69, %71 : vector<64x32xf32>
    %c0_56 = arith.constant 0 : index
    %c0_57 = arith.constant 0 : index
    %73 = vector.load %arg2[%c0_56, %c0_57] : memref<8x64xf32, #tpu.memory_space<vmem>>, vector<8x64xf32>
    %cst_58 = arith.constant dense<0.000000e+00> : vector<8x32xf32>
    %74 = tpu.matmul %73, %72, %cst_58 {dimension_numbers = #tpu.dot_dimension_numbers<[1], [0], [0], [1], [0, 0, 1, 1], [], []>} : vector<8x64xf32>, vector<64x32xf32>, vector<8x32xf32> -> vector<8x32xf32>
    %c0_59 = arith.constant 0 : index
    %c0_60 = arith.constant 0 : index
    %75 = vector.load %arg46[%c0_59, %c0_60] : memref<8x32xf32, #tpu.memory_space<vmem>>, vector<8x32xf32>
    tpu.vector_store %arg46[%c0_59, %c0_60], %74 {strides = array<i32>} : memref<8x32xf32, #tpu.memory_space<vmem>>, vector<8x32xf32>,
    %c0_61 = arith.constant 0 : index
    %c0_62 = arith.constant 0 : index
    %76 = vector.load %arg20[%c0_61, %c0_62] : memref<32x32xf32, #tpu.memory_space<vmem>>, vector<32x32xf32>
    %cst_63 = arith.constant dense<0.000000e+00> : vector<8x32xf32>
    %77 = tpu.matmul %74, %76, %cst_63 {dimension_numbers = #tpu.dot_dimension_numbers<[1], [0], [0], [1], [0, 0, 1, 1], [], []>} : vector<8x32xf32>, vector<32x32xf32>, vector<8x32xf32> -> vector<8x32xf32>
    %c0_64 = arith.constant 0 : index
    %c0_65 = arith.constant 0 : index
    %78 = vector.load %arg21[%c0_64, %c0_65] : memref<1x32xf32, #tpu.memory_space<vmem>>, vector<1x32xf32>
    %79 = vector.broadcast %78 : vector<1x32xf32> to vector<8x32xf32>
    %80 = arith.addf %77, %79 : vector<8x32xf32>
    %cst_66 = arith.constant 0.000000e+00 : f32
    %81 = vector.broadcast %cst_66 : f32 to vector<8x32xf32>
    %82 = arith.maximumf %80, %81 : vector<8x32xf32>
    %c0_67 = arith.constant 0 : index
    %c0_68 = arith.constant 0 : index
    %83 = vector.load %arg22[%c0_67, %c0_68] : memref<32x8xf32, #tpu.memory_space<vmem>>, vector<32x8xf32>
    %cst_69 = arith.constant dense<0.000000e+00> : vector<8x8xf32>
    %84 = tpu.matmul %82, %83, %cst_69 {dimension_numbers = #tpu.dot_dimension_numbers<[1], [0], [0], [1], [0, 0, 1, 1], [], []>} : vector<8x32xf32>, vector<32x8xf32>, vector<8x8xf32> -> vector<8x8xf32>
    %c0_70 = arith.constant 0 : index
    %c0_71 = arith.constant 0 : index
    %85 = vector.load %arg23[%c0_70, %c0_71] : memref<1x8xf32, #tpu.memory_space<vmem>>, vector<1x8xf32>
    %86 = vector.broadcast %85 : vector<1x8xf32> to vector<8x8xf32>
    %87 = arith.addf %84, %86 : vector<8x8xf32>
    %c0_72 = arith.constant 0 : index
    %c0_73 = arith.constant 0 : index
    %88 = vector.load %arg44[%c0_72, %c0_73] : memref<8x8xf32, #tpu.memory_space<vmem>>, vector<8x8xf32>
    tpu.vector_store %arg44[%c0_72, %c0_73], %87 {strides = array<i32>} : memref<8x8xf32, #tpu.memory_space<vmem>>, vector<8x8xf32>,
    %c0_74 = arith.constant 0 : index
    %c0_75 = arith.constant 0 : index
    %89 = vector.load %arg28[%c0_74, %c0_75] : memref<32x32xf32, #tpu.memory_space<vmem>>, vector<32x32xf32>
    %cst_76 = arith.constant dense<0.000000e+00> : vector<8x32xf32>
    %90 = tpu.matmul %74, %89, %cst_76 {dimension_numbers = #tpu.dot_dimension_numbers<[1], [0], [0], [1], [0, 0, 1, 1], [], []>} : vector<8x32xf32>, vector<32x32xf32>, vector<8x32xf32> -> vector<8x32xf32>
    %c0_77 = arith.constant 0 : index
    %c0_78 = arith.constant 0 : index
    %91 = vector.load %arg29[%c0_77, %c0_78] : memref<1x32xf32, #tpu.memory_space<vmem>>, vector<1x32xf32>
    %92 = vector.broadcast %91 : vector<1x32xf32> to vector<8x32xf32>
    %93 = arith.addf %90, %92 : vector<8x32xf32>
    %c0_79 = arith.constant 0 : index
    %c0_80 = arith.constant 0 : index
    %94 = vector.load %arg30[%c0_79, %c0_80] : memref<32x32xf32, #tpu.memory_space<vmem>>, vector<32x32xf32>
    %cst_81 = arith.constant dense<0.000000e+00> : vector<8x32xf32>
    %95 = tpu.matmul %74, %94, %cst_81 {dimension_numbers = #tpu.dot_dimension_numbers<[1], [0], [0], [1], [0, 0, 1, 1], [], []>} : vector<8x32xf32>, vector<32x32xf32>, vector<8x32xf32> -> vector<8x32xf32>
    %c0_82 = arith.constant 0 : index
    %c0_83 = arith.constant 0 : index
    %96 = vector.load %arg31[%c0_82, %c0_83] : memref<1x32xf32, #tpu.memory_space<vmem>>, vector<1x32xf32>
    %97 = vector.broadcast %96 : vector<1x32xf32> to vector<8x32xf32>
    %98 = arith.addf %95, %97 : vector<8x32xf32>
    %c0_84 = arith.constant 0 : index
    %c0_85 = arith.constant 0 : index
    %99 = vector.load %arg32[%c0_84, %c0_85] : memref<32x32xf32, #tpu.memory_space<vmem>>, vector<32x32xf32>
    %cst_86 = arith.constant dense<0.000000e+00> : vector<8x32xf32>
    %100 = tpu.matmul %74, %99, %cst_86 {dimension_numbers = #tpu.dot_dimension_numbers<[1], [0], [0], [1], [0, 0, 1, 1], [], []>} : vector<8x32xf32>, vector<32x32xf32>, vector<8x32xf32> -> vector<8x32xf32>
    %c0_87 = arith.constant 0 : index
    %c0_88 = arith.constant 0 : index
    %101 = vector.load %arg33[%c0_87, %c0_88] : memref<1x32xf32, #tpu.memory_space<vmem>>, vector<1x32xf32>
    %102 = vector.broadcast %101 : vector<1x32xf32> to vector<8x32xf32>
    %103 = arith.addf %100, %102 : vector<8x32xf32>
    %104 = tpu.iota {dimensions = array<i32: 1>} : vector<1x32xi32>
    %cst_89 = arith.constant 0.000000e+00 : f32
    %105 = vector.broadcast %cst_89 : f32 to vector<8x32xf32>
    %c0_i32 = arith.constant 0 : i32
    %106 = vector.broadcast %c0_i32 : i32 to vector<1x32xi32>
    %107 = arith.cmpi sge, %104, %106 : vector<1x32xi32>
    %c8_i32 = arith.constant 8 : i32
    %108 = vector.broadcast %c8_i32 : i32 to vector<1x32xi32>
    %109 = arith.cmpi slt, %104, %108 : vector<1x32xi32>
    %110 = arith.andi %107, %109 : vector<1x32xi1>
    %cst_90 = arith.constant 1.000000e+00 : f32
    %cst_91 = arith.constant 0.000000e+00 : f32
    %111 = vector.broadcast %cst_90 : f32 to vector<1x32xf32>
    %112 = vector.broadcast %cst_91 : f32 to vector<1x32xf32>
    %113 = arith.select %110, %111, %112 : vector<1x32xi1>, vector<1x32xf32>
    %114 = vector.broadcast %113 : vector<1x32xf32> to vector<8x32xf32>
    %115 = arith.mulf %93, %114 : vector<8x32xf32>
    %cst_92 = arith.constant dense<0.000000e+00> : vector<8x8xf32>
    %116 = tpu.matmul %115, %98, %cst_92 {dimension_numbers = #tpu.dot_dimension_numbers<[1], [1], [0], [0], [0, 0, 1, 0], [], []>} : vector<8x32xf32>, vector<8x32xf32>, vector<8x8xf32> -> vector<8x8xf32>
    %cst_93 = arith.constant 0.353553385 : f32
    %117 = vector.broadcast %cst_93 : f32 to vector<8x8xf32>
    %118 = arith.mulf %116, %117 : vector<8x8xf32>
    %cst_94 = arith.constant dense<0xFF800000> : vector<8xf32>
    %119 = vector.multi_reduction <maximumf>, %118, %cst_94 [1] : vector<8x8xf32> to vector<8xf32>
    %120 = vector.shape_cast %119 : vector<8xf32> to vector<8x1xf32>
    %121 = vector.broadcast %120 : vector<8x1xf32> to vector<8x8xf32>
    %122 = arith.subf %118, %121 : vector<8x8xf32>
    %123 = math.exp %122 : vector<8x8xf32>
    %cst_95 = arith.constant dense<0.000000e+00> : vector<8xf32>
    %124 = vector.multi_reduction <add>, %123, %cst_95 [1] : vector<8x8xf32> to vector<8xf32>
    %125 = vector.shape_cast %124 : vector<8xf32> to vector<8x1xf32>
    %126 = tpu.reciprocal %125 {approx = true} : vector<8x1xf32> -> vector<8x1xf32>
    %127 = vector.broadcast %126 : vector<8x1xf32> to vector<8x8xf32>
    %128 = arith.mulf %123, %127 : vector<8x8xf32>
    %cst_96 = arith.constant dense<0.000000e+00> : vector<8x32xf32>
    %129 = tpu.matmul %128, %103, %cst_96 {dimension_numbers = #tpu.dot_dimension_numbers<[1], [0], [0], [1], [0, 0, 1, 1], [], []>} : vector<8x8xf32>, vector<8x32xf32>, vector<8x32xf32> -> vector<8x32xf32>
    %130 = vector.broadcast %113 : vector<1x32xf32> to vector<8x32xf32>
    %131 = arith.mulf %129, %130 : vector<8x32xf32>
    %132 = arith.addf %105, %131 : vector<8x32xf32>
    %c8_i32_97 = arith.constant 8 : i32
    %133 = vector.broadcast %c8_i32_97 : i32 to vector<1x32xi32>
    %134 = arith.cmpi sge, %104, %133 : vector<1x32xi32>
    %c16_i32 = arith.constant 16 : i32
    %135 = vector.broadcast %c16_i32 : i32 to vector<1x32xi32>
    %136 = arith.cmpi slt, %104, %135 : vector<1x32xi32>
    %137 = arith.andi %134, %136 : vector<1x32xi1>
    %cst_98 = arith.constant 1.000000e+00 : f32
    %cst_99 = arith.constant 0.000000e+00 : f32
    %138 = vector.broadcast %cst_98 : f32 to vector<1x32xf32>
    %139 = vector.broadcast %cst_99 : f32 to vector<1x32xf32>
    %140 = arith.select %137, %138, %139 : vector<1x32xi1>, vector<1x32xf32>
    %141 = vector.broadcast %140 : vector<1x32xf32> to vector<8x32xf32>
    %142 = arith.mulf %93, %141 : vector<8x32xf32>
    %cst_100 = arith.constant dense<0.000000e+00> : vector<8x8xf32>
    %143 = tpu.matmul %142, %98, %cst_100 {dimension_numbers = #tpu.dot_dimension_numbers<[1], [1], [0], [0], [0, 0, 1, 0], [], []>} : vector<8x32xf32>, vector<8x32xf32>, vector<8x8xf32> -> vector<8x8xf32>
    %cst_101 = arith.constant 0.353553385 : f32
    %144 = vector.broadcast %cst_101 : f32 to vector<8x8xf32>
    %145 = arith.mulf %143, %144 : vector<8x8xf32>
    %cst_102 = arith.constant dense<0xFF800000> : vector<8xf32>
    %146 = vector.multi_reduction <maximumf>, %145, %cst_102 [1] : vector<8x8xf32> to vector<8xf32>
    %147 = vector.shape_cast %146 : vector<8xf32> to vector<8x1xf32>
    %148 = vector.broadcast %147 : vector<8x1xf32> to vector<8x8xf32>
    %149 = arith.subf %145, %148 : vector<8x8xf32>
    %150 = math.exp %149 : vector<8x8xf32>
    %cst_103 = arith.constant dense<0.000000e+00> : vector<8xf32>
    %151 = vector.multi_reduction <add>, %150, %cst_103 [1] : vector<8x8xf32> to vector<8xf32>
    %152 = vector.shape_cast %151 : vector<8xf32> to vector<8x1xf32>
    %153 = tpu.reciprocal %152 {approx = true} : vector<8x1xf32> -> vector<8x1xf32>
    %154 = vector.broadcast %153 : vector<8x1xf32> to vector<8x8xf32>
    %155 = arith.mulf %150, %154 : vector<8x8xf32>
    %cst_104 = arith.constant dense<0.000000e+00> : vector<8x32xf32>
    %156 = tpu.matmul %155, %103, %cst_104 {dimension_numbers = #tpu.dot_dimension_numbers<[1], [0], [0], [1], [0, 0, 1, 1], [], []>} : vector<8x8xf32>, vector<8x32xf32>, vector<8x32xf32> -> vector<8x32xf32>
    %157 = vector.broadcast %140 : vector<1x32xf32> to vector<8x32xf32>
    %158 = arith.mulf %156, %157 : vector<8x32xf32>
    %159 = arith.addf %132, %158 : vector<8x32xf32>
    %c16_i32_105 = arith.constant 16 : i32
    %160 = vector.broadcast %c16_i32_105 : i32 to vector<1x32xi32>
    %161 = arith.cmpi sge, %104, %160 : vector<1x32xi32>
    %c24_i32 = arith.constant 24 : i32
    %162 = vector.broadcast %c24_i32 : i32 to vector<1x32xi32>
    %163 = arith.cmpi slt, %104, %162 : vector<1x32xi32>
    %164 = arith.andi %161, %163 : vector<1x32xi1>
    %cst_106 = arith.constant 1.000000e+00 : f32
    %cst_107 = arith.constant 0.000000e+00 : f32
    %165 = vector.broadcast %cst_106 : f32 to vector<1x32xf32>
    %166 = vector.broadcast %cst_107 : f32 to vector<1x32xf32>
    %167 = arith.select %164, %165, %166 : vector<1x32xi1>, vector<1x32xf32>
    %168 = vector.broadcast %167 : vector<1x32xf32> to vector<8x32xf32>
    %169 = arith.mulf %93, %168 : vector<8x32xf32>
    %cst_108 = arith.constant dense<0.000000e+00> : vector<8x8xf32>
    %170 = tpu.matmul %169, %98, %cst_108 {dimension_numbers = #tpu.dot_dimension_numbers<[1], [1], [0], [0], [0, 0, 1, 0], [], []>} : vector<8x32xf32>, vector<8x32xf32>, vector<8x8xf32> -> vector<8x8xf32>
    %cst_109 = arith.constant 0.353553385 : f32
    %171 = vector.broadcast %cst_109 : f32 to vector<8x8xf32>
    %172 = arith.mulf %170, %171 : vector<8x8xf32>
    %cst_110 = arith.constant dense<0xFF800000> : vector<8xf32>
    %173 = vector.multi_reduction <maximumf>, %172, %cst_110 [1] : vector<8x8xf32> to vector<8xf32>
    %174 = vector.shape_cast %173 : vector<8xf32> to vector<8x1xf32>
    %175 = vector.broadcast %174 : vector<8x1xf32> to vector<8x8xf32>
    %176 = arith.subf %172, %175 : vector<8x8xf32>
    %177 = math.exp %176 : vector<8x8xf32>
    %cst_111 = arith.constant dense<0.000000e+00> : vector<8xf32>
    %178 = vector.multi_reduction <add>, %177, %cst_111 [1] : vector<8x8xf32> to vector<8xf32>
    %179 = vector.shape_cast %178 : vector<8xf32> to vector<8x1xf32>
    %180 = tpu.reciprocal %179 {approx = true} : vector<8x1xf32> -> vector<8x1xf32>
    %181 = vector.broadcast %180 : vector<8x1xf32> to vector<8x8xf32>
    %182 = arith.mulf %177, %181 : vector<8x8xf32>
    %cst_112 = arith.constant dense<0.000000e+00> : vector<8x32xf32>
    %183 = tpu.matmul %182, %103, %cst_112 {dimension_numbers = #tpu.dot_dimension_numbers<[1], [0], [0], [1], [0, 0, 1, 1], [], []>} : vector<8x8xf32>, vector<8x32xf32>, vector<8x32xf32> -> vector<8x32xf32>
    %184 = vector.broadcast %167 : vector<1x32xf32> to vector<8x32xf32>
    %185 = arith.mulf %183, %184 : vector<8x32xf32>
    %186 = arith.addf %159, %185 : vector<8x32xf32>
    %c24_i32_113 = arith.constant 24 : i32
    %187 = vector.broadcast %c24_i32_113 : i32 to vector<1x32xi32>
    %188 = arith.cmpi sge, %104, %187 : vector<1x32xi32>
    %c32_i32 = arith.constant 32 : i32
    %189 = vector.broadcast %c32_i32 : i32 to vector<1x32xi32>
    %190 = arith.cmpi slt, %104, %189 : vector<1x32xi32>
    %191 = arith.andi %188, %190 : vector<1x32xi1>
    %cst_114 = arith.constant 1.000000e+00 : f32
    %cst_115 = arith.constant 0.000000e+00 : f32
    %192 = vector.broadcast %cst_114 : f32 to vector<1x32xf32>
    %193 = vector.broadcast %cst_115 : f32 to vector<1x32xf32>
    %194 = arith.select %191, %192, %193 : vector<1x32xi1>, vector<1x32xf32>
    %195 = vector.broadcast %194 : vector<1x32xf32> to vector<8x32xf32>
    %196 = arith.mulf %93, %195 : vector<8x32xf32>
    %cst_116 = arith.constant dense<0.000000e+00> : vector<8x8xf32>
    %197 = tpu.matmul %196, %98, %cst_116 {dimension_numbers = #tpu.dot_dimension_numbers<[1], [1], [0], [0], [0, 0, 1, 0], [], []>} : vector<8x32xf32>, vector<8x32xf32>, vector<8x8xf32> -> vector<8x8xf32>
    %cst_117 = arith.constant 0.353553385 : f32
    %198 = vector.broadcast %cst_117 : f32 to vector<8x8xf32>
    %199 = arith.mulf %197, %198 : vector<8x8xf32>
    %cst_118 = arith.constant dense<0xFF800000> : vector<8xf32>
    %200 = vector.multi_reduction <maximumf>, %199, %cst_118 [1] : vector<8x8xf32> to vector<8xf32>
    %201 = vector.shape_cast %200 : vector<8xf32> to vector<8x1xf32>
    %202 = vector.broadcast %201 : vector<8x1xf32> to vector<8x8xf32>
    %203 = arith.subf %199, %202 : vector<8x8xf32>
    %204 = math.exp %203 : vector<8x8xf32>
    %cst_119 = arith.constant dense<0.000000e+00> : vector<8xf32>
    %205 = vector.multi_reduction <add>, %204, %cst_119 [1] : vector<8x8xf32> to vector<8xf32>
    %206 = vector.shape_cast %205 : vector<8xf32> to vector<8x1xf32>
    %207 = tpu.reciprocal %206 {approx = true} : vector<8x1xf32> -> vector<8x1xf32>
    %208 = vector.broadcast %207 : vector<8x1xf32> to vector<8x8xf32>
    %209 = arith.mulf %204, %208 : vector<8x8xf32>
    %cst_120 = arith.constant dense<0.000000e+00> : vector<8x32xf32>
    %210 = tpu.matmul %209, %103, %cst_120 {dimension_numbers = #tpu.dot_dimension_numbers<[1], [0], [0], [1], [0, 0, 1, 1], [], []>} : vector<8x8xf32>, vector<8x32xf32>, vector<8x32xf32> -> vector<8x32xf32>
    %211 = vector.broadcast %194 : vector<1x32xf32> to vector<8x32xf32>
    %212 = arith.mulf %210, %211 : vector<8x32xf32>
    %213 = arith.addf %186, %212 : vector<8x32xf32>
    %c0_121 = arith.constant 0 : index
    %c0_122 = arith.constant 0 : index
    %214 = vector.load %arg34[%c0_121, %c0_122] : memref<32x32xf32, #tpu.memory_space<vmem>>, vector<32x32xf32>
    %cst_123 = arith.constant dense<0.000000e+00> : vector<8x32xf32>
    %215 = tpu.matmul %213, %214, %cst_123 {dimension_numbers = #tpu.dot_dimension_numbers<[1], [0], [0], [1], [0, 0, 1, 1], [], []>} : vector<8x32xf32>, vector<32x32xf32>, vector<8x32xf32> -> vector<8x32xf32>
    %c0_124 = arith.constant 0 : index
    %c0_125 = arith.constant 0 : index
    %216 = vector.load %arg35[%c0_124, %c0_125] : memref<1x32xf32, #tpu.memory_space<vmem>>, vector<1x32xf32>
    %217 = vector.broadcast %216 : vector<1x32xf32> to vector<8x32xf32>
    %218 = arith.addf %215, %217 : vector<8x32xf32>
    %219 = arith.addf %74, %218 : vector<8x32xf32>
    %c0_126 = arith.constant 0 : index
    %c0_127 = arith.constant 0 : index
    %220 = vector.load %arg36[%c0_126, %c0_127] : memref<1x32xf32, #tpu.memory_space<vmem>>, vector<1x32xf32>
    %c0_128 = arith.constant 0 : index
    %c0_129 = arith.constant 0 : index
    %221 = vector.load %arg37[%c0_128, %c0_129] : memref<1x32xf32, #tpu.memory_space<vmem>>, vector<1x32xf32>
    %cst_130 = arith.constant dense<0.000000e+00> : vector<8xf32>
    %222 = vector.multi_reduction <add>, %219, %cst_130 [1] : vector<8x32xf32> to vector<8xf32>
    %223 = vector.shape_cast %222 : vector<8xf32> to vector<8x1xf32>
    %cst_131 = arith.constant 3.200000e+01 : f32
    %224 = vector.broadcast %cst_131 : f32 to vector<8x1xf32>
    %225 = arith.divf %223, %224 : vector<8x1xf32>
    %226 = vector.broadcast %225 : vector<8x1xf32> to vector<8x32xf32>
    %227 = arith.subf %219, %226 : vector<8x32xf32>
    %228 = arith.mulf %227, %227 : vector<8x32xf32>
    %cst_132 = arith.constant dense<0.000000e+00> : vector<8xf32>
    %229 = vector.multi_reduction <add>, %228, %cst_132 [1] : vector<8x32xf32> to vector<8xf32>
    %230 = vector.shape_cast %229 : vector<8xf32> to vector<8x1xf32>
    %cst_133 = arith.constant 3.200000e+01 : f32
    %231 = vector.broadcast %cst_133 : f32 to vector<8x1xf32>
    %232 = arith.divf %230, %231 : vector<8x1xf32>
    %233 = vector.broadcast %225 : vector<8x1xf32> to vector<8x32xf32>
    %234 = arith.subf %219, %233 : vector<8x32xf32>
    %cst_134 = arith.constant 9.99999974E-6 : f32
    %235 = vector.broadcast %cst_134 : f32 to vector<8x1xf32>
    %236 = arith.addf %232, %235 : vector<8x1xf32>
    %237 = math.rsqrt %236 : vector<8x1xf32>
    %238 = vector.broadcast %237 : vector<8x1xf32> to vector<8x32xf32>
    %239 = arith.mulf %234, %238 : vector<8x32xf32>
    %240 = vector.broadcast %220 : vector<1x32xf32> to vector<8x32xf32>
    %241 = arith.mulf %239, %240 : vector<8x32xf32>
    %242 = vector.broadcast %221 : vector<1x32xf32> to vector<8x32xf32>
    %243 = arith.addf %241, %242 : vector<8x32xf32>
    %244 = arith.truncf %243 : vector<8x32xf32> to vector<8x32xbf16>
    %c0_135 = arith.constant 0 : index
    %c0_136 = arith.constant 0 : index
    %245 = vector.load %arg38[%c0_135, %c0_136] : memref<32x2048xbf16, #tpu.memory_space<vmem>>, vector<32x2048xbf16>
    %cst_137 = arith.constant dense<0.000000e+00> : vector<8x2048xf32>
    %246 = tpu.matmul %244, %245, %cst_137 {dimension_numbers = #tpu.dot_dimension_numbers<[1], [0], [0], [1], [0, 0, 1, 1], [], []>} : vector<8x32xbf16>, vector<32x2048xbf16>, vector<8x2048xf32> -> vector<8x2048xf32>
    %c0_138 = arith.constant 0 : index
    %c0_139 = arith.constant 0 : index
    %247 = vector.load %arg39[%c0_138, %c0_139] : memref<1x2048xf32, #tpu.memory_space<vmem>>, vector<1x2048xf32>
    %248 = vector.broadcast %247 : vector<1x2048xf32> to vector<8x2048xf32>
    %249 = arith.addf %246, %248 : vector<8x2048xf32>
    %cst_140 = arith.constant 0.000000e+00 : f32
    %250 = vector.broadcast %cst_140 : f32 to vector<8x2048xf32>
    %251 = arith.maximumf %249, %250 : vector<8x2048xf32>
    %252 = arith.truncf %251 : vector<8x2048xf32> to vector<8x2048xbf16>
    %c0_141 = arith.constant 0 : index
    %c0_142 = arith.constant 0 : index
    %253 = vector.load %arg40[%c0_141, %c0_142] : memref<2048x32xbf16, #tpu.memory_space<vmem>>, vector<2048x32xbf16>
    %cst_143 = arith.constant dense<0.000000e+00> : vector<8x32xf32>
    %254 = tpu.matmul %252, %253, %cst_143 {dimension_numbers = #tpu.dot_dimension_numbers<[1], [0], [0], [1], [0, 0, 1, 1], [], []>} : vector<8x2048xbf16>, vector<2048x32xbf16>, vector<8x32xf32> -> vector<8x32xf32>
    %c0_144 = arith.constant 0 : index
    %c0_145 = arith.constant 0 : index
    %255 = vector.load %arg41[%c0_144, %c0_145] : memref<1x32xf32, #tpu.memory_space<vmem>>, vector<1x32xf32>
    %256 = vector.broadcast %255 : vector<1x32xf32> to vector<8x32xf32>
    %257 = arith.addf %254, %256 : vector<8x32xf32>
    %258 = arith.addf %243, %257 : vector<8x32xf32>
    %c0_146 = arith.constant 0 : index
    %c0_147 = arith.constant 0 : index
    %259 = vector.load %arg42[%c0_146, %c0_147] : memref<1x32xf32, #tpu.memory_space<vmem>>, vector<1x32xf32>
    %c0_148 = arith.constant 0 : index
    %c0_149 = arith.constant 0 : index
    %260 = vector.load %arg43[%c0_148, %c0_149] : memref<1x32xf32, #tpu.memory_space<vmem>>, vector<1x32xf32>
    %cst_150 = arith.constant dense<0.000000e+00> : vector<8xf32>
    %261 = vector.multi_reduction <add>, %258, %cst_150 [1] : vector<8x32xf32> to vector<8xf32>
    %262 = vector.shape_cast %261 : vector<8xf32> to vector<8x1xf32>
    %cst_151 = arith.constant 3.200000e+01 : f32
    %263 = vector.broadcast %cst_151 : f32 to vector<8x1xf32>
    %264 = arith.divf %262, %263 : vector<8x1xf32>
    %265 = vector.broadcast %264 : vector<8x1xf32> to vector<8x32xf32>
    %266 = arith.subf %258, %265 : vector<8x32xf32>
    %267 = arith.mulf %266, %266 : vector<8x32xf32>
    %cst_152 = arith.constant dense<0.000000e+00> : vector<8xf32>
    %268 = vector.multi_reduction <add>, %267, %cst_152 [1] : vector<8x32xf32> to vector<8xf32>
    %269 = vector.shape_cast %268 : vector<8xf32> to vector<8x1xf32>
    %cst_153 = arith.constant 3.200000e+01 : f32
    %270 = vector.broadcast %cst_153 : f32 to vector<8x1xf32>
    %271 = arith.divf %269, %270 : vector<8x1xf32>
    %272 = vector.broadcast %264 : vector<8x1xf32> to vector<8x32xf32>
    %273 = arith.subf %258, %272 : vector<8x32xf32>
    %cst_154 = arith.constant 9.99999974E-6 : f32
    %274 = vector.broadcast %cst_154 : f32 to vector<8x1xf32>
    %275 = arith.addf %271, %274 : vector<8x1xf32>
    %276 = math.rsqrt %275 : vector<8x1xf32>
    %277 = vector.broadcast %276 : vector<8x1xf32> to vector<8x32xf32>
    %278 = arith.mulf %273, %277 : vector<8x32xf32>
    %279 = vector.broadcast %259 : vector<1x32xf32> to vector<8x32xf32>
    %280 = arith.mulf %278, %279 : vector<8x32xf32>
    %281 = vector.broadcast %260 : vector<1x32xf32> to vector<8x32xf32>
    %282 = arith.addf %280, %281 : vector<8x32xf32>
    %c0_155 = arith.constant 0 : index
    %c0_156 = arith.constant 0 : index
    %283 = vector.load %arg47[%c0_155, %c0_156] : memref<8x32xf32, #tpu.memory_space<vmem>>, vector<8x32xf32>
    tpu.vector_store %arg47[%c0_155, %c0_156], %282 {strides = array<i32>} : memref<8x32xf32, #tpu.memory_space<vmem>>, vector<8x32xf32>,
    %c0_157 = arith.constant 0 : index
    %c0_158 = arith.constant 0 : index
    %284 = vector.load %arg24[%c0_157, %c0_158] : memref<32x32xf32, #tpu.memory_space<vmem>>, vector<32x32xf32>
    %cst_159 = arith.constant dense<0.000000e+00> : vector<8x32xf32>
    %285 = tpu.matmul %282, %284, %cst_159 {dimension_numbers = #tpu.dot_dimension_numbers<[1], [0], [0], [1], [0, 0, 1, 1], [], []>} : vector<8x32xf32>, vector<32x32xf32>, vector<8x32xf32> -> vector<8x32xf32>
    %c0_160 = arith.constant 0 : index
    %c0_161 = arith.constant 0 : index
    %286 = vector.load %arg25[%c0_160, %c0_161] : memref<1x32xf32, #tpu.memory_space<vmem>>, vector<1x32xf32>
    %287 = vector.broadcast %286 : vector<1x32xf32> to vector<8x32xf32>
    %288 = arith.addf %285, %287 : vector<8x32xf32>
    %cst_162 = arith.constant 0.000000e+00 : f32
    %289 = vector.broadcast %cst_162 : f32 to vector<8x32xf32>
    %290 = arith.maximumf %288, %289 : vector<8x32xf32>
    %c0_163 = arith.constant 0 : index
    %c0_164 = arith.constant 0 : index
    %291 = vector.load %arg26[%c0_163, %c0_164] : memref<32x8xf32, #tpu.memory_space<vmem>>, vector<32x8xf32>
    %cst_165 = arith.constant dense<0.000000e+00> : vector<8x8xf32>
    %292 = tpu.matmul %290, %291, %cst_165 {dimension_numbers = #tpu.dot_dimension_numbers<[1], [0], [0], [1], [0, 0, 1, 1], [], []>} : vector<8x32xf32>, vector<32x8xf32>, vector<8x8xf32> -> vector<8x8xf32>
    %c0_166 = arith.constant 0 : index
    %c0_167 = arith.constant 0 : index
    %293 = vector.load %arg27[%c0_166, %c0_167] : memref<1x8xf32, #tpu.memory_space<vmem>>, vector<1x8xf32>
    %294 = vector.broadcast %293 : vector<1x8xf32> to vector<8x8xf32>
    %295 = arith.addf %292, %294 : vector<8x8xf32>
    %c0_168 = arith.constant 0 : index
    %c0_169 = arith.constant 0 : index
    %296 = vector.load %arg45[%c0_168, %c0_169] : memref<8x8xf32, #tpu.memory_space<vmem>>, vector<8x8xf32>
    tpu.vector_store %arg45[%c0_168, %c0_169], %295 {strides = array<i32>} : memref<8x8xf32, #tpu.memory_space<vmem>>, vector<8x8xf32>,
    return
  }
}

</mosaic_0001>

<bundles_post_ra>
// kernel: tpu_custom_call.1
= control target key start
LH: loop header
LB: loop body
LE: loop exit
PB: predicated region body
PF: predicated region fallthrough
CT: control target
= control target key end

     0   :  { %s7150_s6 = smov 1   ;;  %s7151_s10 = smov 2   ;;  %s8204_s0 = inlined_call_operand.smem [shape: u32[48], index: -1, kind: input, shape index: {}] }
   0x1   :  { %s7215_s5 = sld [smem:[%s8204_s0]]   ;;  %s7152_s14 = smov 3  }
   0x2   :  { %s7220_s9 = sld [smem:[%s8204_s0 + %s7150_s6]]   ;;  %s7153_s18 = smov 4  }
   0x3   :  { %s7225_s13 = sld [smem:[%s8204_s0 + %s7151_s10]]   ;;  %s7154_s22 = smov 5  }
   0x4   :  { %s7230_s17 = sld [smem:[%s8204_s0 + %s7152_s14]]   ;;  %s7155_s26 = smov 6  }
   0x5   :  { %s7235_s21 = sld [smem:[%s8204_s0 + %s7153_s18]]   ;;  %s7156_s30 = smov 7  }
   0x6   :  { %s7240_s25 = sld [smem:[%s8204_s0 + %s7154_s22]]   ;;  %s7157_s4 = smov 8  }
   0x7   :  { %s7245_s29 = sld [smem:[%s8204_s0 + %s7155_s26]]   ;;  %s7158_s10 = smov 9  }
   0x8   :  { %s7250_s3 = sld [smem:[%s8204_s0 + %s7156_s30]]   ;;  %s7159_s15 = smov 10  }
   0x9   :  { %8219 = sst [smem:[#allocation18_spill]] %s7225_s13  ;;  %s7160_s20 = smov 11  }
   0xa   :  { %s7255_s8 = sld [smem:[%s8204_s0 + %s7157_s4]]   ;;  %s7161_s26 = smov 12  }
   0xb   :  { %s7260_s14 = sld [smem:[%s8204_s0 + %s7158_s10]]   ;;  %s7162_s1 = smov 13  }
   0xc   :  { %s7265_s19 = sld [smem:[%s8204_s0 + %s7159_s15]]   ;;  %s7163_s7 = smov 14  }
   0xd   :  { %s7270_s24 = sld [smem:[%s8204_s0 + %s7160_s20]]   ;;  %s7164_s15 = smov 15  }
   0xe   :  { %s7275_s30 = sld [smem:[%s8204_s0 + %s7161_s26]]   ;;  %s7165_s22 = smov 16  }
   0xf   :  { %s7280_s6 = sld [smem:[%s8204_s0 + %s7162_s1]]   ;;  %s7166_s28 = smov 17  }
  0x10   :  { %s7285_s12 = sld [smem:[%s8204_s0 + %s7163_s7]]   ;;  %s7167_s7 = smov 18  }
  0x11   :  { %s7290_s20 = sld [smem:[%s8204_s0 + %s7164_s15]]   ;;  %s7168_s15 = smov 19  }
  0x12   :  { %s7295_s27 = sld [smem:[%s8204_s0 + %s7165_s22]]   ;;  %s7169_s22 = smov 20  }
  0x13   :  { %s7300_s4 = sld [smem:[%s8204_s0 + %s7166_s28]]   ;;  %s7170_s28 = smov 21  }
  0x14   :  { %s7305_s13 = sld [smem:[%s8204_s0 + %s7167_s7]]   ;;  %s7171_s7 = smov 22  }
  0x16   :  { %8220 = sst [smem:[#allocation19_spill]] %s7285_s12 }
  0x17   :  { %8221 = sst [smem:[#allocation20_spill]] %s7290_s20 }
  0x18   :  { %8222 = sst [smem:[#allocation21_spill]] %s7295_s27 }
  0x19   :  { %8223 = sst [smem:[#allocation22_spill]] %s7300_s4 }
  0x1a   :  { %8224 = sst [smem:[#allocation23_spill]] %s7305_s13 }
  0x1b   :  { %s7310_s20 = sld [smem:[%s8204_s0 + %s7168_s15]]   ;;  %s7172_s15 = smov 23  }
  0x1c   :  { %s7315_s27 = sld [smem:[%s8204_s0 + %s7169_s22]]   ;;  %s7173_s22 = smov 24  }
  0x1d   :  { %s7320_s4 = sld [smem:[%s8204_s0 + %s7170_s28]]   ;;  %s7174_s28 = smov 25  }
  0x1e   :  { %s7325_s13 = sld [smem:[%s8204_s0 + %s7171_s7]]   ;;  %s7175_s7 = smov 26  }
  0x21   :  { %8225 = sst [smem:[#allocation24_spill]] %s7310_s20 }
  0x22   :  { %8226 = sst [smem:[#allocation25_spill]] %s7315_s27 }
  0x23   :  { %8227 = sst [smem:[#allocation26_spill]] %s7320_s4 }
  0x24   :  { %8228 = sst [smem:[#allocation27_spill]] %s7325_s13 }
  0x25   :  { %s7330_s20 = sld [smem:[%s8204_s0 + %s7172_s15]]   ;;  %s7176_s15 = smov 27  }
  0x26   :  { %s7335_s27 = sld [smem:[%s8204_s0 + %s7173_s22]]   ;;  %s7177_s22 = smov 28  }
  0x27   :  { %s7340_s4 = sld [smem:[%s8204_s0 + %s7174_s28]]   ;;  %s7178_s28 = smov 29  }
  0x28   :  { %s7345_s13 = sld [smem:[%s8204_s0 + %s7175_s7]]   ;;  %s7179_s7 = smov 30  }
  0x2b   :  { %8229 = sst [smem:[#allocation28_spill]] %s7330_s20 }
  0x2c   :  { %8230 = sst [smem:[#allocation29_spill]] %s7335_s27 }
  0x2d   :  { %8231 = sst [smem:[#allocation30_spill]] %s7340_s4 }
  0x2e   :  { %8232 = sst [smem:[#allocation31_spill]] %s7345_s13 }
  0x2f   :  { %s7350_s20 = sld [smem:[%s8204_s0 + %s7176_s15]]   ;;  %s7180_s15 = smov 31  }
  0x30   :  { %s7355_s27 = sld [smem:[%s8204_s0 + %s7177_s22]]   ;;  %s7181_s22 = smov 32  }
  0x31   :  { %s7360_s4 = sld [smem:[%s8204_s0 + %s7178_s28]]   ;;  %s7182_s28 = smov 33  }
  0x32   :  { %s7365_s13 = sld [smem:[%s8204_s0 + %s7179_s7]]   ;;  %s7183_s7 = smov 34  }
  0x35   :  { %8233 = sst [smem:[#allocation32_spill]] %s7350_s20 }
  0x36   :  { %8234 = sst [smem:[#allocation33_spill]] %s7355_s27 }
  0x37   :  { %8235 = sst [smem:[#allocation34_spill]] %s7360_s4 }
  0x38   :  { %8236 = sst [smem:[#allocation35_spill]] %s7365_s13 }
  0x39   :  { %s7370_s20 = sld [smem:[%s8204_s0 + %s7180_s15]]   ;;  %s7184_s15 = smov 35  }
  0x3a   :  { %s7375_s27 = sld [smem:[%s8204_s0 + %s7181_s22]]   ;;  %s7185_s22 = smov 36  }
  0x3b   :  { %s7380_s4 = sld [smem:[%s8204_s0 + %s7182_s28]]   ;;  %s7186_s28 = smov 37  }
  0x3c   :  { %s7385_s13 = sld [smem:[%s8204_s0 + %s7183_s7]]   ;;  %s7187_s7 = smov 38  }
  0x3f   :  { %8237 = sst [smem:[#allocation36_spill]] %s7370_s20 }
  0x40   :  { %8238 = sst [smem:[#allocation37_spill]] %s7375_s27 }
  0x41   :  { %8239 = sst [smem:[#allocation38_spill]] %s7380_s4 }
  0x42   :  { %8240 = sst [smem:[#allocation39_spill]] %s7385_s13 }
  0x43   :  { %s7390_s20 = sld [smem:[%s8204_s0 + %s7184_s15]]   ;;  %s7188_s15 = smov 39  }
  0x44   :  { %s7395_s27 = sld [smem:[%s8204_s0 + %s7185_s22]]   ;;  %s7189_s22 = smov 40  }
  0x45   :  { %s7400_s4 = sld [smem:[%s8204_s0 + %s7186_s28]]   ;;  %s7190_s28 = smov 41  }
  0x46   :  { %s7405_s13 = sld [smem:[%s8204_s0 + %s7187_s7]]   ;;  %s7191_s7 = smov 42  }
  0x49   :  { %8241 = sst [smem:[#allocation40_spill]] %s7390_s20 }
  0x4a   :  { %8242 = sst [smem:[#allocation41_spill]] %s7395_s27 }
  0x4b   :  { %8243 = sst [smem:[#allocation42_spill]] %s7400_s4 }
  0x4c   :  { %8244 = sst [smem:[#allocation43_spill]] %s7405_s13 }
  0x4d   :  { %s7410_s20 = sld [smem:[%s8204_s0 + %s7188_s15]]   ;;  %s7192_s15 = smov 43  }
  0x4e   :  { %s7415_s27 = sld [smem:[%s8204_s0 + %s7189_s22]]   ;;  %s7193_s22 = smov 44  }
  0x4f   :  { %s7420_s4 = sld [smem:[%s8204_s0 + %s7190_s28]]   ;;  %s7194_s28 = smov 45  }
  0x50   :  { %s7425_s13 = sld [smem:[%s8204_s0 + %s7191_s7]]   ;;  %s7195_s7 = smov 46  }
  0x53   :  { %8245 = sst [smem:[#allocation44_spill]] %s7410_s20 }
  0x54   :  { %8246 = sst [smem:[#allocation45_spill]] %s7415_s27 }
  0x55   :  { %8247 = sst [smem:[#allocation46_spill]] %s7420_s4 }
  0x56   :  { %8248 = sst [smem:[#allocation47_spill]] %s7425_s13 }
  0x57   :  { %s7430_s20 = sld [smem:[%s8204_s0 + %s7192_s15]]   ;;  %s7196_s15 = smov 47  }
  0x58   :  { %s7435_s27 = sld [smem:[%s8204_s0 + %s7193_s22]]  }
  0x59   :  { %s7440_s4 = sld [smem:[%s8204_s0 + %s7194_s28]]  }
  0x5a   :  { %s7445_s13 = sld [smem:[%s8204_s0 + %s7195_s7]]  }
  0x5b   :  { %s7450_s12 = sld [smem:[%s8204_s0 + %s7196_s15]]  }
  0x5c   :  { %101 = vsyncpa [#allocation5], 0 }
  0x5d   :  { %102 = vsyncpa [#allocation3], 0 }
  0x5e   :  { %103 = vsyncpa [#allocation4], 0 }
  0x5f   :  { %104 = vsyncpa [#allocation9], 0 }
  0x60   :  { %105 = vsyncpa [#allocation12], 0  ;;  %s118_s22 = sshll.u32 %s7230_s17, 4  ;;  %s119_s22 = int_to_ptr.vmem [resolvable:$true] %s118_s22 }
  0x61   :  { %s7018_s23 = scalar_lea.vmem %s119_s22, 16  ;;  %p7023_p1 = scmp.lt.s32.totalorder %s119_s22, %s119_s22 }
  0x62   :  { %p7019_p0 = scmp.ne.s32.totalorder %s119_s22, %s7018_s23  ;;  %p7024_p2 = scmp.lt.s32.totalorder %s7018_s23, %s7018_s23 }
  0x64   :  { %p7025_p3 = por %p7024_p2, %p7023_p1 }
  0x66   :  { %p7026_p4 = pnand %p7025_p3, %p7019_p0 }
  0x68   :  { %7029 = shalt.err (!%p7026_p4)
}
  0x69   :  { %s7197_s26 = smov [#allocation2]   ;;  %s7198_s0 = smov [#allocation6]  }
  0x6a   :  { %121 = dma.vmem_to_smem %s119_s22, 16, %s7197_s26, [#allocation5]  }
  0x6b   :  { %s206_s28 = sshll.u32 %s7198_s0, 4  ;;  %s7030_s1 = scalar_lea.hbm %s7430_s20, 16  ;;  %s207_s28 = int_to_ptr.vmem [resolvable:$true] %s206_s28 }
  0x6c   :  { %p7031_p5 = scmp.ne.s32.totalorder %s7430_s20, %s7030_s1  ;;  %p7034_p6 = scmp.lt.u32.totalorder %s7030_s1, %s7430_s20 }
  0x6e   :  { %p7036_p7 = pnand %p7034_p6, %p7031_p5 }
  0x70   :  { %7039 = shalt.err (!%p7036_p7)
}
  0x71   :  { %s7040_s17 = scalar_lea.vmem %s207_s28, 16  ;;  %s7044_s2 = scalar_lea.vmem %s207_s28, 32 }
  0x72   :  { %p7041_p8 = scmp.ne.s32.totalorder %s207_s28, %s7040_s17  ;;  %p7045_p9 = scmp.lt.s32.totalorder %s207_s28, %s207_s28 }
  0x73   :  { %p7046_p10 = scmp.lt.s32.totalorder %s7044_s2, %s7040_s17 }
  0x75   :  { %p7047_p11 = por %p7046_p10, %p7045_p9 }
  0x77   :  { %p7048_p12 = pnand %p7047_p11, %p7041_p8 }
  0x79   :  { %7051 = shalt.err (!%p7048_p12)
}
  0x7a   :  { %209 = dma.hbm_to_vmem [thread:$0]  %s7430_s20, 16, %s207_s28, [#allocation3]  }
  0x7b   :  { %7140 = dma.done.wait [#allocation5], 16  }
  0x7c   :  { %7141 = vsyncadd [#allocation5], 4294967280 }
  0x7d   :  { %7142 = dma.done.wait [#allocation3], 16  }
  0x7e   :  { %7143 = vsyncadd [#allocation3], 4294967280 }
  0x7f   :  { %216 = sfence }
  0x80   :  { %v226_v0 = vld [vmem:[%s7220_s9] sm:$0xff]  ;;  %v227_v1 = vld [vmem:[%s7220_s9 + $0x8] sm:$0xff]  ;;  %v228_v2 = vld [vmem:[%s7220_s9 + $0x10] sm:$0xff]  ;;  %vm235_vm0 = vcmask 523264   ;;  %vm392_vm1 = vcmask 130048   ;;  %vm541_vm2 = vcmask 261120  }
  0x81   :  { %v6615_v3 = vpack.c.bf16 %v227_v1, %v226_v0  ;;  %v229_v4 = vld [vmem:[%s7220_s9 + $0x18] sm:$0xff]  ;;  %v230_v6 = vld [vmem:[%s7220_s9 + $0x20] sm:$0xff]  ;;  %v231_v7 = vld [vmem:[%s7220_s9 + $0x28] sm:$0xff]  ;;  %vm7200_vm3 = vmmov 0   ;;  %s8256_s7 = sld [smem:[#allocation25_spill]]  ;;  %s8257_s10 = sld [smem:[#allocation18_spill]] }
  0x82   :  { %v6619_v5 = vpack.c.bf16 %v229_v4, %v228_v2  ;;  %v7464_v8 = vld [vmem:[%s7215_s5] sm:$0xff]  ;;  %v7469_v9 = vld [vmem:[%s7220_s9 + $0x30] sm:$0xff]  ;;  %v6623_v10 = vpack.c.bf16 %v231_v7, %v230_v6  ;;  %v7472_v11 = vld [vmem:[%s7220_s9 + $0x38] sm:$0xff]  ;;  %s234_s9 = sld [smem:[#allocation2]]  ;;  %s8258_s11 = sld [smem:[#allocation37_spill]]  ;;  %vm2185_vm4 = vcmask 64512  }
  0x83   :  { %6616 = vmatprep.subr.bf16.mxu0 %v6615_v3  ;;  %6224 = vmatprep.mubr.msk.f32.mxu0 %vm235_vm0, %v7464_v8  ;;  %v6627_v12 = vpack.c.bf16 %v7472_v11, %v7469_v9  ;;  %v7477_v13 = vld [vmem:[%s7215_s5 + $0x8] sm:$0xff]  ;;  %v7480_v14 = vld [vmem:[%s7215_s5 + $0x10] sm:$0xff]  ;;  %v7483_v15 = vld [vmem:[%s7215_s5 + $0x18] sm:$0xff]  ;;  %s8259_s15 = sld [smem:[#allocation27_spill]]  ;;  %s8260_s16 = sld [smem:[#allocation26_spill]] }
  0x84   :  { %6618 = vmatpush3.bf16.msra.mxu0 %v6615_v3  ;;  %v7488_v16 = vld [vmem:[%s7215_s5 + $0x20] sm:$0xff]  ;;  %v7493_v17 = vld [vmem:[%s7215_s5 + $0x28] sm:$0xff]  ;;  %v7498_v18 = vld [vmem:[%s7215_s5 + $0x30] sm:$0xff]  ;;  %s8261_s18 = sld [smem:[#allocation35_spill]]  ;;  %s8262_s22 = sld [smem:[#allocation28_spill]] }
  0x85   :  { %6620 = vmatprep.subr.bf16.mxu0 %v6619_v5  ;;  %v7503_v19 = vld [vmem:[%s7215_s5 + $0x38] sm:$0xff]  ;;  %v383_v20 = vld [vmem:[%s7235_s21] sm:$0xff]  ;;  %v384_v21 = vld [vmem:[%s7235_s21 + $0x8] sm:$0xff]  ;;  %s5532_s21 = sld [smem:[#allocation2 + $0x1]]  ;;  %s8263_s23 = sld [smem:[#allocation34_spill]] }
  0x86   :  { %v6631_v22 = vpack.c.bf16 %v384_v21, %v383_v20  ;;  %v530_v23 = vld [vmem:[%s7245_s29] sm:$0xff]  ;;  %v531_v24 = vld [vmem:[%s7245_s29 + $0x8] sm:$0xff]  ;;  %v532_v30 = vld [vmem:[%s7245_s29 + $0x10] sm:$0xff]  ;;  %s8264_s26 = sld [smem:[#allocation36_spill]]  ;;  %s8265_s0 = sld [smem:[#allocation38_spill]] }
  0x87   :  { %v6635_v25 = vpack.c.bf16 %v531_v24, %v530_v23  ;;  %v533_v31 = vld [vmem:[%s7245_s29 + $0x18] sm:$0xff]  ;;  %v5514_v54 = vld [vmem:[%s7240_s25] ss:$0 sm:$0xff]  ;;  %v808_v24 = vld [vmem:[%s7260_s14 + $0x8] sm:$0xff]  ;;  %s8249_s29 = sld [smem:[#allocation19_spill]]  ;;  %s8266_s28 = sld [smem:[#allocation39_spill]] }
  0x88   :  { %6622 = vmatpush3.bf16.msra.mxu0 %v6619_v5  ;;  %6632 = vmatprep.subr.bf16.mxu1 %v6631_v22  ;;  %s365_s20 = sadd.f32 1.0, %s234_s9  ;;  %v6639_v37 = vpack.c.bf16 %v533_v31, %v532_v30  ;;  %v807_v23 = vld [vmem:[%s7260_s14] sm:$0xff]  ;;  %s8267_s1 = sld [smem:[#allocation40_spill]] }
  0x89   :  { %6624 = vmatprep.subr.bf16.mxu0 %v6623_v10  ;;  %6634 = vmatpush3.bf16.msra.mxu1 %v6631_v22  ;;  %s8268_s17 = sld [smem:[#allocation43_spill]]  ;;  %s8269_s2 = sld [smem:[#allocation41_spill]] }
  0x8a   :  { %6636 = vmatprep.subr.bf16.mxu1 %v6635_v25  ;;  %v366_v26 = vstv %s365_s20  ;;  %s8270_s9 = sld [smem:[#allocation42_spill]]  ;;  %s8271_s20 = sld [smem:[#allocation45_spill]] }
  0x8b   :  { %v367_v27 = vmul.f32 %v366_v26, %v226_v0  ;;  %v368_v28 = vmul.f32 %v366_v26, %v227_v1  ;;  %v369_v34 = vmul.f32 %v366_v26, %v228_v2  ;;  %v370_v36 = vmul.f32 %v366_v26, %v229_v4  ;;  %s789_s25 = sadd.f32 1.0, %s5532_s21  ;;  %s8272_s21 = sld [smem:[#allocation44_spill]] }
  0x8c   :  { %6626 = vmatpush3.bf16.msra.mxu0 %v6623_v10  ;;  %v371_v41 = vmul.f32 %v366_v26, %v230_v6  ;;  %v372_v43 = vmul.f32 %v366_v26, %v231_v7  ;;  %v373_v47 = vmul.f32 %v366_v26, %v7469_v9  ;;  %v374_v49 = vmul.f32 %v366_v26, %v7472_v11 }
  0x8d   :  { %6628 = vmatprep.subr.bf16.mxu0 %v6627_v12  ;;  %v6659_v26 = vpack.c.bf16 %v808_v24, %v807_v23 }
  0x90   :  { %6630 = vmatpush3.bf16.msra.mxu0 %v6627_v12 }
  0x93   :  { %6225 = vmatmul.mubr.msk.f32.vlgmr.msra.gmra.mrb[0].mxu0 %vm235_vm0, %v7477_v13 }
  0x94   :  { %6227 = vmatprep.mubr.msk.f32.mxu0 %vm235_vm0, %v7480_v14 }
  0x97   :  { %6228 = vmatmul.mubr.msk.f32.gmra.mrb[2].mxu0 %vm235_vm0, %v7483_v15 }
  0x98   :  { %6230 = vmatprep.mubr.msk.f32.mxu0 %vm235_vm0, %v7488_v16 }
  0x9b   :  { %6231 = vmatmul.mubr.msk.f32.gmra.mrb[4].mxu0 %vm235_vm0, %v7493_v17 }
  0x9c   :  { %6233 = vmatprep.mubr.msk.f32.mxu0 %vm235_vm0, %v7498_v18 }
  0x9f   :  { %6234 = vmatmul.mubr.msk.f32.gmra.mrb[6].mxu0 %vm235_vm0, %v7503_v19 }
  0xa0   :  { %6288 = vmatprep.mubr.msk.f32.mxu0 %vm235_vm0, %v7464_v8 }
 0x166   :  { %v6226_v29 = vpop.f32.mrb[0].mxu0 }
 0x167   :  { %v326_v32 = vpop.f32.mrb[1].mxu0  ;;  %v376_v35 = vadd.f32 %v6226_v29, %v368_v28  ;;  %v5523_v29 = vld [vmem:[%s7250_s3] ss:$0 sm:$0xff]  ;;  %s8250_s3 = sld [smem:[#allocation21_spill]] }
 0x168   :  { %v375_v33 = vadd.f32 %v367_v27, %v326_v32  ;;  %v810_v27 = vld [vmem:[%s7260_s14 + $0x18] sm:$0xff] }
 0x16a   :  { %v6229_v38 = vpop.f32.mrb[2].mxu0  ;;  %6240 = vmatprep.mubr.msk.f32.mxu1 %vm392_vm1, %v375_v33 }
 0x16b   :  { %v336_v39 = vpop.f32.mrb[3].mxu0  ;;  %6241 = vmatmul.mubr.msk.f32.vlgmr.msra.gmra.mrb[0].mxu1 %vm392_vm1, %v376_v35  ;;  %v378_v42 = vadd.f32 %v6229_v38, %v370_v36 }
 0x16c   :  { %v377_v40 = vadd.f32 %v369_v34, %v336_v39  ;;  %6638 = vmatpush3.bf16.msra.mxu1 %v6635_v25  ;;  %v809_v25 = vld [vmem:[%s7260_s14 + $0x10] sm:$0xff]  ;;  %s8251_s14 = sld [smem:[#allocation23_spill]] }
 0x16d   :  { %6640 = vmatprep.subr.bf16.mxu1 %v6639_v37  ;;  %v6663_v28 = vpack.c.bf16 %v810_v27, %v809_v25  ;;  %v1103_v27 = vld [vmem:[%s7280_s6] sm:$0xff] }
 0x16e   :  { %v6232_v44 = vpop.f32.mrb[4].mxu0  ;;  %6243 = vmatprep.mubr.msk.f32.mxu1 %vm392_vm1, %v377_v40 }
 0x16f   :  { %v346_v45 = vpop.f32.mrb[5].mxu0  ;;  %6244 = vmatmul.mubr.msk.f32.gmra.mrb[2].mxu1 %vm392_vm1, %v378_v42  ;;  %v380_v48 = vadd.f32 %v6232_v44, %v372_v43 }
 0x170   :  { %v379_v46 = vadd.f32 %v371_v41, %v346_v45  ;;  %6642 = vmatpush3.bf16.msra.mxu1 %v6639_v37 }
 0x171   :  { %6660 = vmatprep.subr.bf16.mxu1 %v6659_v26 }
 0x172   :  { %v6235_v50 = vpop.f32.mrb[6].mxu0  ;;  %6246 = vmatprep.mubr.msk.f32.mxu1 %vm392_vm1, %v379_v46 }
 0x173   :  { %v356_v51 = vpop.f32.mrb[7].mxu0  ;;  %6247 = vmatmul.mubr.msk.f32.gmra.mrb[4].mxu1 %vm392_vm1, %v380_v48  ;;  %v382_v53 = vadd.f32 %v6235_v50, %v374_v49 }
 0x174   :  { %v381_v52 = vadd.f32 %v373_v47, %v356_v51 }
 0x176   :  { %6249 = vmatprep.mubr.msk.f32.mxu1 %vm392_vm1, %v381_v52 }
 0x177   :  { %6250 = vmatmul.mubr.msk.f32.gmra.mrb[6].mxu1 %vm392_vm1, %v382_v53 }
 0x23e   :  { %v6242_v55 = vpop.f32.mrb[0].mxu1 }
 0x23f   :  { %v489_v56 = vadd.f32 %v6242_v55, %v5514_v54  ;;  %v483_v57 = vpop.f32.mrb[1].mxu1 }
 0x240   :  { %v484_v58 = vadd.f32 %v5514_v54, %v483_v57 }
 0x241   :  { %v523_v61 = vmax.f32 %v489_v56, 0.0 }
 0x242   :  { %v522_v59 = vmax.f32 %v484_v58, 0.0  ;;  %v6245_v60 = vpop.f32.mrb[2].mxu1  ;;  %v955_v58 = vld [vmem:[%s7270_s24] sm:$0xff] }
 0x243   :  { %v499_v62 = vadd.f32 %v6245_v60, %v5514_v54  ;;  %v493_v63 = vpop.f32.mrb[3].mxu1 }
 0x244   :  { %v494_v0 = vadd.f32 %v5514_v54, %v493_v63  ;;  %6260 = vmatprep.mubr.msk.f32.mxu1 %vm541_vm2, %v522_v59  ;;  %v957_v59 = vld [vmem:[%s7270_s24 + $0x10] sm:$0xff] }
 0x245   :  { %6261 = vmatmul.mubr.msk.f32.vlgmr.msra.gmra.mrb[8].mxu1 %vm541_vm2, %v523_v61  ;;  %v525_v3 = vmax.f32 %v499_v62, 0.0 }
 0x246   :  { %v524_v1 = vmax.f32 %v494_v0, 0.0  ;;  %v6248_v2 = vpop.f32.mrb[4].mxu1  ;;  %6662 = vmatpush3.bf16.msra.mxu1 %v6659_v26 }
 0x247   :  { %v509_v4 = vadd.f32 %v6248_v2, %v5514_v54  ;;  %v503_v5 = vpop.f32.mrb[5].mxu1  ;;  %6664 = vmatprep.subr.bf16.mxu1 %v6663_v28 }
 0x248   :  { %v504_v6 = vadd.f32 %v5514_v54, %v503_v5  ;;  %6263 = vmatprep.mubr.msk.f32.mxu1 %vm541_vm2, %v524_v1 }
 0x249   :  { %6264 = vmatmul.mubr.msk.f32.gmra.mrb[10].mxu1 %vm541_vm2, %v525_v3  ;;  %v527_v10 = vmax.f32 %v509_v4, 0.0 }
 0x24a   :  { %v526_v7 = vmax.f32 %v504_v6, 0.0  ;;  %v6251_v9 = vpop.f32.mrb[6].mxu1  ;;  %6666 = vmatpush3.bf16.msra.mxu1 %v6663_v28  ;;  %v1104_v28 = vld [vmem:[%s7280_s6 + $0x8] sm:$0xff] }
 0x24b   :  { %v519_v11 = vadd.f32 %v6251_v9, %v5514_v54  ;;  %v513_v12 = vpop.f32.mrb[7].mxu1 }
 0x24c   :  { %v514_v20 = vadd.f32 %v5514_v54, %v513_v12  ;;  %6266 = vmatprep.mubr.msk.f32.mxu1 %vm541_vm2, %v526_v7 }
 0x24d   :  { %6267 = vmatmul.mubr.msk.f32.gmra.mrb[12].mxu1 %vm541_vm2, %v527_v10  ;;  %v529_v22 = vmax.f32 %v519_v11, 0.0 }
 0x24e   :  { %v528_v21 = vmax.f32 %v514_v20, 0.0 }
 0x250   :  { %6269 = vmatprep.mubr.msk.f32.mxu1 %vm541_vm2, %v528_v21 }
 0x251   :  { %6270 = vmatmul.mubr.msk.f32.gmra.mrb[14].mxu1 %vm541_vm2, %v529_v22 }
 0x318   :  { %v6262_v30 = vpop.f32.mrb[8].mxu1 }
 0x319   :  { %v638_v31 = vadd.f32 %v6262_v30, %v5523_v29  ;;  %v632_v32 = vpop.f32.mrb[9].mxu1  ;;  %v5541_v30 = vld [vmem:[%s7265_s19] ss:$0 sm:$0xff]  ;;  %s8252_s19 = sld [smem:[#allocation20_spill]] }
 0x31a   :  { %v633_v33 = vadd.f32 %v5523_v29, %v632_v32 }
 0x31b   :  { %v7543_v34 = vmax.f32 %v638_v31, 0.0 }
 0x31c   :  { %v7545_v35 = vmax.f32 %v633_v33, 0.0  ;;  %v6265_v36 = vpop.f32.mrb[10].mxu1 }
 0x31d   :  { %v648_v37 = vadd.f32 %v6265_v36, %v5523_v29  ;;  %v642_v38 = vpop.f32.mrb[11].mxu1 }
 0x31e   :  { %v643_v39 = vadd.f32 %v5523_v29, %v642_v38  ;;  %v6643_v40 = vpack.c.bf16 %v7543_v34, %v7545_v35 }
 0x31f   :  { %v7549_v41 = vmax.f32 %v648_v37, 0.0 }
 0x320   :  { %v7551_v42 = vmax.f32 %v643_v39, 0.0  ;;  %v6268_v43 = vpop.f32.mrb[12].mxu1  ;;  %6644 = vmatprep.subr.bf16.mxu0 %v6643_v40 }
 0x321   :  { %v658_v44 = vadd.f32 %v6268_v43, %v5523_v29  ;;  %v652_v45 = vpop.f32.mrb[13].mxu1  ;;  %6646 = vmatpush3.bf16.msra.mxu0 %v6643_v40 }
 0x322   :  { %v653_v46 = vadd.f32 %v5523_v29, %v652_v45  ;;  %v6647_v47 = vpack.c.bf16 %v7549_v41, %v7551_v42 }
 0x323   :  { %v7555_v48 = vmax.f32 %v658_v44, 0.0 }
 0x324   :  { %v7557_v49 = vmax.f32 %v653_v46, 0.0  ;;  %v6271_v50 = vpop.f32.mrb[14].mxu1  ;;  %6648 = vmatprep.subr.bf16.mxu0 %v6647_v47 }
 0x325   :  { %v668_v51 = vadd.f32 %v6271_v50, %v5523_v29  ;;  %v662_v52 = vpop.f32.mrb[15].mxu1  ;;  %6650 = vmatpush3.bf16.msra.mxu0 %v6647_v47 }
 0x326   :  { %v663_v53 = vadd.f32 %v5523_v29, %v662_v52  ;;  %v6651_v54 = vpack.c.bf16 %v7555_v48, %v7557_v49  ;;  %v6675_v29 = vpack.c.bf16 %v1104_v28, %v1103_v27 }
 0x327   :  { %v7561_v55 = vmax.f32 %v668_v51, 0.0 }
 0x328   :  { %v7563_v56 = vmax.f32 %v663_v53, 0.0  ;;  %6652 = vmatprep.subr.bf16.mxu0 %v6651_v54  ;;  %6676 = vmatprep.subr.bf16.mxu1 %v6675_v29 }
 0x329   :  { %6654 = vmatpush3.bf16.msra.mxu0 %v6651_v54 }
 0x32a   :  { %v6655_v57 = vpack.c.bf16 %v7561_v55, %v7563_v56 }
 0x32c   :  { %6656 = vmatprep.subr.bf16.mxu0 %v6655_v57 }
 0x32d   :  { %6658 = vmatpush3.bf16.msra.mxu0 %v6655_v57 }
 0x330   :  { %6289 = vmatmul.mubr.msk.f32.vlgmr.msra.gmra.mrb[8].mxu0 %vm235_vm0, %v7477_v13  ;;  %v956_v13 = vld [vmem:[%s7270_s24 + $0x8] sm:$0xff] }
 0x331   :  { %6291 = vmatprep.mubr.msk.f32.mxu0 %vm235_vm0, %v7480_v14  ;;  %v6667_v60 = vpack.c.bf16 %v956_v13, %v955_v58  ;;  %v958_v14 = vld [vmem:[%s7270_s24 + $0x18] sm:$0xff]  ;;  %s8253_s24 = sld [smem:[#allocation22_spill]] }
 0x332   :  { %v6671_v61 = vpack.c.bf16 %v958_v14, %v957_v59 }
 0x333   :  { %6668 = vmatprep.subr.bf16.mxu0 %v6667_v60 }
 0x334   :  { %6292 = vmatmul.mubr.msk.f32.gmra.mrb[10].mxu0 %vm235_vm0, %v7483_v15  ;;  %v790_v15 = vstv %s789_s25  ;;  %s8273_s25 = sld [smem:[#allocation46_spill]] }
 0x335   :  { %6294 = vmatprep.mubr.msk.f32.mxu0 %vm235_vm0, %v7488_v16  ;;  %6670 = vmatpush3.bf16.msra.mxu0 %v6667_v60  ;;  %v793_v2 = vmul.f32 %v790_v15, %v7551_v42  ;;  %v794_v3 = vmul.f32 %v790_v15, %v7549_v41  ;;  %v795_v9 = vmul.f32 %v790_v15, %v7557_v49 }
 0x336   :  { %6672 = vmatprep.subr.bf16.mxu0 %v6671_v61  ;;  %v796_v10 = vmul.f32 %v790_v15, %v7555_v48  ;;  %v797_v22 = vmul.f32 %v790_v15, %v7563_v56  ;;  %v798_v23 = vmul.f32 %v790_v15, %v7561_v55 }
 0x338   :  { %6295 = vmatmul.mubr.msk.f32.gmra.mrb[12].mxu0 %vm235_vm0, %v7493_v17  ;;  %v791_v17 = vmul.f32 %v790_v15, %v7545_v35 }
 0x339   :  { %6297 = vmatprep.mubr.msk.f32.mxu0 %vm235_vm0, %v7498_v18  ;;  %6674 = vmatpush3.bf16.msra.mxu0 %v6671_v61  ;;  %v792_v18 = vmul.f32 %v790_v15, %v7543_v34  ;;  %v1105_v61 = vld [vmem:[%s7280_s6 + $0x10] sm:$0xff]  ;;  %v1106_v15 = vld [vmem:[%s7280_s6 + $0x18] sm:$0xff]  ;;  %s8255_s6 = sld [smem:[#allocation24_spill]] }
 0x33c   :  { %6298 = vmatmul.mubr.msk.f32.gmra.mrb[14].mxu0 %vm235_vm0, %v7503_v19 }
 0x403   :  { %v6290_v16 = vpop.f32.mrb[8].mxu0 }
 0x404   :  { %v750_v62 = vpop.f32.mrb[9].mxu0  ;;  %v800_v0 = vadd.f32 %v6290_v16, %v792_v18  ;;  %v6679_v16 = vpack.c.bf16 %v1106_v15, %v1105_v61  ;;  %v680_v18 = vld [vmem:[%s7255_s8 + $0x8] sm:$0xff] }
 0x405   :  { %v799_v63 = vadd.f32 %v791_v17, %v750_v62  ;;  %v679_v17 = vld [vmem:[%s7255_s8] sm:$0xff] }
 0x406   :  { %v6683_v62 = vpack.c.bf16 %v680_v18, %v679_v17 }
 0x407   :  { %v6293_v1 = vpop.f32.mrb[10].mxu0  ;;  %6308 = vmatprep.mubr.msk.f32.mxu1 %vm541_vm2, %v799_v63  ;;  %v5550_v63 = vld [vmem:[%s7275_s30] ss:$0 sm:$0xff]  ;;  %s8254_s30 = sld [smem:[#allocation33_spill]] }
 0x408   :  { %v760_v4 = vpop.f32.mrb[11].mxu0  ;;  %6309 = vmatmul.mubr.msk.f32.vlgmr.msra.gmra.mrb[16].mxu1 %vm541_vm2, %v800_v0  ;;  %v802_v6 = vadd.f32 %v6293_v1, %v794_v3 }
 0x409   :  { %v801_v5 = vadd.f32 %v793_v2, %v760_v4  ;;  %6678 = vmatpush3.bf16.msra.mxu1 %v6675_v29  ;;  %v681_v4 = vld [vmem:[%s7255_s8 + $0x10] sm:$0xff] }
 0x40a   :  { %6680 = vmatprep.subr.bf16.mxu1 %v6679_v16 }
 0x40b   :  { %v6296_v7 = vpop.f32.mrb[12].mxu0  ;;  %6311 = vmatprep.mubr.msk.f32.mxu1 %vm541_vm2, %v801_v5  ;;  %v682_v5 = vld [vmem:[%s7255_s8 + $0x18] sm:$0xff]  ;;  %s5575_s8 = sld [smem:[#allocation2 + $0x2]] }
 0x40c   :  { %v770_v11 = vpop.f32.mrb[13].mxu0  ;;  %6312 = vmatmul.mubr.msk.f32.gmra.mrb[18].mxu1 %vm541_vm2, %v802_v6  ;;  %v804_v20 = vadd.f32 %v6296_v7, %v796_v10 }
 0x40d   :  { %v803_v12 = vadd.f32 %v795_v9, %v770_v11  ;;  %6682 = vmatpush3.bf16.msra.mxu1 %v6679_v16  ;;  %v6687_v11 = vpack.c.bf16 %v682_v5, %v681_v4 }
 0x40e   :  { %6684 = vmatprep.subr.bf16.mxu1 %v6683_v62 }
 0x40f   :  { %v6299_v21 = vpop.f32.mrb[14].mxu0  ;;  %6314 = vmatprep.mubr.msk.f32.mxu1 %vm541_vm2, %v803_v12 }
 0x410   :  { %v780_v24 = vpop.f32.mrb[15].mxu0  ;;  %6315 = vmatmul.mubr.msk.f32.gmra.mrb[20].mxu1 %vm541_vm2, %v804_v20  ;;  %v806_v26 = vadd.f32 %v6299_v21, %v798_v23 }
 0x411   :  { %v805_v25 = vadd.f32 %v797_v22, %v780_v24 }
 0x413   :  { %6317 = vmatprep.mubr.msk.f32.mxu1 %vm541_vm2, %v805_v25 }
 0x414   :  { %6318 = vmatmul.mubr.msk.f32.gmra.mrb[22].mxu1 %vm541_vm2, %v806_v26 }
 0x4db   :  { %v6310_v31 = vpop.f32.mrb[16].mxu1 }
 0x4dc   :  { %v914_v32 = vadd.f32 %v6310_v31, %v5541_v30  ;;  %v908_v33 = vpop.f32.mrb[17].mxu1 }
 0x4dd   :  { %v909_v36 = vadd.f32 %v5541_v30, %v908_v33 }
 0x4de   :  { %v948_v39 = vmax.f32 %v914_v32, 0.0 }
 0x4df   :  { %v947_v37 = vmax.f32 %v909_v36, 0.0  ;;  %v6313_v38 = vpop.f32.mrb[18].mxu1 }
 0x4e0   :  { %v924_v40 = vadd.f32 %v6313_v38, %v5541_v30  ;;  %v918_v43 = vpop.f32.mrb[19].mxu1  ;;  %v1489_v38 = vld [vmem:[%s8249_s29] sm:$0xff] }
 0x4e1   :  { %v919_v44 = vadd.f32 %v5541_v30, %v918_v43  ;;  %6328 = vmatprep.mubr.msk.f32.mxu0 %vm541_vm2, %v947_v37 }
 0x4e2   :  { %6329 = vmatmul.mubr.msk.f32.vlgmr.msra.gmra.mrb[16].mxu0 %vm541_vm2, %v948_v39  ;;  %v950_v47 = vmax.f32 %v924_v40, 0.0  ;;  %v1490_v39 = vld [vmem:[%s8249_s29 + $0x8] sm:$0xff] }
 0x4e3   :  { %v949_v45 = vmax.f32 %v919_v44, 0.0  ;;  %v6316_v46 = vpop.f32.mrb[20].mxu1  ;;  %v6707_v44 = vpack.c.bf16 %v1490_v39, %v1489_v38 }
 0x4e4   :  { %v934_v50 = vadd.f32 %v6316_v46, %v5541_v30  ;;  %v928_v51 = vpop.f32.mrb[21].mxu1  ;;  %v1492_v46 = vld [vmem:[%s8249_s29 + $0x18] sm:$0xff] }
 0x4e5   :  { %v929_v52 = vadd.f32 %v5541_v30, %v928_v51  ;;  %6331 = vmatprep.mubr.msk.f32.mxu0 %vm541_vm2, %v949_v45  ;;  %v1491_v45 = vld [vmem:[%s8249_s29 + $0x10] sm:$0xff]  ;;  %s8274_s29 = sld [smem:[#allocation29_spill]] }
 0x4e6   :  { %6332 = vmatmul.mubr.msk.f32.gmra.mrb[18].mxu0 %vm541_vm2, %v950_v47  ;;  %v952_v57 = vmax.f32 %v934_v50, 0.0  ;;  %v6711_v47 = vpack.c.bf16 %v1492_v46, %v1491_v45  ;;  %v7012_v50 = vld [vmem:[%s7215_s5 + $0x8] sm:$0xff]  ;;  %v7013_v51 = vld [vmem:[%s7215_s5 + $0x10] sm:$0xff] }
 0x4e7   :  { %v951_v53 = vmax.f32 %v929_v52, 0.0  ;;  %v6319_v54 = vpop.f32.mrb[22].mxu1  ;;  %v1638_v52 = vld [vmem:[%s8250_s3 + $0x8] sm:$0xff] }
 0x4e8   :  { %v944_v58 = vadd.f32 %v6319_v54, %v5541_v30  ;;  %v938_v13 = vpop.f32.mrb[23].mxu1 }
 0x4e9   :  { %v939_v59 = vadd.f32 %v5541_v30, %v938_v13  ;;  %6334 = vmatprep.mubr.msk.f32.mxu0 %vm541_vm2, %v951_v53  ;;  %v1639_v53 = vld [vmem:[%s8250_s3 + $0x10] sm:$0xff] }
 0x4ea   :  { %6335 = vmatmul.mubr.msk.f32.gmra.mrb[20].mxu0 %vm541_vm2, %v952_v57  ;;  %v954_v14 = vmax.f32 %v944_v58, 0.0 }
 0x4eb   :  { %v953_v60 = vmax.f32 %v939_v59, 0.0 }
 0x4ed   :  { %6337 = vmatprep.mubr.msk.f32.mxu0 %vm541_vm2, %v953_v60 }
 0x4ee   :  { %6338 = vmatmul.mubr.msk.f32.gmra.mrb[22].mxu0 %vm541_vm2, %v954_v14 }
 0x4ef   :  { %6396 = vmatprep.mubr.msk.f32.mxu0 %vm235_vm0, %v7464_v8 }
 0x5b5   :  { %v6330_v0 = vpop.f32.mrb[16].mxu0 }
 0x5b6   :  { %v1062_v1 = vadd.f32 %v6330_v0, %v5550_v63  ;;  %v1056_v2 = vpop.f32.mrb[17].mxu0 }
 0x5b7   :  { %v1057_v3 = vadd.f32 %v5550_v63, %v1056_v2 }
 0x5b8   :  { %v7621_v6 = vmax.f32 %v1062_v1, 0.0 }
 0x5b9   :  { %v7623_v8 = vmax.f32 %v1057_v3, 0.0  ;;  %v6333_v7 = vpop.f32.mrb[18].mxu0 }
 0x5ba   :  { %v1072_v9 = vadd.f32 %v6333_v7, %v5550_v63  ;;  %v1066_v10 = vpop.f32.mrb[19].mxu0 }
 0x5bb   :  { %v1067_v12 = vadd.f32 %v5550_v63, %v1066_v10  ;;  %6348 = vmatprep.mubr.msk.f32.mxu1 %vm541_vm2, %v7623_v8  ;;  %v6691_v20 = vpack.c.bf16 %v7621_v6, %v7623_v8  ;;  %v1785_v10 = vld [vmem:[%s8251_s14] sm:$0xff] }
 0x5bc   :  { %v7629_v21 = vmax.f32 %v1072_v9, 0.0  ;;  %6349 = vmatmul.mubr.msk.f32.vlgmr.msra.gmra.mrb[24].mxu1 %vm541_vm2, %v7621_v6 }
 0x5bd   :  { %v7633_v22 = vmax.f32 %v1067_v12, 0.0  ;;  %v6336_v23 = vpop.f32.mrb[20].mxu0  ;;  %6692 = vmatprep.subr.bf16.mxu0 %v6691_v20  ;;  %6686 = vmatpush3.bf16.msra.mxu1 %v6683_v62 }
 0x5be   :  { %v1082_v24 = vadd.f32 %v6336_v23, %v5550_v63  ;;  %v1076_v25 = vpop.f32.mrb[21].mxu0  ;;  %6694 = vmatpush3.bf16.msra.mxu0 %v6691_v20  ;;  %6688 = vmatprep.subr.bf16.mxu1 %v6687_v11  ;;  %v5584_v20 = vld [vmem:[%s8252_s19] ss:$0 sm:$0xff] }
 0x5bf   :  { %v1077_v26 = vadd.f32 %v5550_v63, %v1076_v25  ;;  %6351 = vmatprep.mubr.msk.f32.mxu1 %vm541_vm2, %v7633_v22  ;;  %v6695_v27 = vpack.c.bf16 %v7629_v21, %v7633_v22  ;;  %v1787_v25 = vld [vmem:[%s8251_s14 + $0x10] sm:$0xff] }
 0x5c0   :  { %v7639_v28 = vmax.f32 %v1082_v24, 0.0  ;;  %6352 = vmatmul.mubr.msk.f32.gmra.mrb[26].mxu1 %vm541_vm2, %v7629_v21 }
 0x5c1   :  { %v7643_v29 = vmax.f32 %v1077_v26, 0.0  ;;  %v6339_v30 = vpop.f32.mrb[22].mxu0  ;;  %6696 = vmatprep.subr.bf16.mxu0 %v6695_v27  ;;  %6690 = vmatpush3.bf16.msra.mxu1 %v6687_v11  ;;  %v1786_v11 = vld [vmem:[%s8251_s14 + $0x8] sm:$0xff]  ;;  %v1788_v26 = vld [vmem:[%s8251_s14 + $0x18] sm:$0xff]  ;;  %s7203_s14 = smov [#allocation7]  }
 0x5c2   :  { %v1092_v31 = vadd.f32 %v6339_v30, %v5550_v63  ;;  %v1086_v32 = vpop.f32.mrb[23].mxu0  ;;  %6698 = vmatpush3.bf16.msra.mxu0 %v6695_v27  ;;  %v6723_v12 = vpack.c.bf16 %v1786_v11, %v1785_v10  ;;  %v5610_v10 = vld [vmem:[%s8255_s6] ss:$0 sm:$0xff]  ;;  %s5408_s19 = sshll.u32 %s7203_s14, 4  ;;  %s5409_s19 = int_to_ptr.vmem [resolvable:$true] %s5408_s19 }
 0x5c3   :  { %v1087_v33 = vadd.f32 %v5550_v63, %v1086_v32  ;;  %6354 = vmatprep.mubr.msk.f32.mxu1 %vm541_vm2, %v7643_v29  ;;  %v6699_v36 = vpack.c.bf16 %v7639_v28, %v7643_v29  ;;  %v6727_v32 = vpack.c.bf16 %v1788_v26, %v1787_v25  ;;  %p7057_p0 = scmp.lt.s32.totalorder %s5409_s19, %s5409_s19 }
 0x5c4   :  { %v7649_v37 = vmax.f32 %v1092_v31, 0.0  ;;  %6355 = vmatmul.mubr.msk.f32.gmra.mrb[28].mxu1 %vm541_vm2, %v7639_v28 }
 0x5c5   :  { %v7655_v40 = vmax.f32 %v1087_v33, 0.0  ;;  %6700 = vmatprep.subr.bf16.mxu0 %v6699_v36 }
 0x5c6   :  { %6702 = vmatpush3.bf16.msra.mxu0 %v6699_v36 }
 0x5c7   :  { %6357 = vmatprep.mubr.msk.f32.mxu1 %vm541_vm2, %v7655_v40  ;;  %v6703_v43 = vpack.c.bf16 %v7649_v37, %v7655_v40 }
 0x5c8   :  { %6358 = vmatmul.mubr.msk.f32.gmra.mrb[30].mxu1 %vm541_vm2, %v7649_v37 }
 0x5c9   :  { %6368 = vmatprep.mubr.msk.f32.mxu1 %vm541_vm2, %v7545_v35  ;;  %6704 = vmatprep.subr.bf16.mxu0 %v6703_v43  ;;  %v7015_v35 = vld [vmem:[%s7215_s5 + $0x20] sm:$0xff] }
 0x5ca   :  { %6706 = vmatpush3.bf16.msra.mxu0 %v6703_v43 }
 0x5cb   :  { %6708 = vmatprep.subr.bf16.mxu0 %v6707_v44 }
 0x5cc   :  { %6369 = vmatmul.mubr.msk.f32.vlgmr.msra.gmra.mrb[24].mxu1 %vm541_vm2, %v7543_v34  ;;  %v7014_v34 = vld [vmem:[%s7215_s5 + $0x18] sm:$0xff] }
 0x5cd   :  { %6371 = vmatprep.mubr.msk.f32.mxu1 %vm541_vm2, %v7551_v42  ;;  %6397 = vmatmul.mubr.msk.f32.vlgmr.msra.gmra.mrb[24].mxu0 %vm235_vm0, %v7012_v50  ;;  %v7017_v42 = vld [vmem:[%s7215_s5 + $0x30] sm:$0xff] }
 0x5ce   :  { %6399 = vmatprep.mubr.msk.f32.mxu0 %vm235_vm0, %v7013_v51  ;;  %6710 = vmatpush3.bf16.msra.mxu0 %v6707_v44 }
 0x5cf   :  { %6712 = vmatprep.subr.bf16.mxu0 %v6711_v47 }
 0x5d0   :  { %6372 = vmatmul.mubr.msk.f32.gmra.mrb[26].mxu1 %vm541_vm2, %v7549_v41  ;;  %v7016_v41 = vld [vmem:[%s7215_s5 + $0x28] sm:$0xff]  ;;  %s1471_s5 = sadd.f32 1.0, %s5575_s8  ;;  %s8276_s8 = sld [smem:[#allocation47_spill]] }
 0x5d1   :  { %6374 = vmatprep.mubr.msk.f32.mxu1 %vm541_vm2, %v7557_v49  ;;  %6400 = vmatmul.mubr.msk.f32.gmra.mrb[26].mxu0 %vm235_vm0, %v7014_v34  ;;  %v1637_v49 = vld [vmem:[%s8250_s3] sm:$0xff] }
 0x5d2   :  { %6402 = vmatprep.mubr.msk.f32.mxu0 %vm235_vm0, %v7015_v35  ;;  %6714 = vmatpush3.bf16.msra.mxu0 %v6711_v47  ;;  %v6715_v54 = vpack.c.bf16 %v1638_v52, %v1637_v49 }
 0x5d4   :  { %6375 = vmatmul.mubr.msk.f32.gmra.mrb[28].mxu1 %vm541_vm2, %v7555_v48  ;;  %v1640_v48 = vld [vmem:[%s8250_s3 + $0x18] sm:$0xff]  ;;  %6716 = vmatprep.subr.bf16.mxu1 %v6715_v54  ;;  %s8275_s3 = sld [smem:[#allocation31_spill]] }
 0x5d5   :  { %6377 = vmatprep.mubr.msk.f32.mxu1 %vm541_vm2, %v7563_v56  ;;  %6403 = vmatmul.mubr.msk.f32.gmra.mrb[28].mxu0 %vm235_vm0, %v7016_v41  ;;  %v6719_v57 = vpack.c.bf16 %v1640_v48, %v1639_v53  ;;  %v1472_v56 = vstv %s1471_s5  ;;  %v5593_v41 = vld [vmem:[%s8253_s24] ss:$0 sm:$0xff]  ;;  %s8277_s5 = sld [smem:[#allocation30_spill]]  ;;  %s7052_s24 = scalar_lea.vmem %s5409_s19, 128 }
 0x5d6   :  { %6405 = vmatprep.mubr.msk.f32.mxu0 %vm235_vm0, %v7017_v42  ;;  %6718 = vmatpush3.bf16.msra.mxu1 %v6715_v54  ;;  %v1474_v58 = vmul.f32 %v1472_v56, %v7621_v6  ;;  %v1476_v14 = vmul.f32 %v1472_v56, %v7629_v21  ;;  %v1475_v15 = vmul.f32 %v1472_v56, %v7633_v22  ;;  %p7053_p13 = scmp.ne.s32.totalorder %s5409_s19, %s7052_s24  ;;  %p7058_p1 = scmp.lt.s32.totalorder %s7052_s24, %s7052_s24 }
 0x5d7   :  { %6720 = vmatprep.subr.bf16.mxu1 %v6719_v57  ;;  %v1478_v62 = vmul.f32 %v1472_v56, %v7639_v28  ;;  %v1477_v0 = vmul.f32 %v1472_v56, %v7643_v29  ;;  %v1480_v4 = vmul.f32 %v1472_v56, %v7649_v37  ;;  %v1479_v6 = vmul.f32 %v1472_v56, %v7655_v40 }
 0x5d8   :  { %6378 = vmatmul.mubr.msk.f32.gmra.mrb[30].mxu1 %vm541_vm2, %v7561_v55  ;;  %v1473_v55 = vmul.f32 %v1472_v56, %v7623_v8  ;;  %p7059_p2 = por %p7058_p1, %p7057_p0 }
 0x5d9   :  { %6406 = vmatmul.mubr.msk.f32.gmra.mrb[30].mxu0 %vm235_vm0, %v7503_v19 }
 0x5da   :  { %6722 = vmatpush3.bf16.msra.mxu1 %v6719_v57  ;;  %p7060_p3 = pnand %p7059_p2, %p7053_p13 }
 0x5db   :  { %6724 = vmatprep.subr.bf16.mxu1 %v6723_v12 }
 0x6a0   :  { %v6398_v13 = vpop.f32.mrb[24].mxu0 }
 0x6a1   :  { %v1482_v59 = vadd.f32 %v6398_v13, %v1474_v58  ;;  %v1432_v19 = vpop.f32.mrb[25].mxu0 }
 0x6a2   :  { %v1481_v60 = vadd.f32 %v1473_v55, %v1432_v19 }
 0x6a4   :  { %v6401_v61 = vpop.f32.mrb[26].mxu0  ;;  %6416 = vmatprep.mubr.msk.f32.mxu0 %vm541_vm2, %v1481_v60 }
 0x6a5   :  { %v1484_v16 = vadd.f32 %v6401_v61, %v1476_v14  ;;  %v1442_v17 = vpop.f32.mrb[27].mxu0  ;;  %6417 = vmatmul.mubr.msk.f32.vlgmr.msra.gmra.mrb[32].mxu0 %vm541_vm2, %v1482_v59 }
 0x6a6   :  { %v1483_v18 = vadd.f32 %v1475_v15, %v1442_v17 }
 0x6a8   :  { %v6404_v63 = vpop.f32.mrb[28].mxu0  ;;  %6419 = vmatprep.mubr.msk.f32.mxu0 %vm541_vm2, %v1483_v18 }
 0x6a9   :  { %v1486_v1 = vadd.f32 %v6404_v63, %v1478_v62  ;;  %v1452_v2 = vpop.f32.mrb[29].mxu0  ;;  %6420 = vmatmul.mubr.msk.f32.gmra.mrb[34].mxu0 %vm541_vm2, %v1484_v16 }
 0x6aa   :  { %v1485_v3 = vadd.f32 %v1477_v0, %v1452_v2  ;;  %v7199_v2 = vmov 0.0|0.0  }
 0x6ab   :  { %6731 = vmatprep.subr.bf16.mxu0 %v7199_v2 }
 0x6ac   :  { %v6407_v5 = vpop.f32.mrb[30].mxu0  ;;  %6422 = vmatprep.mubr.msk.f32.mxu0 %vm541_vm2, %v1485_v3  ;;  %v7201_v3 = vmov 0.0  }
 0x6ad   :  { %v1488_v8 = vadd.f32 %v6407_v5, %v1480_v4  ;;  %v1462_v7 = vpop.f32.mrb[31].mxu0  ;;  %6423 = vmatmul.mubr.msk.f32.gmra.mrb[36].mxu0 %vm541_vm2, %v1486_v1  ;;  %v2187_v4 = vld [vmem:[%s8254_s30] sm:$0xff]  ;;  %v2188_v5 = vld [vmem:[%s8254_s30 + $0x8] sm:$0xff] }
 0x6ae   :  { %v1487_v9 = vadd.f32 %v1479_v6, %v1462_v7  ;;  %v6756_v6 = vpack.c.bf16 %v2188_v5, %v2187_v4  ;;  %v2190_v7 = vld [vmem:[%s8254_s30 + $0x18] sm:$0xff]  ;;  %v2430_v5 = vlaneseq }
 0x6b0   :  { %6425 = vmatprep.mubr.msk.f32.mxu0 %vm541_vm2, %v1487_v9 }
 0x6b1   :  { %6426 = vmatmul.mubr.msk.f32.gmra.mrb[38].mxu0 %vm541_vm2, %v1488_v8  ;;  %v2189_v8 = vld [vmem:[%s8254_s30 + $0x10] sm:$0xff] }
 0x6b2   :  { %6484 = vmatprep.mubr.msk.f32.mxu0 %vm7200_vm3, %v7201_v3  ;;  %v6759_v9 = vpack.c.bf16 %v2190_v7, %v2189_v8  ;;  %v2431_v8 = vand.u32 127, %v2430_v5 }
 0x6b4   :  { %vm2600_vm5 = vcmp.ge.s32.totalorder %v2431_v8, 8  ;;  %vm2601_vm6 = vcmp.lt.s32.totalorder %v2431_v8, 16  ;;  %vm2433_vm7 = vcmp.lt.s32.totalorder %v2431_v8, 8  ;;  %vm2765_vm9 = vcmp.ge.s32.totalorder %v2431_v8, 16 }
 0x6b5   :  { %vm2602_vm8 = vmand %vm2600_vm5, %vm2601_vm6  ;;  %vm2766_vm10 = vcmp.lt.s32.totalorder %v2431_v8, 24  ;;  %vm2930_vm12 = vcmp.ge.s32.totalorder %v2431_v8, 24  ;;  %vm2931_vm13 = vcmp.lt.s32.totalorder %v2431_v8, 32 }
 0x6b6   :  { %vm2767_vm11 = vmand %vm2765_vm9, %vm2766_vm10 }
 0x6b7   :  { %vm2932_vm14 = vmand %vm2930_vm12, %vm2931_vm13 }
 0x778   :  { %v6418_v21 = vpop.f32.mrb[32].mxu0 }
 0x779   :  { %v1596_v22 = vadd.f32 %v6418_v21, %v5584_v20  ;;  %v1590_v23 = vpop.f32.mrb[33].mxu0 }
 0x77a   :  { %v1591_v24 = vadd.f32 %v5584_v20, %v1590_v23 }
 0x77b   :  { %v1630_v29 = vmax.f32 %v1596_v22, 0.0 }
 0x77c   :  { %v1629_v27 = vmax.f32 %v1591_v24, 0.0  ;;  %v6421_v28 = vpop.f32.mrb[34].mxu0 }
 0x77d   :  { %v1606_v30 = vadd.f32 %v6421_v28, %v5584_v20  ;;  %v1600_v31 = vpop.f32.mrb[35].mxu0 }
 0x77e   :  { %v1601_v33 = vadd.f32 %v5584_v20, %v1600_v31  ;;  %6436 = vmatprep.mubr.msk.f32.mxu1 %vm541_vm2, %v1629_v27 }
 0x77f   :  { %6437 = vmatmul.mubr.msk.f32.vlgmr.msra.gmra.mrb[32].mxu1 %vm541_vm2, %v1630_v29  ;;  %v1632_v38 = vmax.f32 %v1606_v30, 0.0 }
 0x780   :  { %v1631_v36 = vmax.f32 %v1601_v33, 0.0  ;;  %v6424_v37 = vpop.f32.mrb[36].mxu0  ;;  %6726 = vmatpush3.bf16.msra.mxu1 %v6723_v12 }
 0x781   :  { %v1616_v39 = vadd.f32 %v6424_v37, %v5584_v20  ;;  %v1610_v40 = vpop.f32.mrb[37].mxu0  ;;  %6728 = vmatprep.subr.bf16.mxu1 %v6727_v32 }
 0x782   :  { %v1611_v43 = vadd.f32 %v5584_v20, %v1610_v40  ;;  %6439 = vmatprep.mubr.msk.f32.mxu1 %vm541_vm2, %v1631_v36  ;;  %v2017_v40 = vld [vmem:[%s8256_s7 + $0x8] sm:$0xff] }
 0x783   :  { %6440 = vmatmul.mubr.msk.f32.gmra.mrb[34].mxu1 %vm541_vm2, %v1632_v38  ;;  %v1634_v46 = vmax.f32 %v1616_v39, 0.0  ;;  %v2016_v39 = vld [vmem:[%s8256_s7] sm:$0xff] }
 0x784   :  { %v1633_v44 = vmax.f32 %v1611_v43, 0.0  ;;  %v6427_v45 = vpop.f32.mrb[38].mxu0  ;;  %6730 = vmatpush3.bf16.msra.mxu1 %v6727_v32 }
 0x785   :  { %v1626_v47 = vadd.f32 %v6427_v45, %v5584_v20  ;;  %v1620_v50 = vpop.f32.mrb[39].mxu0  ;;  %6755 = vmatprep.subr.bf16.mxu1 %v7199_v2  ;;  %v6744_v45 = vpack.c.bf16 %v2017_v40, %v2016_v39 }
 0x786   :  { %v1621_v51 = vadd.f32 %v5584_v20, %v1620_v50  ;;  %6442 = vmatprep.mubr.msk.f32.mxu1 %vm541_vm2, %v1633_v44  ;;  %v1941_v44 = vld [vmem:[%s8257_s10] sm:$0xff] }
 0x787   :  { %6443 = vmatmul.mubr.msk.f32.gmra.mrb[36].mxu1 %vm541_vm2, %v1634_v46  ;;  %v1636_v35 = vmax.f32 %v1626_v47, 0.0  ;;  %v2018_v46 = vld [vmem:[%s8256_s7 + $0x10] sm:$0xff]  ;;  %v2019_v47 = vld [vmem:[%s8256_s7 + $0x18] sm:$0xff] }
 0x788   :  { %v1635_v34 = vmax.f32 %v1621_v51, 0.0  ;;  %v6747_v50 = vpack.c.bf16 %v2019_v47, %v2018_v46  ;;  %v2349_v51 = vld [vmem:[%s8258_s11] sm:$0xff] }
 0x78a   :  { %6445 = vmatprep.mubr.msk.f32.mxu1 %vm541_vm2, %v1635_v34  ;;  %v2350_v34 = vld [vmem:[%s8258_s11 + $0x8] sm:$0xff] }
 0x78b   :  { %6446 = vmatmul.mubr.msk.f32.gmra.mrb[38].mxu1 %vm541_vm2, %v1636_v35  ;;  %v2101_v35 = vld [vmem:[%s8259_s15] sm:$0xff] }
 0x852   :  { %v6438_v42 = vpop.f32.mrb[32].mxu1 }
 0x853   :  { %v1744_v49 = vadd.f32 %v6438_v42, %v5593_v41  ;;  %v1738_v52 = vpop.f32.mrb[33].mxu1  ;;  %v6768_v42 = vpack.c.bf16 %v2350_v34, %v2349_v51 }
 0x854   :  { %v1739_v53 = vadd.f32 %v5593_v41, %v1738_v52  ;;  %v2352_v52 = vld [vmem:[%s8258_s11 + $0x18] sm:$0xff] }
 0x855   :  { %v1778_v57 = vmax.f32 %v1744_v49, 0.0  ;;  %v2351_v49 = vld [vmem:[%s8258_s11 + $0x10] sm:$0xff] }
 0x856   :  { %v1777_v54 = vmax.f32 %v1739_v53, 0.0  ;;  %v6441_v48 = vpop.f32.mrb[34].mxu1 }
 0x857   :  { %v1754_v56 = vadd.f32 %v6441_v48, %v5593_v41  ;;  %v1748_v58 = vpop.f32.mrb[35].mxu1 }
 0x858   :  { %v1749_v13 = vadd.f32 %v5593_v41, %v1748_v58  ;;  %6456 = vmatprep.mubr.msk.f32.mxu1 %vm541_vm2, %v1777_v54  ;;  %v2104_v58 = vld [vmem:[%s8259_s15 + $0x18] sm:$0xff] }
 0x859   :  { %6457 = vmatmul.mubr.msk.f32.vlgmr.msra.gmra.mrb[24].mxu1 %vm541_vm2, %v1778_v57  ;;  %v1780_v19 = vmax.f32 %v1754_v56, 0.0  ;;  %v6771_v57 = vpack.c.bf16 %v2352_v52, %v2351_v49  ;;  %v2103_v56 = vld [vmem:[%s8259_s15 + $0x10] sm:$0xff] }
 0x85a   :  { %v1779_v55 = vmax.f32 %v1749_v13, 0.0  ;;  %v6444_v59 = vpop.f32.mrb[36].mxu1  ;;  %6757 = vmatpush3.bf16.msra.mxu1 %v6756_v6  ;;  %v6753_v13 = vpack.c.bf16 %v2104_v58, %v2103_v56  ;;  %v5614_v6 = vld [vmem:[%s8262_s22] ss:$0 sm:$0xff] }
 0x85b   :  { %v1764_v60 = vadd.f32 %v6444_v59, %v5593_v41  ;;  %v1758_v14 = vpop.f32.mrb[37].mxu1  ;;  %6758 = vmatprep.subr.bf16.mxu1 %v7199_v2  ;;  %v2268_v59 = vld [vmem:[%s8261_s18] sm:$0xff] }
 0x85c   :  { %v1759_v61 = vadd.f32 %v5593_v41, %v1758_v14  ;;  %6459 = vmatprep.mubr.msk.f32.mxu1 %vm541_vm2, %v1779_v55  ;;  %v5612_v55 = vld [vmem:[%s8260_s16] ss:$0 sm:$0xff] }
 0x85d   :  { %6460 = vmatmul.mubr.msk.f32.gmra.mrb[26].mxu1 %vm541_vm2, %v1780_v19  ;;  %v1782_v17 = vmax.f32 %v1764_v60, 0.0  ;;  %v2269_v19 = vld [vmem:[%s8261_s18 + $0x8] sm:$0xff] }
 0x85e   :  { %v1781_v15 = vmax.f32 %v1759_v61, 0.0  ;;  %v6447_v16 = vpop.f32.mrb[38].mxu1  ;;  %6760 = vmatpush3.bf16.msra.mxu1 %v6759_v9 }
 0x85f   :  { %v1774_v18 = vadd.f32 %v6447_v16, %v5593_v41  ;;  %v1768_v62 = vpop.f32.mrb[39].mxu1  ;;  %6767 = vmatprep.subr.bf16.mxu1 %v7199_v2 }
 0x860   :  { %v1769_v63 = vadd.f32 %v5593_v41, %v1768_v62  ;;  %6462 = vmatprep.mubr.msk.f32.mxu1 %vm541_vm2, %v1781_v15  ;;  %v2102_v41 = vld [vmem:[%s8259_s15 + $0x8] sm:$0xff]  ;;  %v2270_v62 = vld [vmem:[%s8261_s18 + $0x10] sm:$0xff] }
 0x861   :  { %6463 = vmatmul.mubr.msk.f32.gmra.mrb[28].mxu1 %vm541_vm2, %v1782_v17  ;;  %v1784_v1 = vmax.f32 %v1774_v18, 0.0  ;;  %v6750_v53 = vpack.c.bf16 %v2102_v41, %v2101_v35  ;;  %v6762_v17 = vpack.c.bf16 %v2269_v19, %v2268_v59 }
 0x862   :  { %v1783_v0 = vmax.f32 %v1769_v63, 0.0  ;;  %v2271_v63 = vld [vmem:[%s8261_s18 + $0x18] sm:$0xff] }
 0x864   :  { %6465 = vmatprep.mubr.msk.f32.mxu1 %vm541_vm2, %v1783_v0  ;;  %v6765_v0 = vpack.c.bf16 %v2271_v63, %v2270_v62 }
 0x865   :  { %6466 = vmatmul.mubr.msk.f32.gmra.mrb[30].mxu1 %vm541_vm2, %v1784_v1 }
 0x866   :  { %6517 = vmatprep.mubr.msk.f32.mxu1 %vm7200_vm3, %v7201_v3 }
 0x92c   :  { %v6458_v11 = vpop.f32.mrb[24].mxu1 }
 0x92d   :  { %v1934_v12 = vadd.f32 %v6458_v11, %v5610_v10  ;;  %v1879_v20 = vpop.f32.mrb[25].mxu1  ;;  %v5616_v11 = vld [vmem:[%s8263_s23] ss:$0 sm:$0xff] }
 0x92e   :  { %v1933_v21 = vadd.f32 %v5610_v10, %v1879_v20 }
 0x930   :  { %v6732_v22 = vpack.c.bf16 %v1934_v12, %v1933_v21  ;;  %v6461_v23 = vpop.f32.mrb[26].mxu1  ;;  %v5618_v12 = vld [vmem:[%s8264_s26] ss:$0 sm:$0xff] }
 0x931   :  { %v1936_v24 = vadd.f32 %v6461_v23, %v5610_v10  ;;  %v1889_v25 = vpop.f32.mrb[27].mxu1  ;;  %v7815_v23 = vsel %vm2602_vm8, 1.0, %v7201_v3 }
 0x932   :  { %v1935_v26 = vadd.f32 %v5610_v10, %v1889_v25  ;;  %6733 = vmatpush3.bf16.msra.mxu0 %v6732_v22  ;;  %v7812_v22 = vsel %vm2433_vm7, 1.0, %v7201_v3 }
 0x933   :  { %6734 = vmatprep.subr.bf16.mxu0 %v7199_v2 }
 0x934   :  { %v6735_v27 = vpack.c.bf16 %v1936_v24, %v1935_v26  ;;  %v6464_v28 = vpop.f32.mrb[28].mxu1  ;;  %v5620_v26 = vld [vmem:[%s8265_s0] ss:$0 sm:$0xff] }
 0x935   :  { %v1938_v29 = vadd.f32 %v6464_v28, %v5610_v10  ;;  %v1899_v30 = vpop.f32.mrb[29].mxu1 }
 0x936   :  { %v1937_v31 = vadd.f32 %v5610_v10, %v1899_v30  ;;  %6736 = vmatpush3.bf16.msra.mxu0 %v6735_v27 }
 0x937   :  { %6737 = vmatprep.subr.bf16.mxu0 %v7199_v2 }
 0x938   :  { %v6738_v32 = vpack.c.bf16 %v1938_v29, %v1937_v31  ;;  %v6467_v33 = vpop.f32.mrb[30].mxu1  ;;  %v7825_v29 = vsel %vm2767_vm11, 1.0, %v7201_v3 }
 0x939   :  { %v1940_v36 = vadd.f32 %v6467_v33, %v5610_v10  ;;  %v1909_v37 = vpop.f32.mrb[31].mxu1 }
 0x93a   :  { %v1939_v38 = vadd.f32 %v5610_v10, %v1909_v37  ;;  %6739 = vmatpush3.bf16.msra.mxu0 %v6738_v32  ;;  %v7838_v32 = vsel %vm2932_vm14, 1.0, %v7201_v3 }
 0x93b   :  { %6740 = vmatprep.subr.bf16.mxu0 %v7199_v2 }
 0x93c   :  { %v6741_v43 = vpack.c.bf16 %v1940_v36, %v1939_v38 }
 0x93e   :  { %6742 = vmatpush3.bf16.msra.mxu0 %v6741_v43 }
 0x93f   :  { %6743 = vmatprep.subr.bf16.mxu0 %v7199_v2 }
 0x941   :  { %6485 = vmatmul.mubr.msk.f32.vlgmr.msra.gmra.mrb[40].mxu0 %vm235_vm0, %v1941_v44 }
 0x942   :  { %6745 = vmatpush3.bf16.msra.mxu0 %v6744_v45  ;;  %6495 = vmatprep.mubr.msk.f32.mxu0 %vm7200_vm3, %v7201_v3 }
 0x943   :  { %6746 = vmatprep.subr.bf16.mxu0 %v7199_v2 }
 0x946   :  { %6748 = vmatpush3.bf16.msra.mxu0 %v6747_v50 }
 0x947   :  { %6749 = vmatprep.subr.bf16.mxu0 %v7199_v2 }
 0xa14   :  { %v7770_v54 = vpop.f32.mrb[40].mxu0 }
 0xa15   :  { %2015 = vst.msk [vmem:[#allocation10] sm:$0xff] %vm541_vm2, %v7770_v54  ;;  %v6486_v48 = vpop.f32.mrb[41].mxu0  ;;  %6496 = vmatmul.mubr.msk.f32.vlgmr.msra.gmra.mrb[42].mxu0 %vm541_vm2, %v7770_v54  ;;  %6518 = vmatmul.mubr.msk.f32.vlgmr.msra.gmra.mrb[40].mxu1 %vm541_vm2, %v7770_v54 }
 0xa16   :  { %6769 = vmatpush3.bf16.msra.mxu1 %v6768_v42  ;;  %6539 = vmatprep.mubr.msk.f32.mxu1 %vm7200_vm3, %v7201_v3 }
 0xa17   :  { %6770 = vmatprep.subr.bf16.mxu1 %v7199_v2  ;;  %6751 = vmatpush3.bf16.msra.mxu0 %v6750_v53 }
 0xa18   :  { %6752 = vmatprep.subr.bf16.mxu0 %v7199_v2  ;;  %6506 = vmatprep.mubr.msk.f32.mxu0 %vm7200_vm3, %v7201_v3 }
 0xa1a   :  { %6772 = vmatpush3.bf16.msra.mxu1 %v6771_v57 }
 0xa1b   :  { %6552 = vmatprep.subr.mxu1 %v7201_v3  ;;  %6754 = vmatpush3.bf16.msra.mxu0 %v6753_v13 }
 0xa1c   :  { %6761 = vmatprep.subr.bf16.mxu0 %v7199_v2 }
 0xa1d   :  { %6540 = vmatmul.mubr.msk.f32.vlgmr.msra.gmra.mrb[42].mxu1 %vm541_vm2, %v7770_v54 }
 0xa1e   :  { %6554 = vmatprep.mubr.msk.f32.mxu1 %vm7200_vm3, %v7201_v3 }
 0xae8   :  { %v2096_v60 = vpop.f32.mrb[42].mxu0  ;;  %v2264_v14 = vpop.f32.mrb[40].mxu1 }
 0xae9   :  { %v2097_v61 = vadd.f32 %v5612_v55, %v2096_v60  ;;  %v6497_v15 = vpop.f32.mrb[43].mxu0  ;;  %v6519_v16 = vpop.f32.mrb[41].mxu1  ;;  %v2265_v20 = vadd.f32 %v5616_v11, %v2264_v14 }
 0xaeb   :  { %v2100_v18 = vmax.f32 %v2097_v61, 0.0  ;;  %v2436_v27 = vmul.f32 %v7812_v22, %v2265_v20  ;;  %v2604_v28 = vmul.f32 %v7815_v23, %v2265_v20  ;;  %v2769_v31 = vmul.f32 %v7825_v29, %v2265_v20 }
 0xaec   :  { %v2934_v33 = vmul.f32 %v7838_v32, %v2265_v20 }
 0xaed   :  { %6507 = vmatmul.mubr.msk.f32.vlgmr.msra.gmra.mrb[44].mxu0 %vm541_vm2, %v2100_v18 }
 0xaee   :  { %6763 = vmatpush3.bf16.msra.mxu0 %v6762_v17  ;;  %6528 = vmatprep.mubr.msk.f32.mxu0 %vm7200_vm3, %v7201_v3 }
 0xaef   :  { %6764 = vmatprep.subr.bf16.mxu0 %v7199_v2 }
 0xaf0   :  { %v2426_v1 = vpop.f32.mrb[42].mxu1 }
 0xaf1   :  { %v6541_v4 = vpop.f32.mrb[43].mxu1  ;;  %v7827_v30 = vadd.f32 %v5620_v26, %v2426_v1 }
 0xaf2   :  { %6766 = vmatpush3.bf16.msra.mxu0 %v6765_v0 }
 0xaf3   :  { %6542 = vmatprep.subr.mxu0 %v7201_v3 }
 0xaf5   :  { %6529 = vmatmul.mubr.msk.f32.vlgmr.msra.gmra.mrb[46].mxu0 %vm541_vm2, %v7770_v54 }
 0xaf6   :  { %6544 = vmatprep.mubr.msk.f32.mxu0 %vm7200_vm3, %v7201_v3 }
 0xbc0   :  { %v2181_v7 = vpop.f32.mrb[44].mxu0 }
 0xbc1   :  { %v2182_v9 = vadd.f32 %v5614_v6, %v2181_v7  ;;  %v6508_v10 = vpop.f32.mrb[45].mxu0 }
 0xbc3   :  { %2186 = vst.msk [vmem:[#allocation7] sm:$0xff] %vm2185_vm4, %v2182_v9 }
 0xbc8   :  { %v2345_v21 = vpop.f32.mrb[46].mxu0 }
 0xbc9   :  { %v2346_v24 = vadd.f32 %v5618_v12, %v2345_v21  ;;  %v6530_v25 = vpop.f32.mrb[47].mxu0 }
 0xbca   :  { %v3096_v25 = vld [vmem:[%s8266_s28 + $0x8] sm:$0xff] }
 0xbcb   :  { %6543 = vmatpush3.xpose.msk.msra.mxu0 %vm541_vm2, %v2346_v24  ;;  %6553 = vmatpush3.xpose.msk.msra.mxu1 %vm541_vm2, %v2346_v24 }
 0xbcc   :  { %6547 = vmatprep.subr.mxu0 %v7201_v3  ;;  %6562 = vmatprep.subr.mxu1 %v7201_v3 }
 0xbce   :  { %6545 = vmatmul.mubr.msk.f32.vlgmr.msra.gmra.mrb[48].mxu0 %vm541_vm2, %v2436_v27  ;;  %6555 = vmatmul.mubr.msk.f32.vlgmr.msra.gmra.mrb[44].mxu1 %vm541_vm2, %v2604_v28  ;;  %v3097_v27 = vld [vmem:[%s8266_s28 + $0x10] sm:$0xff]  ;;  %v3098_v28 = vld [vmem:[%s8266_s28 + $0x18] sm:$0xff] }
 0xbcf   :  { %6548 = vmatpush3.msra.mxu0 %v7827_v30  ;;  %6563 = vmatpush3.xpose.msk.msra.mxu1 %vm541_vm2, %v2346_v24 }
 0xbd0   :  { %6564 = vmatprep.mubr.msk.f32.mxu1 %vm7200_vm3, %v7201_v3  ;;  %6572 = vmatprep.subr.mxu1 %v7201_v3 }
 0xbd1   :  { %6549 = vmatprep.mubr.msk.f32.mxu0 %vm7200_vm3, %v7201_v3  ;;  %6557 = vmatprep.subr.mxu0 %v7201_v3 }
 0xbd2   :  { %6565 = vmatmul.mubr.msk.f32.vlgmr.msra.gmra.mrb[46].mxu1 %vm541_vm2, %v2769_v31  ;;  %v6777_v31 = vpack.c.bf16 %v3098_v28, %v3097_v27  ;;  %v3229_v28 = vld [vmem:[%s8268_s17 + $0x90] sm:$0xff] }
 0xbd3   :  { %6573 = vmatpush3.xpose.msk.msra.mxu1 %vm541_vm2, %v2346_v24  ;;  %6574 = vmatprep.mubr.msk.f32.mxu1 %vm7200_vm3, %v7201_v3  ;;  %v3095_v24 = vld [vmem:[%s8266_s28] sm:$0xff] }
 0xbd4   :  { %6773 = vmatprep.subr.bf16.mxu1 %v7199_v2  ;;  %v6774_v26 = vpack.c.bf16 %v3096_v25, %v3095_v24  ;;  %v5636_v24 = vld [vmem:[%s8269_s2] ss:$0 sm:$0xff] }
 0xbd6   :  { %6575 = vmatmul.mubr.msk.f32.vlgmr.msra.gmra.mrb[48].mxu1 %vm541_vm2, %v2934_v33 }
 0xbd7   :  { %6590 = vmatprep.mubr.msk.f32.mxu1 %vm7200_vm3, %v7201_v3  ;;  %6775 = vmatpush3.bf16.msra.mxu1 %v6774_v26  ;;  %v5637_v26 = vld [vmem:[%s8270_s9] ss:$0 sm:$0xff] }
 0xbd8   :  { %6776 = vmatprep.subr.bf16.mxu1 %v7199_v2 }
 0xbdb   :  { %6778 = vmatpush3.bf16.msra.mxu1 %v6777_v31  ;;  %v3237_v31 = vld [vmem:[%s8268_s17 + $0xd0] sm:$0xff] }
 0xca1   :  { %v2509_v36 = vpop.f32.mrb[48].mxu0  ;;  %v2674_v37 = vpop.f32.mrb[44].mxu1 }
 0xca2   :  { %v2513_v38 = vmul.f32 0.35355338, %v2509_v36  ;;  %v6546_v39 = vpop.f32.mrb[49].mxu0  ;;  %v6556_v40 = vpop.f32.mrb[45].mxu1  ;;  %v2678_v43 = vmul.f32 0.35355338, %v2674_v37 }
 0xca4   :  { %v2514_v44 = vsel %vm2185_vm4, %v2513_v38, -inf  ;;  %v2679_v51 = vsel %vm2185_vm4, %v2678_v43, -inf }
 0xca5   :  { %v2839_v45 = vpop.f32.mrb[46].mxu1  ;;  %2515 = vmax.xlane.f32.xlu0 %v2514_v44 }
 0xca6   :  { %v2843_v46 = vmul.f32 0.35355338, %v2839_v45  ;;  %v6566_v47 = vpop.f32.mrb[47].mxu1 }
 0xca8   :  { %v2844_v50 = vsel %vm2185_vm4, %v2843_v46, -inf }
 0xca9   :  { %2845 = vmax.xlane.f32.xlu1 %v2844_v50  ;;  %v3004_v34 = vpop.f32.mrb[48].mxu1  ;;  %2680 = vmax.xlane.f32.xlu0 %v2679_v51 }
 0xcaa   :  { %v3008_v35 = vmul.f32 0.35355338, %v3004_v34  ;;  %v6576_v41 = vpop.f32.mrb[49].mxu1 }
 0xcac   :  { %v3009_v42 = vsel %vm2185_vm4, %v3008_v35, -inf }
 0xcad   :  { %3010 = vmax.xlane.f32.xlu1 %v3009_v42 }
 0xd32   :  { %v2516_v49 = vpop.xlane.xlu0 %2515 }
 0xd33   :  { %v2517_v52 = vsub.f32 %v2513_v38, %v2516_v49 }
 0xd35   :  { %v2518_v53 = vmul.f32 1.442695, %v2517_v52 }
 0xd36   :  { %v2846_v48 = vpop.xlane.xlu1 %2845  ;;  %v2681_v57 = vpop.xlane.xlu0 %2680 }
 0xd37   :  { %6992 = vpow2.f32 %v2518_v53  ;;  %v2847_v56 = vsub.f32 %v2843_v46, %v2846_v48  ;;  %v2682_v58 = vsub.f32 %v2678_v43, %v2681_v57  ;;  %v3211_v57 = vld [vmem:[%s8268_s17] sm:$0xff] }
 0xd39   :  { %v2848_v13 = vmul.f32 1.442695, %v2847_v56  ;;  %v2683_v55 = vmul.f32 1.442695, %v2682_v58  ;;  %v3219_v56 = vld [vmem:[%s8268_s17 + $0x40] sm:$0xff]  ;;  %v3212_v58 = vld [vmem:[%s8268_s17 + $0x8] sm:$0xff] }
 0xd3a   :  { %v3011_v59 = vpop.xlane.xlu1 %3010 }
 0xd3b   :  { %6994 = vpow2.f32 %v2848_v13  ;;  %v3012_v19 = vsub.f32 %v3008_v35, %v3011_v59  ;;  %v5639_v13 = vcombine.high %v3211_v57, %v3219_v56 }
 0xd3c   :  { %6996 = vpow2.f32 %v2683_v55  ;;  %v3220_v55 = vld [vmem:[%s8268_s17 + $0x48] sm:$0xff] }
 0xd3d   :  { %v3013_v60 = vmul.f32 1.442695, %v3012_v19  ;;  %v5640_v59 = vcombine.low %v3212_v58, %v3220_v55  ;;  %v5641_v19 = vcombine.high %v3212_v58, %v3220_v55  ;;  %v3233_v55 = vld [vmem:[%s8268_s17 + $0xb0] sm:$0xff] }
 0xd3f   :  { %6998 = vpow2.f32 %v3013_v60  ;;  %3531 = vmatprep.subr.bf16.mxu1 %v5641_v19  ;;  %v3227_v60 = vld [vmem:[%s8268_s17 + $0x80] sm:$0xff]  ;;  %v3242_v19 = vld [vmem:[%s8268_s17 + $0xf8] sm:$0xff] }
 0xd41   :  { %v6993_v14 = vpop.eup %6992 }
 0xd42   :  { %v2520_v61 = vsel %vm2185_vm4, %v6993_v14, 0.0 }
 0xd43   :  { %2521 = vadd.xlane.f32.xlu0 %v2520_v61  ;;  %v3228_v61 = vld [vmem:[%s8268_s17 + $0x88] sm:$0xff] }
 0xd45   :  { %v6995_v15 = vpop.eup %6994 }
 0xd46   :  { %v6997_v16 = vpop.eup %6996  ;;  %v2850_v17 = vsel %vm2185_vm4, %v6995_v15, 0.0 }
 0xd47   :  { %2851 = vadd.xlane.f32.xlu0 %v2850_v17  ;;  %v2685_v18 = vsel %vm2185_vm4, %v6997_v16, 0.0 }
 0xd48   :  { %2686 = vadd.xlane.f32.xlu1 %v2685_v18 }
 0xd49   :  { %v6999_v62 = vpop.eup %6998 }
 0xd4a   :  { %v3015_v63 = vsel %vm2185_vm4, %v6999_v62, 0.0 }
 0xd4c   :  { %3016 = vadd.xlane.f32.xlu1 %v3015_v63  ;;  %v3213_v63 = vld [vmem:[%s8268_s17 + $0x10] sm:$0xff] }
 0xdd0   :  { %v2522_v0 = vpop.xlane.xlu0 %2521 }
 0xdd1   :  { %7000 = vrcp.f32 %v2522_v0  ;;  %v3221_v0 = vld [vmem:[%s8268_s17 + $0x50] sm:$0xff] }
 0xdd4   :  { %v2852_v4 = vpop.xlane.xlu0 %2851 }
 0xdd5   :  { %v2687_v1 = vpop.xlane.xlu1 %2686 }
 0xdd6   :  { %7002 = vrcp.f32 %v2687_v1  ;;  %v3214_v1 = vld [vmem:[%s8268_s17 + $0x18] sm:$0xff] }
 0xdd7   :  { %7004 = vrcp.f32 %v2852_v4  ;;  %v7202_v4 = vmov 0  }
 0xdd9   :  { %v3017_v6 = vpop.xlane.xlu1 %3016 }
 0xdda   :  { %7006 = vrcp.f32 %v3017_v6  ;;  %v5643_v6 = vcombine.high %v3213_v63, %v3221_v0 }
 0xddb   :  { %v7001_v8 = vpop.eup %7000 }
 0xddc   :  { %v2524_v7 = vmul.f32 %v7001_v8, %v6993_v14  ;;  %v3235_v14 = vld [vmem:[%s8268_s17 + $0xc0] sm:$0xff]  ;;  %v3222_v8 = vld [vmem:[%s8268_s17 + $0x58] sm:$0xff] }
 0xddd   :  { %v5654_v17 = vcombine.low %v3227_v60, %v3235_v14 }
 0xdde   :  { %6550 = vmatmul.mubr.msk.f32.vlgmr.msra.gmra.mrb[50].mxu0 %vm2185_vm4, %v2524_v7  ;;  %v5642_v7 = vcombine.low %v3213_v63, %v3221_v0  ;;  %v6866_v63 = vld [vmem:[%s8271_s20] sm:$0xff]  }
 0xddf   :  { %6558 = vmatpush3.msra.mxu0 %v7827_v30  ;;  %6559 = vmatprep.mubr.msk.f32.mxu0 %vm7200_vm3, %v7201_v3  ;;  %v6867_v0 = vld [vmem:[%s8271_s20 + $0x80] sm:$0xff]  }
 0xde0   :  { %v7003_v9 = vpop.eup %7002  ;;  %6567 = vmatprep.subr.mxu0 %v7201_v3 }
 0xde1   :  { %v2689_v10 = vmul.f32 %v7003_v9, %v6997_v16  ;;  %v7005_v11 = vpop.eup %7004  ;;  %v3236_v16 = vld [vmem:[%s8268_s17 + $0xc8] sm:$0xff]  ;;  %v5644_v9 = vcombine.low %v3214_v1, %v3222_v8 }
 0xde2   :  { %v2854_v12 = vmul.f32 %v7005_v11, %v6995_v15  ;;  %v5655_v15 = vcombine.high %v3227_v60, %v3235_v14  ;;  %v5656_v18 = vcombine.low %v3228_v61, %v3236_v16 }
 0xde3   :  { %6560 = vmatmul.mubr.msk.f32.vlgmr.msra.gmra.mrb[52].mxu0 %vm2185_vm4, %v2689_v10  ;;  %v5645_v10 = vcombine.high %v3214_v1, %v3222_v8  ;;  %v6868_v1 = vld [vmem:[%s8271_s20 + $0x48] sm:$0xff]  }
 0xde4   :  { %6568 = vmatpush3.msra.mxu0 %v7827_v30  ;;  %6569 = vmatprep.mubr.msk.f32.mxu0 %vm7200_vm3, %v7201_v3  ;;  %v7007_v20 = vpop.eup %7006  ;;  %v6871_v8 = vld [vmem:[%s8271_s20 + $0x88] sm:$0xff]  }
 0xde5   :  { %6577 = vmatprep.subr.mxu0 %v7201_v3  ;;  %v3019_v21 = vmul.f32 %v7007_v20, %v6999_v62  ;;  %v5657_v62 = vcombine.high %v3228_v61, %v3236_v16 }
 0xde7   :  { %6570 = vmatmul.mubr.msk.f32.vlgmr.msra.gmra.mrb[54].mxu0 %vm2185_vm4, %v2854_v12 }
 0xde8   :  { %6578 = vmatpush3.msra.mxu0 %v7827_v30  ;;  %6579 = vmatprep.mubr.msk.f32.mxu0 %vm7200_vm3, %v7201_v3 }
 0xde9   :  { %3490 = vmatprep.subr.bf16.mxu0 %v5639_v13 }
 0xdeb   :  { %6580 = vmatmul.mubr.msk.f32.vlgmr.msra.gmra.mrb[56].mxu0 %vm2185_vm4, %v3019_v21 }
 0xdec   :  { %3522 = vmatprep.mubr.bf16.mxu0 %v7202_v4 }
 0xeb1   :  { %v2594_v33 = vpop.f32.mrb[50].mxu0 }
 0xeb2   :  { %v6551_v36 = vpop.f32.mrb[51].mxu0  ;;  %v2598_v37 = vmul.f32 %v2594_v33, %v7812_v22  ;;  %v5634_v22 = vld [vmem:[%s8267_s1] ss:$0 sm:$0xff]  ;;  %v3230_v33 = vld [vmem:[%s8268_s17 + $0x98] sm:$0xff] }
 0xeb3   :  { %v3238_v36 = vld [vmem:[%s8268_s17 + $0xd8] sm:$0xff] }
 0xeb6   :  { %v2759_v30 = vpop.f32.mrb[52].mxu0 }
 0xeb7   :  { %v2763_v38 = vmul.f32 %v2759_v30, %v7815_v23  ;;  %v6561_v39 = vpop.f32.mrb[53].mxu0 }
 0xeb8   :  { %v5661_v39 = vcombine.high %v3230_v33, %v3238_v36 }
 0xeb9   :  { %v2764_v40 = vadd.f32 %v2763_v38, %v2598_v37  ;;  %v5659_v38 = vcombine.high %v3229_v28, %v3237_v31 }
 0xeba   :  { %v2924_v43 = vpop.f32.mrb[54].mxu0 }
 0xebb   :  { %v2928_v44 = vmul.f32 %v2924_v43, %v7825_v29  ;;  %v6571_v45 = vpop.f32.mrb[55].mxu0  ;;  %v3223_v43 = vld [vmem:[%s8268_s17 + $0x60] sm:$0xff] }
 0xebc   :  { %v3224_v45 = vld [vmem:[%s8268_s17 + $0x68] sm:$0xff] }
 0xebd   :  { %v2929_v46 = vadd.f32 %v2928_v44, %v2764_v40  ;;  %v3215_v40 = vld [vmem:[%s8268_s17 + $0x20] sm:$0xff]  ;;  %v3216_v44 = vld [vmem:[%s8268_s17 + $0x28] sm:$0xff] }
 0xebe   :  { %v3089_v47 = vpop.f32.mrb[56].mxu0 }
 0xebf   :  { %v3093_v50 = vmul.f32 %v3089_v47, %v7838_v32  ;;  %v6581_v51 = vpop.f32.mrb[57].mxu0  ;;  %v5660_v47 = vcombine.low %v3230_v33, %v3238_v36  ;;  %v6885_v33 = vld [vmem:[%s8271_s20 + $0xe8] sm:$0xff]  }
 0xec0   :  { %v5649_v51 = vcombine.high %v3216_v44, %v3224_v45  ;;  %v6886_v36 = vld [vmem:[%s8271_s20 + $0x28] sm:$0xff]  }
 0xec1   :  { %v3094_v34 = vadd.f32 %v3093_v50, %v2929_v46  ;;  %v5658_v46 = vcombine.low %v3229_v28, %v3237_v31  ;;  %v5647_v50 = vcombine.high %v3215_v40, %v3223_v43  ;;  %v6883_v28 = vld [vmem:[%s8271_s20 + $0xa0] sm:$0xff]   ;;  %v6884_v31 = vld [vmem:[%s8271_s20 + $0x68] sm:$0xff]  }
 0xec3   :  { %6591 = vmatmul.mubr.msk.f32.vlgmr.msra.gmra.mrb[50].mxu1 %vm541_vm2, %v3094_v34  ;;  %v3231_v34 = vld [vmem:[%s8268_s17 + $0xa0] sm:$0xff] }
 0xec4   :  { %3532 = vmatpush1.bf16.msra.mxu1 %v5640_v59  ;;  %3563 = vmatprep.mubr.bf16.mxu1 %v7202_v4  ;;  %v3234_v59 = vld [vmem:[%s8268_s17 + $0xb8] sm:$0xff] }
 0xec5   :  { %3533 = vmatprep.subr.bf16.mxu1 %v5657_v62  ;;  %v6865_v62 = vld [vmem:[%s8271_s20 + $0xc0] sm:$0xff]  }
 0xec8   :  { %3534 = vmatpush1.bf16.msra.mxu1 %v5656_v18  ;;  %v6864_v18 = vld [vmem:[%s8271_s20 + $0x40] sm:$0xff]  }
 0xec9   :  { %3613 = vmatprep.subr.bf16.mxu1 %v5645_v10  ;;  %v6874_v10 = vld [vmem:[%s8271_s20 + $0x10] sm:$0xff]  }
 0xf96   :  { %v3175_v35 = vpop.f32.mrb[50].mxu1 }
 0xf97   :  { %v3176_v23 = vadd.f32 %v5634_v22, %v3175_v35  ;;  %v6592_v41 = vpop.f32.mrb[51].mxu1  ;;  %v3239_v22 = vld [vmem:[%s8268_s17 + $0xe0] sm:$0xff]  ;;  %v3232_v35 = vld [vmem:[%s8268_s17 + $0xa8] sm:$0xff] }
 0xf98   :  { %v5646_v41 = vcombine.low %v3215_v40, %v3223_v43  ;;  %v6890_v40 = vld [vmem:[%s8271_s20 + $0x30] sm:$0xff]  }
 0xf99   :  { %v3179_v42 = vadd.f32 %v3176_v23, %v7770_v54  ;;  %v5638_v54 = vcombine.low %v3211_v57, %v3219_v56  ;;  %v3240_v23 = vld [vmem:[%s8268_s17 + $0xe8] sm:$0xff]  ;;  %v5662_v57 = vcombine.low %v3231_v34, %v3239_v22  ;;  %v6891_v43 = vld [vmem:[%s8271_s20 + $0xb0] sm:$0xff]  }
 0xf9a   :  { %v5664_v56 = vcombine.low %v3232_v35, %v3240_v23 }
 0xf9b   :  { %v3182_v29 = vsel %vm541_vm2, %v3179_v42, 0.0  ;;  %3491 = vmatpush1.bf16.msra.mxu0 %v5638_v54  ;;  %v3241_v54 = vld [vmem:[%s8268_s17 + $0xf0] sm:$0xff] }
 0xf9c   :  { %3183 = vadd.xlane.f32.xlu0 %v3182_v29  ;;  %3492 = vmatprep.subr.bf16.mxu0 %v5655_v15  ;;  %v5663_v29 = vcombine.high %v3231_v34, %v3239_v22  ;;  %v5667_v61 = vcombine.high %v3233_v55, %v3241_v54  ;;  %v5669_v15 = vcombine.high %v3234_v59, %v3242_v19  ;;  %v7988_v34 = vshrl.u32 %v2430_v5, 7 }
 0xf9d   :  { %v5666_v16 = vcombine.low %v3233_v55, %v3241_v54 }
 0xf9e   :  { %v3273_v22 = vsub.s32 6, %v7988_v34  ;;  %v3261_v5 = vsub.s32 3, %v7988_v34 }
 0xf9f   :  { %3493 = vmatpush1.bf16.msra.mxu0 %v5654_v17  ;;  %v5668_v17 = vcombine.low %v3234_v59, %v3242_v19 }
 0xfa0   :  { %3572 = vmatprep.subr.bf16.mxu0 %v5643_v6  ;;  %v6869_v6 = vld [vmem:[%s8271_s20 + $0xc8] sm:$0xff]  }
0x1029   :  { %v3184_v49 = vpop.xlane.xlu0 %3183 }
0x102a   :  { %v3186_v52 = vmul.f32 0.03125, %v3184_v49  ;;  %v5665_v49 = vcombine.high %v3232_v35, %v3240_v23  ;;  %v7992_v35 = vld [vmem:[%s8272_s21 + $0x8] sm:$0xff] }
0x102b   :  { %v7997_v23 = vrot.slane %v7992_v35, %v3273_v22 }
0x102c   :  { %v3187_v32 = vsub.f32 %v3179_v42, %v3186_v52  ;;  %v5648_v42 = vcombine.low %v3216_v44, %v3224_v45  ;;  %v3217_v52 = vld [vmem:[%s8268_s17 + $0x30] sm:$0xff]  ;;  %v6892_v44 = vld [vmem:[%s8271_s20 + $0x78] sm:$0xff]  }
0x102d   :  { %v6893_v45 = vld [vmem:[%s8271_s20 + $0xf8] sm:$0xff]  }
0x102e   :  { %v3188_v53 = vmul.f32 %v3187_v32, %v3187_v32 }
0x1030   :  { %v3189_v48 = vsel %vm541_vm2, %v3188_v53, 0.0  ;;  %v3218_v53 = vld [vmem:[%s8268_s17 + $0x38] sm:$0xff] }
0x1031   :  { %3190 = vadd.xlane.f32.xlu1 %v3189_v48  ;;  %v3226_v48 = vld [vmem:[%s8268_s17 + $0x78] sm:$0xff] }
0x1032   :  { %v5653_v13 = vcombine.high %v3218_v53, %v3226_v48  ;;  %v5652_v14 = vcombine.low %v3218_v53, %v3226_v48 }
0x10be   :  { %v3191_v11 = vpop.xlane.xlu1 %3190 }
0x10bf   :  { %v3192_v12 = vmul.f32 0.03125, %v3191_v11  ;;  %v6875_v11 = vld [vmem:[%s8271_s20 + $0x90] sm:$0xff]  }
0x10c1   :  { %v3193_v20 = vadd.f32 1e-05, %v3192_v12  ;;  %v6876_v12 = vld [vmem:[%s8271_s20 + $0x58] sm:$0xff]  }
0x10c3   :  { %7008 = vrsqrt.f32 %v3193_v20  ;;  %v6877_v20 = vld [vmem:[%s8271_s20 + $0xd8] sm:$0xff]  }
0x10cd   :  { %v7009_v21 = vpop.eup %7008 }
0x10ce   :  { %v3195_v25 = vmul.f32 %v7009_v21, %v3187_v32  ;;  %v3225_v32 = vld [vmem:[%s8268_s17 + $0x70] sm:$0xff]  ;;  %v6878_v21 = vld [vmem:[%s8271_s20 + $0x18] sm:$0xff]  }
0x10cf   :  { %v5651_v58 = vcombine.high %v3217_v52, %v3225_v32  ;;  %v5650_v60 = vcombine.low %v3217_v52, %v3225_v32 }
0x10d0   :  { %v3202_v27 = vmul.f32 %v5636_v24, %v3195_v25  ;;  %v6879_v24 = vld [vmem:[%s8271_s20 + $0x98] sm:$0xff]   ;;  %v6880_v25 = vld [vmem:[%s8271_s20 + $0x60] sm:$0xff]  }
0x10d2   :  { %v7909_v30 = vadd.f32 %v5637_v26, %v3202_v27  ;;  %v6881_v26 = vld [vmem:[%s8271_s20 + $0xe0] sm:$0xff]  }
0x10d3   :  { %v6882_v27 = vld [vmem:[%s8271_s20 + $0x20] sm:$0xff]  }
0x10d4   :  { %v7913_v37 = vpack.c.bf16 %v7909_v30, %v7909_v30 }
0x10d6   :  { %5670 = vmatmul.mubr.msk.bf16.vlgmr.msra.gmra.mrb[60].mxu0 %vm541_vm2, %v7913_v37  ;;  %5671 = vmatmul.mubr.msk.bf16.vlgmr.msra.gmra.mrb[52].mxu1 %vm541_vm2, %v7913_v37 }
0x10d7   :  { %3573 = vmatpush1.bf16.msra.mxu0 %v5642_v7  ;;  %3614 = vmatpush1.bf16.msra.mxu1 %v5644_v9  ;;  %v6872_v7 = vld [vmem:[%s8271_s20 + $0x50] sm:$0xff]  }
0x10d8   :  { %3574 = vmatprep.subr.bf16.mxu0 %v5659_v38  ;;  %3615 = vmatprep.subr.bf16.mxu1 %v5661_v39  ;;  %v6873_v9 = vld [vmem:[%s8271_s20 + $0xd0] sm:$0xff]  }
0x10d9   :  { %3604 = vmatprep.mubr.bf16.mxu0 %v7202_v4  ;;  %3645 = vmatprep.mubr.bf16.mxu1 %v7202_v4  ;;  %v6888_v38 = vld [vmem:[%s8271_s20 + $0x70] sm:$0xff]  }
0x10da   :  { %v6889_v39 = vld [vmem:[%s8271_s20 + $0xf0] sm:$0xff]  }
0x10db   :  { %3575 = vmatpush1.bf16.msra.mxu0 %v5658_v46  ;;  %3616 = vmatpush1.bf16.msra.mxu1 %v5660_v47  ;;  %v6894_v46 = vld [vmem:[%s8271_s20 + $0x38] sm:$0xff]  }
0x10dc   :  { %3654 = vmatprep.subr.bf16.mxu0 %v5647_v50  ;;  %3695 = vmatprep.subr.bf16.mxu1 %v5649_v51  ;;  %v6895_v47 = vld [vmem:[%s8271_s20 + $0xb8] sm:$0xff]   ;;  %v6896_v50 = vld [vmem:[%s8271_s20 + $0x140] sm:$0xff]  }
0x10dd   :  { %v6897_v51 = vld [vmem:[%s8271_s20 + $0x1c0] sm:$0xff]  }
0x10de   :  { %5672 = vmatmul.mubr.msk.bf16.vlgmr.msra.gmra.mrb[64].mxu0 %vm541_vm2, %v7913_v37  ;;  %5673 = vmatmul.mubr.msk.bf16.vlgmr.msra.gmra.mrb[56].mxu1 %vm541_vm2, %v7913_v37 }
0x10df   :  { %3655 = vmatpush1.bf16.msra.mxu0 %v5646_v41  ;;  %3696 = vmatpush1.bf16.msra.mxu1 %v5648_v42  ;;  %v3249_v41 = vsub.s32 0, %v7988_v34  ;;  %v3257_v42 = vsub.s32 2, %v7988_v34 }
0x10e0   :  { %3656 = vmatprep.subr.bf16.mxu0 %v5663_v29  ;;  %3697 = vmatprep.subr.bf16.mxu1 %v5665_v49  ;;  %v8002_v29 = vld [vmem:[%s8272_s21] sm:$0xff]  ;;  %v3253_v49 = vsub.s32 1, %v7988_v34 }
0x10e1   :  { %3686 = vmatprep.mubr.bf16.mxu0 %v7202_v4  ;;  %3727 = vmatprep.mubr.bf16.mxu1 %v7202_v4  ;;  %v3250_v52 = vrot.slane %v8002_v29, %v3249_v41  ;;  %v3258_v32 = vrot.slane %v8002_v29, %v3257_v42  ;;  %v3262_v48 = vrot.slane %v8002_v29, %v3261_v5 }
0x10e2   :  { %v3254_v53 = vrot.slane %v8002_v29, %v3253_v49 }
0x10e3   :  { %3657 = vmatpush1.bf16.msra.mxu0 %v5662_v57  ;;  %3698 = vmatpush1.bf16.msra.mxu1 %v5664_v56 }
0x10e4   :  { %3736 = vmatprep.subr.bf16.mxu0 %v5651_v58  ;;  %3777 = vmatprep.subr.bf16.mxu1 %v5653_v13 }
0x10e6   :  { %5674 = vmatmul.mubr.msk.bf16.vlgmr.msra.gmra.mrb[68].mxu0 %vm541_vm2, %v7913_v37  ;;  %5675 = vmatmul.mubr.msk.bf16.vlgmr.msra.gmra.mrb[60].mxu1 %vm541_vm2, %v7913_v37 }
0x10e7   :  { %3737 = vmatpush1.bf16.msra.mxu0 %v5650_v60  ;;  %3778 = vmatpush1.bf16.msra.mxu1 %v5652_v14 }
0x10e8   :  { %3738 = vmatprep.subr.bf16.mxu0 %v5667_v61  ;;  %3779 = vmatprep.subr.bf16.mxu1 %v5669_v15  ;;  %v3269_v61 = vsub.s32 5, %v7988_v34  ;;  %v3277_v15 = vsub.s32 7, %v7988_v34 }
0x10e9   :  { %3768 = vmatprep.mubr.bf16.mxu0 %v7202_v4  ;;  %3809 = vmatprep.mubr.bf16.mxu1 %v7202_v4  ;;  %v6870_v4 = vld [vmem:[%s8271_s20 + $0x8] sm:$0xff]  }
0x10eb   :  { %3739 = vmatpush1.bf16.msra.mxu0 %v5666_v16  ;;  %3780 = vmatpush1.bf16.msra.mxu1 %v5668_v17 }
0x10ec   :  { %6022 = vmatprep.subr.bf16.mxu0 %v6864_v18  ;;  %6044 = vmatprep.subr.bf16.mxu1 %v6865_v62 }
0x10ee   :  { %5676 = vmatmul.mubr.msk.bf16.vlgmr.msra.gmra.mrb[72].mxu0 %vm541_vm2, %v7913_v37  ;;  %5677 = vmatmul.mubr.msk.bf16.vlgmr.msra.gmra.mrb[64].mxu1 %vm541_vm2, %v7913_v37  ;;  %v6887_v37 = vld [vmem:[%s8271_s20 + $0xa8] sm:$0xff]  }
0x10ef   :  { %6023 = vmatpush3.bf16.msra.mxu0 %v6866_v63  ;;  %6045 = vmatpush3.bf16.msra.mxu1 %v6867_v0 }
0x10f0   :  { %6024 = vmatprep.subr.bf16.mxu0 %v6868_v1  ;;  %6046 = vmatprep.subr.bf16.mxu1 %v6869_v6 }
0x10f3   :  { %6025 = vmatpush3.bf16.msra.mxu0 %v6870_v4  ;;  %6047 = vmatpush3.bf16.msra.mxu1 %v6871_v8  ;;  %v3270_v4 = vrot.slane %v8002_v29, %v3269_v61  ;;  %v3278_v8 = vrot.slane %v8002_v29, %v3277_v15 }
0x10f4   :  { %6026 = vmatprep.subr.bf16.mxu0 %v6872_v7  ;;  %6048 = vmatprep.subr.bf16.mxu1 %v6873_v9  ;;  %v6898_v7 = vld [vmem:[%s8271_s20 + $0x100] sm:$0xff]  }
0x10f5   :  { %v6899_v9 = vld [vmem:[%s8271_s20 + $0x180] sm:$0xff]  }
0x10f7   :  { %6027 = vmatpush3.bf16.msra.mxu0 %v6874_v10  ;;  %6049 = vmatpush3.bf16.msra.mxu1 %v6875_v11 }
0x10f8   :  { %6028 = vmatprep.subr.bf16.mxu0 %v6876_v12  ;;  %6050 = vmatprep.subr.bf16.mxu1 %v6877_v20  ;;  %v6900_v12 = vld [vmem:[%s8271_s20 + $0x148] sm:$0xff]  }
0x10f9   :  { %v6901_v20 = vld [vmem:[%s8271_s20 + $0x1c8] sm:$0xff]  }
0x10fb   :  { %6029 = vmatpush3.bf16.msra.mxu0 %v6878_v21  ;;  %6051 = vmatpush3.bf16.msra.mxu1 %v6879_v24 }
0x10fc   :  { %6030 = vmatprep.subr.bf16.mxu0 %v6880_v25  ;;  %6052 = vmatprep.subr.bf16.mxu1 %v6881_v26 }
0x10ff   :  { %6031 = vmatpush3.bf16.msra.mxu0 %v6882_v27  ;;  %6053 = vmatpush3.bf16.msra.mxu1 %v6883_v28 }
0x1100   :  { %6032 = vmatprep.subr.bf16.mxu0 %v6884_v31  ;;  %6054 = vmatprep.subr.bf16.mxu1 %v6885_v33 }
0x1103   :  { %6033 = vmatpush3.bf16.msra.mxu0 %v6886_v36  ;;  %6055 = vmatpush3.bf16.msra.mxu1 %v6887_v37  ;;  %v6902_v36 = vld [vmem:[%s8271_s20 + $0x108] sm:$0xff]  }
0x1104   :  { %6034 = vmatprep.subr.bf16.mxu0 %v6888_v38  ;;  %6056 = vmatprep.subr.bf16.mxu1 %v6889_v39  ;;  %v6903_v37 = vld [vmem:[%s8271_s20 + $0x188] sm:$0xff]  }
0x1107   :  { %6035 = vmatpush3.bf16.msra.mxu0 %v6890_v40  ;;  %6057 = vmatpush3.bf16.msra.mxu1 %v6891_v43  ;;  %v6904_v40 = vld [vmem:[%s8271_s20 + $0x150] sm:$0xff]  }
0x1108   :  { %6036 = vmatprep.subr.bf16.mxu0 %v6892_v44  ;;  %6058 = vmatprep.subr.bf16.mxu1 %v6893_v45  ;;  %v6905_v43 = vld [vmem:[%s8271_s20 + $0x1d0] sm:$0xff]  }
0x110b   :  { %6037 = vmatpush3.bf16.msra.mxu0 %v6894_v46  ;;  %6059 = vmatpush3.bf16.msra.mxu1 %v6895_v47  ;;  %v3282_v46 = vrot.slane %v7992_v35, %v3249_v41  ;;  %v3290_v47 = vrot.slane %v7992_v35, %v3257_v42 }
0x110c   :  { %6066 = vmatprep.subr.bf16.mxu0 %v6896_v50  ;;  %6088 = vmatprep.subr.bf16.mxu1 %v6897_v51 }
0x11a9   :  { %v3524_v57 = vpop.f32.mrb[60].mxu0  ;;  %v3565_v56 = vpop.f32.mrb[52].mxu1 }
0x11aa   :  { %v3525_v58 = vadd.f32 %v3524_v57, %v3250_v52  ;;  %v3566_v13 = vadd.f32 %v3565_v56, %v3258_v32  ;;  %v3526_v55 = vpop.f32.mrb[61].mxu0  ;;  %v3567_v54 = vpop.f32.mrb[53].mxu1  ;;  %v6906_v52 = vld [vmem:[%s8271_s20 + $0x110] sm:$0xff]  }
0x11ab   :  { %v3527_v59 = vadd.f32 %v3526_v55, %v3254_v53  ;;  %v3568_v19 = vadd.f32 %v3567_v54, %v3262_v48  ;;  %v3528_v60 = vpop.f32.mrb[62].mxu0  ;;  %v3569_v14 = vpop.f32.mrb[54].mxu1  ;;  %v6907_v32 = vld [vmem:[%s8271_s20 + $0x190] sm:$0xff]   ;;  %v6908_v53 = vld [vmem:[%s8271_s20 + $0x158] sm:$0xff]  }
0x11ac   :  { %v3818_v16 = vmax.f32 %v3525_v58, 0.0  ;;  %v3820_v17 = vmax.f32 %v3566_v13, 0.0  ;;  %v3529_v18 = vpop.f32.mrb[63].mxu0  ;;  %v3570_v62 = vpop.f32.mrb[55].mxu1  ;;  %v6909_v48 = vld [vmem:[%s8271_s20 + $0x1d8] sm:$0xff]   ;;  %v3265_v60 = vsub.s32 4, %v7988_v34 }
0x11ad   :  { %v3819_v63 = vmax.f32 %v3527_v59, 0.0  ;;  %v3821_v0 = vmax.f32 %v3568_v19, 0.0  ;;  %v6910_v59 = vld [vmem:[%s8271_s20 + $0x118] sm:$0xff]   ;;  %v6913_v18 = vld [vmem:[%s8271_s20 + $0x1e0] sm:$0xff]  }
0x11ae   :  { %v3834_v10 = vpack.c.bf16 %v3818_v16, %v3818_v16  ;;  %v3836_v11 = vpack.c.bf16 %v3820_v17, %v3820_v17  ;;  %v6911_v19 = vld [vmem:[%s8271_s20 + $0x198] sm:$0xff]   ;;  %v6912_v17 = vld [vmem:[%s8271_s20 + $0x160] sm:$0xff]   ;;  %v3298_v62 = vrot.slane %v7992_v35, %v3265_v60 }
0x11af   :  { %v3835_v1 = vpack.c.bf16 %v3819_v63, %v3819_v63  ;;  %v3837_v6 = vpack.c.bf16 %v3821_v0, %v3821_v0  ;;  %v6914_v63 = vld [vmem:[%s8271_s20 + $0x120] sm:$0xff]   ;;  %v6958_v34 = vld [vmem:[%s8271_s20 + $0x238] sm:$0xff]  }
0x11b0   :  { %v6915_v0 = vld [vmem:[%s8271_s20 + $0x1a0] sm:$0xff]  }
0x11b1   :  { %v8026_v21 = vpop.f32.mrb[64].mxu0  ;;  %v8028_v24 = vpop.f32.mrb[56].mxu1  ;;  %4913 = vmatprep.mubr.bf16.mxu0 %v3835_v1  ;;  %4953 = vmatprep.mubr.bf16.mxu1 %v3837_v6  ;;  %v6916_v1 = vld [vmem:[%s8271_s20 + $0x168] sm:$0xff]  }
0x11b2   :  { %v3608_v25 = vpop.f32.mrb[65].mxu0  ;;  %v3649_v26 = vpop.f32.mrb[57].mxu1  ;;  %4914 = vmatmul.mubr.bf16.vlgmr.msra.gmra.mrb[76].mxu0 %v3834_v10  ;;  %4954 = vmatmul.mubr.bf16.vlgmr.msra.gmra.mrb[68].mxu1 %v3836_v11  ;;  %v6917_v6 = vld [vmem:[%s8271_s20 + $0x1e8] sm:$0xff]  }
0x11b3   :  { %v3609_v27 = vadd.f32 %v3608_v25, %v3270_v4  ;;  %v3650_v28 = vadd.f32 %v3649_v26, %v3278_v8  ;;  %6067 = vmatpush3.bf16.msra.mxu0 %v6898_v7  ;;  %6089 = vmatpush3.bf16.msra.mxu1 %v6899_v9  ;;  %v3610_v31 = vpop.f32.mrb[66].mxu0  ;;  %v3651_v33 = vpop.f32.mrb[58].mxu1  ;;  %v6918_v25 = vld [vmem:[%s8271_s20 + $0x128] sm:$0xff]  }
0x11b4   :  { %v3611_v38 = vpop.f32.mrb[67].mxu0  ;;  %v3652_v39 = vpop.f32.mrb[59].mxu1  ;;  %6068 = vmatprep.subr.bf16.mxu0 %v6900_v12  ;;  %6090 = vmatprep.subr.bf16.mxu1 %v6901_v20  ;;  %v6919_v26 = vld [vmem:[%s8271_s20 + $0x1a8] sm:$0xff]   ;;  %v6920_v33 = vld [vmem:[%s8271_s20 + $0x170] sm:$0xff]  }
0x11b5   :  { %v3823_v44 = vmax.f32 %v3609_v27, 0.0  ;;  %v3825_v45 = vmax.f32 %v3650_v28, 0.0  ;;  %v3266_v27 = vrot.slane %v8002_v29, %v3265_v60  ;;  %v3294_v38 = vrot.slane %v7992_v35, %v3261_v5  ;;  %v6926_v5 = vld [vmem:[%s8271_s20 + $0x138] sm:$0xff]   ;;  %v6937_v60 = vld [vmem:[%s8271_s20 + $0x2d0] sm:$0xff]  }
0x11b7   :  { %v3839_v50 = vpack.c.bf16 %v3823_v44, %v3823_v44  ;;  %v3841_v51 = vpack.c.bf16 %v3825_v45, %v3825_v45  ;;  %6069 = vmatpush3.bf16.msra.mxu0 %v6902_v36  ;;  %6091 = vmatpush3.bf16.msra.mxu1 %v6903_v37  ;;  %v6921_v36 = vld [vmem:[%s8271_s20 + $0x1f0] sm:$0xff]   ;;  %v3286_v37 = vrot.slane %v7992_v35, %v3253_v49  ;;  %v6925_v49 = vld [vmem:[%s8271_s20 + $0x1f8] sm:$0xff]  }
0x11b8   :  { %6070 = vmatprep.subr.bf16.mxu0 %v6904_v40  ;;  %6092 = vmatprep.subr.bf16.mxu1 %v6905_v43  ;;  %v3607_v39 = vadd.f32 %v8026_v21, %v3266_v27  ;;  %v6924_v43 = vld [vmem:[%s8271_s20 + $0x178] sm:$0xff]   ;;  %v6928_v21 = vld [vmem:[%s8271_s20 + $0x240] sm:$0xff]   ;;  %v6953_v27 = vld [vmem:[%s8271_s20 + $0x2f0] sm:$0xff]  }
0x11b9   :  { %v3688_v57 = vpop.f32.mrb[68].mxu0  ;;  %v3729_v56 = vpop.f32.mrb[60].mxu1  ;;  %4993 = vmatprep.mubr.bf16.mxu0 %v3839_v50  ;;  %5033 = vmatprep.mubr.bf16.mxu1 %v3841_v51 }
0x11ba   :  { %v8040_v41 = vadd.f32 %v3688_v57, %v3282_v46  ;;  %v8042_v42 = vadd.f32 %v3729_v56, %v3290_v47  ;;  %v3690_v58 = vpop.f32.mrb[69].mxu0  ;;  %v3731_v13 = vpop.f32.mrb[61].mxu1  ;;  %v6927_v46 = vld [vmem:[%s8271_s20 + $0x1b8] sm:$0xff]   ;;  %v3822_v47 = vmax.f32 %v3607_v39, 0.0  ;;  %v6931_v57 = vld [vmem:[%s8271_s20 + $0x280] sm:$0xff]  }
0x11bb   :  { %6071 = vmatpush3.bf16.msra.mxu0 %v6906_v52  ;;  %6093 = vmatpush3.bf16.msra.mxu1 %v6907_v32  ;;  %v3692_v55 = vpop.f32.mrb[70].mxu0  ;;  %v3733_v54 = vpop.f32.mrb[62].mxu1  ;;  %v3691_v44 = vadd.f32 %v3690_v58, %v3286_v37  ;;  %v3732_v45 = vadd.f32 %v3731_v13, %v3294_v38  ;;  %v6930_v32 = vld [vmem:[%s8271_s20 + $0x200] sm:$0xff]   ;;  %v6932_v58 = vld [vmem:[%s8271_s20 + $0x248] sm:$0xff]   ;;  %v6957_v37 = vld [vmem:[%s8271_s20 + $0x2f8] sm:$0xff]  }
0x11bc   :  { %v3693_v14 = vpop.f32.mrb[71].mxu0  ;;  %v3734_v16 = vpop.f32.mrb[63].mxu1  ;;  %6072 = vmatprep.subr.bf16.mxu0 %v6908_v53  ;;  %6094 = vmatprep.subr.bf16.mxu1 %v6909_v48  ;;  %v3838_v53 = vpack.c.bf16 %v3822_v47, %v3822_v47  ;;  %v6933_v13 = vld [vmem:[%s8271_s20 + $0x2c8] sm:$0xff]   ;;  %v6961_v39 = vld [vmem:[%s8271_s20 + $0x3c0] sm:$0xff]  }
0x11bd   :  { %v3827_v51 = vmax.f32 %v3691_v44, 0.0  ;;  %v3829_v52 = vmax.f32 %v3732_v45, 0.0  ;;  %v6934_v54 = vld [vmem:[%s8271_s20 + $0x208] sm:$0xff]   ;;  %v6938_v14 = vld [vmem:[%s8271_s20 + $0x210] sm:$0xff]  }
0x11be   :  { %v6939_v16 = vld [vmem:[%s8271_s20 + $0x290] sm:$0xff]   ;;  %v6964_v44 = vld [vmem:[%s8271_s20 + $0x348] sm:$0xff]  }
0x11bf   :  { %6073 = vmatpush3.bf16.msra.mxu0 %v6910_v59  ;;  %6095 = vmatpush3.bf16.msra.mxu1 %v6911_v19  ;;  %v3843_v56 = vpack.c.bf16 %v3827_v51, %v3827_v51  ;;  %v3845_v55 = vpack.c.bf16 %v3829_v52, %v3829_v52  ;;  %v6935_v59 = vld [vmem:[%s8271_s20 + $0x288] sm:$0xff]   ;;  %v6936_v19 = vld [vmem:[%s8271_s20 + $0x250] sm:$0xff]   ;;  %v6972_v52 = vld [vmem:[%s8271_s20 + $0x358] sm:$0xff]  }
0x11c0   :  { %6074 = vmatprep.subr.bf16.mxu0 %v6912_v17  ;;  %6096 = vmatprep.subr.bf16.mxu1 %v6913_v18  ;;  %v6940_v17 = vld [vmem:[%s8271_s20 + $0x258] sm:$0xff]   ;;  %v6967_v47 = vld [vmem:[%s8271_s20 + $0x388] sm:$0xff]   ;;  %v6971_v51 = vld [vmem:[%s8271_s20 + $0x390] sm:$0xff]  }
0x11c1   :  { %v3770_v4 = vpop.f32.mrb[72].mxu0  ;;  %v3811_v8 = vpop.f32.mrb[64].mxu1  ;;  %v6941_v18 = vld [vmem:[%s8271_s20 + $0x2d8] sm:$0xff]  }
0x11c2   :  { %v8054_v7 = vadd.f32 %v3770_v4, %v3298_v62  ;;  %v8057_v9 = vadd.f32 %v3811_v8, %v7997_v23  ;;  %v8059_v10 = vpop.f32.mrb[73].mxu0  ;;  %v8061_v11 = vpop.f32.mrb[65].mxu1  ;;  %v3274_v23 = vrot.slane %v8002_v29, %v3273_v22  ;;  %v6922_v22 = vld [vmem:[%s8271_s20 + $0x130] sm:$0xff]   ;;  %v6942_v62 = vld [vmem:[%s8271_s20 + $0x218] sm:$0xff]   ;;  %v6947_v4 = vld [vmem:[%s8271_s20 + $0x2a0] sm:$0xff]  }
0x11c3   :  { %6075 = vmatpush3.bf16.msra.mxu0 %v6914_v63  ;;  %6097 = vmatpush3.bf16.msra.mxu1 %v6915_v0  ;;  %v3774_v12 = vpop.f32.mrb[74].mxu0  ;;  %v3815_v20 = vpop.f32.mrb[66].mxu1  ;;  %v6923_v29 = vld [vmem:[%s8271_s20 + $0x1b0] sm:$0xff]   ;;  %v6943_v63 = vld [vmem:[%s8271_s20 + $0x298] sm:$0xff]   ;;  %v6944_v0 = vld [vmem:[%s8271_s20 + $0x260] sm:$0xff]  }
0x11c4   :  { %v3775_v28 = vpop.f32.mrb[75].mxu0  ;;  %v3816_v31 = vpop.f32.mrb[67].mxu1  ;;  %6076 = vmatprep.subr.bf16.mxu0 %v6916_v1  ;;  %6098 = vmatprep.subr.bf16.mxu1 %v6917_v6  ;;  %v3648_v40 = vadd.f32 %v8028_v24, %v3274_v23  ;;  %v6929_v24 = vld [vmem:[%s8271_s20 + $0x2c0] sm:$0xff]   ;;  %v6948_v8 = vld [vmem:[%s8271_s20 + $0x268] sm:$0xff]   ;;  %v3302_v23 = vrot.slane %v7992_v35, %v3269_v61 }
0x11c5   :  { %v6945_v1 = vld [vmem:[%s8271_s20 + $0x2e0] sm:$0xff]   ;;  %v6949_v12 = vld [vmem:[%s8271_s20 + $0x2e8] sm:$0xff]   ;;  %v3310_v28 = vrot.slane %v7992_v35, %v3277_v15  ;;  %v6954_v31 = vld [vmem:[%s8271_s20 + $0x230] sm:$0xff]   ;;  %v3826_v35 = vmax.f32 %v8040_v41, 0.0 }
0x11c6   :  { %v3824_v50 = vmax.f32 %v3648_v40, 0.0  ;;  %v6946_v6 = vld [vmem:[%s8271_s20 + $0x220] sm:$0xff]   ;;  %v6950_v20 = vld [vmem:[%s8271_s20 + $0x228] sm:$0xff]   ;;  %v3773_v38 = vadd.f32 %v8059_v10, %v3302_v23  ;;  %v6959_v15 = vld [vmem:[%s8271_s20 + $0x2b8] sm:$0xff]  }
0x11c7   :  { %6077 = vmatpush3.bf16.msra.mxu0 %v6918_v25  ;;  %6099 = vmatpush3.bf16.msra.mxu1 %v6919_v26  ;;  %v6951_v25 = vld [vmem:[%s8271_s20 + $0x2a8] sm:$0xff]   ;;  %v6952_v26 = vld [vmem:[%s8271_s20 + $0x270] sm:$0xff]   ;;  %v3814_v61 = vadd.f32 %v8061_v11, %v3310_v28  ;;  %v6962_v10 = vld [vmem:[%s8271_s20 + $0x300] sm:$0xff]   ;;  %v3842_v11 = vpack.c.bf16 %v3826_v35, %v3826_v35 }
0x11c8   :  { %6078 = vmatprep.subr.bf16.mxu0 %v6920_v33  ;;  %6100 = vmatprep.subr.bf16.mxu1 %v6921_v36  ;;  %v3840_v48 = vpack.c.bf16 %v3824_v50, %v3824_v50  ;;  %v6955_v33 = vld [vmem:[%s8271_s20 + $0x2b0] sm:$0xff]   ;;  %v6956_v36 = vld [vmem:[%s8271_s20 + $0x278] sm:$0xff]   ;;  %v3831_v40 = vmax.f32 %v3773_v38, 0.0  ;;  %v6963_v41 = vld [vmem:[%s8271_s20 + $0x380] sm:$0xff]  }
0x11c9   :  { %v6968_v50 = vld [vmem:[%s8271_s20 + $0x350] sm:$0xff]  }
0x11ca   :  { %v3847_v45 = vpack.c.bf16 %v3831_v40, %v3831_v40 }
0x11cb   :  { %6079 = vmatpush3.bf16.msra.mxu0 %v6922_v22  ;;  %6101 = vmatpush3.bf16.msra.mxu1 %v6923_v29  ;;  %v6960_v22 = vld [vmem:[%s8271_s20 + $0x340] sm:$0xff]   ;;  %v3828_v29 = vmax.f32 %v8042_v42, 0.0  ;;  %v6965_v42 = vld [vmem:[%s8271_s20 + $0x3c8] sm:$0xff]  }
0x11cc   :  { %6080 = vmatprep.subr.bf16.mxu0 %v6924_v43  ;;  %6102 = vmatprep.subr.bf16.mxu1 %v6925_v49  ;;  %v3833_v43 = vmax.f32 %v3814_v61, 0.0 }
0x11cd   :  { %v3844_v49 = vpack.c.bf16 %v3828_v29, %v3828_v29 }
0x11cf   :  { %6081 = vmatpush3.bf16.msra.mxu0 %v6926_v5  ;;  %6103 = vmatpush3.bf16.msra.mxu1 %v6927_v46  ;;  %v3849_v5 = vpack.c.bf16 %v3833_v43, %v3833_v43  ;;  %v6966_v46 = vld [vmem:[%s8271_s20 + $0x308] sm:$0xff]  }
0x11d0   :  { %6110 = vmatprep.subr.bf16.mxu0 %v6928_v21  ;;  %6132 = vmatprep.subr.bf16.mxu1 %v6929_v24  ;;  %v6969_v21 = vld [vmem:[%s8271_s20 + $0x3d0] sm:$0xff]  }
0x11d1   :  { %v6970_v24 = vld [vmem:[%s8271_s20 + $0x310] sm:$0xff]  }
0x11d2   :  { %4994 = vmatmul.mubr.bf16.vlgmr.msra.gmra.mrb[80].mxu0 %v3838_v53  ;;  %5034 = vmatmul.mubr.bf16.vlgmr.msra.gmra.mrb[72].mxu1 %v3840_v48  ;;  %v6974_v53 = vld [vmem:[%s8271_s20 + $0x318] sm:$0xff]  }
0x11d3   :  { %6111 = vmatpush3.bf16.msra.mxu0 %v6930_v32  ;;  %5073 = vmatprep.mubr.bf16.mxu0 %v3843_v56  ;;  %v6973_v32 = vld [vmem:[%s8271_s20 + $0x3d8] sm:$0xff]   ;;  %v6977_v56 = vld [vmem:[%s8271_s20 + $0x3e0] sm:$0xff]  }
0x11d4   :  { %6133 = vmatpush3.bf16.msra.mxu1 %v6931_v57  ;;  %5113 = vmatprep.mubr.bf16.mxu1 %v3845_v55  ;;  %v6975_v48 = vld [vmem:[%s8271_s20 + $0x398] sm:$0xff]   ;;  %v6976_v57 = vld [vmem:[%s8271_s20 + $0x360] sm:$0xff]   ;;  %v6980_v55 = vld [vmem:[%s8271_s20 + $0x368] sm:$0xff]  }
0x11d5   :  { %6112 = vmatprep.subr.bf16.mxu0 %v6932_v58  ;;  %6134 = vmatprep.subr.bf16.mxu1 %v6933_v13  ;;  %v6978_v58 = vld [vmem:[%s8271_s20 + $0x320] sm:$0xff]  }
0x11d6   :  { %v6979_v13 = vld [vmem:[%s8271_s20 + $0x3a0] sm:$0xff]  }
0x11d7   :  { %6113 = vmatpush3.bf16.msra.mxu0 %v6934_v54  ;;  %v6981_v54 = vld [vmem:[%s8271_s20 + $0x3e8] sm:$0xff]  }
0x11d8   :  { %6135 = vmatpush3.bf16.msra.mxu1 %v6935_v59  ;;  %6114 = vmatprep.subr.bf16.mxu0 %v6936_v19  ;;  %v6982_v59 = vld [vmem:[%s8271_s20 + $0x328] sm:$0xff]  }
0x11d9   :  { %6136 = vmatprep.subr.bf16.mxu1 %v6937_v60  ;;  %v6983_v19 = vld [vmem:[%s8271_s20 + $0x3a8] sm:$0xff]   ;;  %v6984_v60 = vld [vmem:[%s8271_s20 + $0x370] sm:$0xff]  }
0x11db   :  { %6115 = vmatpush3.bf16.msra.mxu0 %v6938_v14  ;;  %v6985_v14 = vld [vmem:[%s8271_s20 + $0x3f0] sm:$0xff]  }
0x11dc   :  { %6137 = vmatpush3.bf16.msra.mxu1 %v6939_v16  ;;  %6116 = vmatprep.subr.bf16.mxu0 %v6940_v17  ;;  %v6986_v16 = vld [vmem:[%s8271_s20 + $0x330] sm:$0xff]  }
0x11dd   :  { %6138 = vmatprep.subr.bf16.mxu1 %v6941_v18  ;;  %v6987_v17 = vld [vmem:[%s8271_s20 + $0x3b0] sm:$0xff]   ;;  %v6988_v18 = vld [vmem:[%s8271_s20 + $0x378] sm:$0xff]  }
0x11df   :  { %6117 = vmatpush3.bf16.msra.mxu0 %v6942_v62  ;;  %v6989_v62 = vld [vmem:[%s8271_s20 + $0x3f8] sm:$0xff]  }
0x11e0   :  { %6139 = vmatpush3.bf16.msra.mxu1 %v6943_v63  ;;  %6118 = vmatprep.subr.bf16.mxu0 %v6944_v0  ;;  %v6990_v63 = vld [vmem:[%s8271_s20 + $0x338] sm:$0xff]   ;;  %v3830_v0 = vmax.f32 %v8054_v7, 0.0 }
0x11e1   :  { %6140 = vmatprep.subr.bf16.mxu1 %v6945_v1  ;;  %v6991_v1 = vld [vmem:[%s8271_s20 + $0x3b8] sm:$0xff]  }
0x11e3   :  { %6119 = vmatpush3.bf16.msra.mxu0 %v6946_v6  ;;  %v3832_v6 = vmax.f32 %v8057_v9, 0.0  ;;  %v5678_v9 = vld [vmem:[%s8273_s25] ss:$0 sm:$0xff] }
0x11e4   :  { %6141 = vmatpush3.bf16.msra.mxu1 %v6947_v4  ;;  %6120 = vmatprep.subr.bf16.mxu0 %v6948_v8  ;;  %v3846_v4 = vpack.c.bf16 %v3830_v0, %v3830_v0  ;;  %v5233_v0 = vld [vmem:[%s8274_s29 + $0x8] sm:$0xff] }
0x11e5   :  { %6142 = vmatprep.subr.bf16.mxu1 %v6949_v12  ;;  %v3848_v8 = vpack.c.bf16 %v3832_v6, %v3832_v6  ;;  %v5235_v6 = vld [vmem:[%s8274_s29 + $0x18] sm:$0xff] }
0x11e7   :  { %6121 = vmatpush3.bf16.msra.mxu0 %v6950_v20 }
0x11e8   :  { %6143 = vmatpush3.bf16.msra.mxu1 %v6951_v25  ;;  %6122 = vmatprep.subr.bf16.mxu0 %v6952_v26 }
0x11e9   :  { %6144 = vmatprep.subr.bf16.mxu1 %v6953_v27 }
0x11eb   :  { %6123 = vmatpush3.bf16.msra.mxu0 %v6954_v31 }
0x11ec   :  { %6145 = vmatpush3.bf16.msra.mxu1 %v6955_v33  ;;  %6124 = vmatprep.subr.bf16.mxu0 %v6956_v36 }
0x11ed   :  { %6146 = vmatprep.subr.bf16.mxu1 %v6957_v37 }
0x11ef   :  { %6125 = vmatpush3.bf16.msra.mxu0 %v6958_v34 }
0x11f0   :  { %6147 = vmatpush3.bf16.msra.mxu1 %v6959_v15  ;;  %6154 = vmatprep.subr.bf16.mxu0 %v6960_v22 }
0x11f1   :  { %6176 = vmatprep.subr.bf16.mxu1 %v6961_v39 }
0x11f2   :  { %5074 = vmatmul.mubr.bf16.vlgmr.msra.gmra.mrb[84].mxu0 %v3842_v11 }
0x11f3   :  { %5114 = vmatmul.mubr.bf16.vlgmr.msra.gmra.mrb[76].mxu1 %v3844_v49  ;;  %6155 = vmatpush3.bf16.msra.mxu0 %v6962_v10 }
0x11f4   :  { %5153 = vmatprep.mubr.bf16.mxu0 %v3847_v45  ;;  %6177 = vmatpush3.bf16.msra.mxu1 %v6963_v41 }
0x11f5   :  { %5193 = vmatprep.mubr.bf16.mxu1 %v3849_v5  ;;  %6156 = vmatprep.subr.bf16.mxu0 %v6964_v44 }
0x11f6   :  { %6178 = vmatprep.subr.bf16.mxu1 %v6965_v42 }
0x11f7   :  { %6157 = vmatpush3.bf16.msra.mxu0 %v6966_v46 }
0x11f8   :  { %6179 = vmatpush3.bf16.msra.mxu1 %v6967_v47  ;;  %6158 = vmatprep.subr.bf16.mxu0 %v6968_v50 }
0x11f9   :  { %6180 = vmatprep.subr.bf16.mxu1 %v6969_v21 }
0x11fb   :  { %6159 = vmatpush3.bf16.msra.mxu0 %v6970_v24 }
0x11fc   :  { %6181 = vmatpush3.bf16.msra.mxu1 %v6971_v51  ;;  %6160 = vmatprep.subr.bf16.mxu0 %v6972_v52 }
0x11fd   :  { %6182 = vmatprep.subr.bf16.mxu1 %v6973_v32 }
0x11ff   :  { %6161 = vmatpush3.bf16.msra.mxu0 %v6974_v53 }
0x1200   :  { %6183 = vmatpush3.bf16.msra.mxu1 %v6975_v48  ;;  %6162 = vmatprep.subr.bf16.mxu0 %v6976_v57 }
0x1201   :  { %6184 = vmatprep.subr.bf16.mxu1 %v6977_v56 }
0x1203   :  { %6163 = vmatpush3.bf16.msra.mxu0 %v6978_v58 }
0x1204   :  { %6185 = vmatpush3.bf16.msra.mxu1 %v6979_v13  ;;  %6164 = vmatprep.subr.bf16.mxu0 %v6980_v55 }
0x1205   :  { %6186 = vmatprep.subr.bf16.mxu1 %v6981_v54 }
0x1207   :  { %6165 = vmatpush3.bf16.msra.mxu0 %v6982_v59 }
0x1208   :  { %6187 = vmatpush3.bf16.msra.mxu1 %v6983_v19  ;;  %6166 = vmatprep.subr.bf16.mxu0 %v6984_v60 }
0x1209   :  { %6188 = vmatprep.subr.bf16.mxu1 %v6985_v14 }
0x120b   :  { %6167 = vmatpush3.bf16.msra.mxu0 %v6986_v16 }
0x120c   :  { %6189 = vmatpush3.bf16.msra.mxu1 %v6987_v17  ;;  %6168 = vmatprep.subr.bf16.mxu0 %v6988_v18 }
0x120d   :  { %6190 = vmatprep.subr.bf16.mxu1 %v6989_v62 }
0x120f   :  { %6169 = vmatpush3.bf16.msra.mxu0 %v6990_v63  ;;  %v5232_v63 = vld [vmem:[%s8274_s29] sm:$0xff] }
0x1210   :  { %6191 = vmatpush3.bf16.msra.mxu1 %v6991_v1  ;;  %6779 = vmatprep.subr.bf16.mxu0 %v7199_v2  ;;  %v6780_v1 = vpack.c.bf16 %v5233_v0, %v5232_v63 }
0x1211   :  { %6785 = vmatprep.subr.bf16.mxu1 %v7199_v2 }
0x1212   :  { %5154 = vmatmul.mubr.bf16.vlgmr.msra.gmra.mrb[88].mxu0 %v3846_v4 }
0x1213   :  { %5194 = vmatmul.mubr.bf16.vlgmr.msra.gmra.mrb[80].mxu1 %v3848_v8  ;;  %6601 = vmatprep.mubr.msk.f32.mxu0 %vm7200_vm3, %v7201_v3  ;;  %v5317_v8 = vld [vmem:[%s8275_s3] sm:$0xff] }
0x1214   :  { %6612 = vmatprep.mubr.msk.f32.mxu1 %vm7200_vm3, %v7201_v3  ;;  %6781 = vmatpush3.bf16.msra.mxu0 %v6780_v1 }
0x1215   :  { %6782 = vmatprep.subr.bf16.mxu0 %v7199_v2 }
0x1285   :  { %v6038_v7 = vpop.f32.mrb[76].mxu0  ;;  %v6060_v12 = vpop.f32.mrb[68].mxu1 }
0x1286   :  { %v6039_v20 = vpop.f32.mrb[77].mxu0  ;;  %v6061_v25 = vpop.f32.mrb[69].mxu1 }
0x1287   :  { %v6040_v26 = vadd.f32 %v6039_v20, %v6038_v7  ;;  %v6062_v27 = vadd.f32 %v6061_v25, %v6060_v12  ;;  %v6041_v23 = vpop.f32.mrb[78].mxu0  ;;  %v6063_v28 = vpop.f32.mrb[70].mxu1  ;;  %v5318_v7 = vld [vmem:[%s8275_s3 + $0x8] sm:$0xff] }
0x1288   :  { %v6042_v31 = vpop.f32.mrb[79].mxu0  ;;  %v6064_v33 = vpop.f32.mrb[71].mxu1  ;;  %v6786_v12 = vpack.c.bf16 %v5318_v7, %v5317_v8  ;;  %v5808_v28 = vld [vmem:[#allocation6] ss:$0 sm:$0xff] }
0x1289   :  { %v4916_v36 = vadd.f32 %v6040_v26, %v5678_v9 }
0x128a   :  { %6787 = vmatpush3.bf16.msra.mxu1 %v6786_v12 }
0x128b   :  { %v4956_v37 = vadd.f32 %v6062_v27, %v4916_v36  ;;  %6788 = vmatprep.subr.bf16.mxu1 %v7199_v2  ;;  %v5807_v27 = vld [vmem:[%s8276_s8] ss:$0 sm:$0xff]  ;;  %v5319_v36 = vld [vmem:[%s8275_s3 + $0x10] sm:$0xff] }
0x128c   :  { %v5809_v2 = vld [vmem:[%s8277_s5] ss:$0 sm:$0xff] }
0x12a5   :  { %v6082_v38 = vpop.f32.mrb[80].mxu0  ;;  %v6104_v61 = vpop.f32.mrb[72].mxu1 }
0x12a6   :  { %v6083_v34 = vpop.f32.mrb[81].mxu0  ;;  %v6105_v35 = vpop.f32.mrb[73].mxu1 }
0x12a7   :  { %v6084_v15 = vadd.f32 %v6083_v34, %v6082_v38  ;;  %v6106_v22 = vadd.f32 %v6105_v35, %v6104_v61  ;;  %v6085_v3 = vpop.f32.mrb[82].mxu0  ;;  %v6107_v29 = vpop.f32.mrb[74].mxu1 }
0x12a8   :  { %v6086_v39 = vpop.f32.mrb[83].mxu0  ;;  %v6108_v40 = vpop.f32.mrb[75].mxu1 }
0x12a9   :  { %v4996_v43 = vadd.f32 %v6084_v15, %v4956_v37  ;;  %v5320_v37 = vld [vmem:[%s8275_s3 + $0x18] sm:$0xff] }
0x12aa   :  { %v6789_v38 = vpack.c.bf16 %v5320_v37, %v5319_v36 }
0x12ab   :  { %v5036_v10 = vadd.f32 %v6106_v22, %v4996_v43 }
0x12ac   :  { %6790 = vmatpush3.bf16.msra.mxu1 %v6789_v38 }
0x12c5   :  { %v6126_v11 = vpop.f32.mrb[84].mxu0 }
0x12c6   :  { %v6148_v41 = vpop.f32.mrb[76].mxu1  ;;  %v6127_v49 = vpop.f32.mrb[85].mxu0 }
0x12c7   :  { %v6128_v44 = vadd.f32 %v6127_v49, %v6126_v11  ;;  %v6149_v45 = vpop.f32.mrb[77].mxu1  ;;  %v6129_v42 = vpop.f32.mrb[86].mxu0 }
0x12c8   :  { %v6150_v5 = vadd.f32 %v6149_v45, %v6148_v41  ;;  %v6151_v46 = vpop.f32.mrb[78].mxu1  ;;  %v6130_v47 = vpop.f32.mrb[87].mxu0 }
0x12c9   :  { %v5076_v50 = vadd.f32 %v6128_v44, %v5036_v10  ;;  %v6152_v21 = vpop.f32.mrb[79].mxu1 }
0x12cb   :  { %v5116_v24 = vadd.f32 %v6150_v5, %v5076_v50 }
0x12e5   :  { %v6170_v51 = vpop.f32.mrb[88].mxu0 }
0x12e6   :  { %v6192_v52 = vpop.f32.mrb[80].mxu1  ;;  %v6171_v32 = vpop.f32.mrb[89].mxu0 }
0x12e7   :  { %v6172_v53 = vadd.f32 %v6171_v32, %v6170_v51  ;;  %v6193_v48 = vpop.f32.mrb[81].mxu1  ;;  %v6173_v57 = vpop.f32.mrb[90].mxu0 }
0x12e8   :  { %v6194_v56 = vadd.f32 %v6193_v48, %v6192_v52  ;;  %v6195_v58 = vpop.f32.mrb[82].mxu1  ;;  %v6174_v13 = vpop.f32.mrb[91].mxu0 }
0x12e9   :  { %v5156_v55 = vadd.f32 %v6172_v53, %v5116_v24  ;;  %v6196_v54 = vpop.f32.mrb[83].mxu1 }
0x12eb   :  { %v5196_v59 = vadd.f32 %v6194_v56, %v5156_v55 }
0x12ed   :  { %v5201_v19 = vadd.f32 %v5196_v59, %v7909_v30  ;;  %v5234_v30 = vld [vmem:[%s8274_s29 + $0x10] sm:$0xff] }
0x12ee   :  { %v6783_v4 = vpack.c.bf16 %v5235_v6, %v5234_v30 }
0x12ef   :  { %v5204_v60 = vsel %vm541_vm2, %v5201_v19, 0.0 }
0x12f0   :  { %5205 = vadd.xlane.f32.xlu0 %v5204_v60  ;;  %6784 = vmatpush3.bf16.msra.mxu0 %v6783_v4 }
0x137d   :  { %v5206_v14 = vpop.xlane.xlu0 %5205 }
0x137e   :  { %v5207_v16 = vmul.f32 0.03125, %v5206_v14 }
0x1380   :  { %v5208_v17 = vsub.f32 %v5201_v19, %v5207_v16 }
0x1382   :  { %v5209_v18 = vmul.f32 %v5208_v17, %v5208_v17 }
0x1384   :  { %v5210_v62 = vsel %vm541_vm2, %v5209_v18, 0.0 }
0x1385   :  { %5211 = vadd.xlane.f32.xlu1 %v5210_v62 }
0x1412   :  { %v5212_v9 = vpop.xlane.xlu1 %5211 }
0x1413   :  { %v5213_v20 = vmul.f32 0.03125, %v5212_v9 }
0x1415   :  { %v5214_v25 = vadd.f32 1e-05, %v5213_v20 }
0x1417   :  { %7010 = vrsqrt.f32 %v5214_v25 }
0x1421   :  { %v7011_v26 = vpop.eup %7010 }
0x1422   :  { %v5216_v23 = vmul.f32 %v7011_v26, %v5208_v17 }
0x1424   :  { %v5223_v31 = vmul.f32 %v5807_v27, %v5216_v23 }
0x1426   :  { %v5230_v33 = vadd.f32 %v5808_v28, %v5223_v31 }
0x1428   :  { %6602 = vmatmul.mubr.msk.f32.vlgmr.msra.gmra.mrb[58].mxu0 %vm541_vm2, %v5230_v33  ;;  %5231 = vst.msk [vmem:[#allocation11] sm:$0xff] %vm541_vm2, %v5230_v33 }
0x14fb   :  { %v5312_v61 = vpop.f32.mrb[58].mxu0 }
0x14fc   :  { %v5313_v34 = vadd.f32 %v5809_v2, %v5312_v61  ;;  %v6603_v35 = vpop.f32.mrb[59].mxu0 }
0x14fe   :  { %v5316_v15 = vmax.f32 %v5313_v34, 0.0 }
0x1500   :  { %6613 = vmatmul.mubr.msk.f32.vlgmr.msra.gmra.mrb[84].mxu1 %vm541_vm2, %v5316_v15 }
0x1501   :  { %7063 = shalt.err (!%p7060_p3)
}
0x1502   :  { %s7064_s30 = scalar_lea.hbm %s7435_s27, 128 }
0x1503   :  { %p7065_p4 = scmp.ne.s32.totalorder %s7435_s27, %s7064_s30  ;;  %p7068_p5 = scmp.lt.u32.totalorder %s7064_s30, %s7435_s27 }
0x1505   :  { %p7070_p6 = pnand %p7068_p5, %p7065_p4 }
0x1507   :  { %7073 = shalt.err (!%p7070_p6)
}
0x1508   :  { %5411 = dma.vmem_to_hbm [thread:$0]  %s5409_s19, 128, %s7435_s27, [#allocation4]  }
0x1509   :  { %s7204_s6 = smov [#allocation11]  }
0x150a   :  { %s5438_s7 = sshll.u32 %s7204_s6, 4  ;;  %s5439_s7 = int_to_ptr.vmem [resolvable:$true] %s5438_s7 }
0x150b   :  { %s7074_s10 = scalar_lea.vmem %s5439_s7, 128  ;;  %p7079_p8 = scmp.lt.s32.totalorder %s5439_s7, %s5439_s7 }
0x150c   :  { %p7075_p7 = scmp.ne.s32.totalorder %s5439_s7, %s7074_s10  ;;  %p7080_p9 = scmp.lt.s32.totalorder %s7074_s10, %s7074_s10 }
0x150e   :  { %p7081_p10 = por %p7080_p9, %p7079_p8 }
0x1510   :  { %p7082_p11 = pnand %p7081_p10, %p7075_p7 }
0x1512   :  { %7085 = shalt.err (!%p7082_p11)
}
0x1513   :  { %s7086_s11 = scalar_lea.hbm %s7450_s12, 128 }
0x1514   :  { %p7087_p12 = scmp.ne.s32.totalorder %s7450_s12, %s7086_s11  ;;  %p7090_p13 = scmp.lt.u32.totalorder %s7086_s11, %s7450_s12 }
0x1516   :  { %p7092_p0 = pnand %p7090_p13, %p7087_p12 }
0x1518   :  { %7095 = shalt.err (!%p7092_p0)
}
0x1519   :  { %s8278_s27 = sld [smem:[#allocation32_spill]]  ;;  %s7205_s15 = smov [#allocation8]  }
0x151a   :  { %5441 = dma.vmem_to_hbm [thread:$0]  %s5439_s7, 128, %s7450_s12, [#allocation12]  }
0x151b   :  { %s5418_s16 = sshll.u32 %s7205_s15, 4  ;;  %s7206_s18 = smov [#allocation10]   ;;  %s5419_s16 = int_to_ptr.vmem [resolvable:$true] %s5418_s16 }
0x151c   :  { %s5428_s22 = sshll.u32 %s7206_s18, 4  ;;  %s7096_s23 = scalar_lea.vmem %s5419_s16, 128  ;;  %s5429_s22 = int_to_ptr.vmem [resolvable:$true] %s5428_s22 }
0x151d   :  { %p7097_p1 = scmp.ne.s32.totalorder %s5419_s16, %s7096_s23  ;;  %p7101_p2 = scmp.lt.s32.totalorder %s5419_s16, %s5419_s16 }
0x151e   :  { %p7102_p3 = scmp.lt.s32.totalorder %s7096_s23, %s7096_s23 }
0x151f   :  { %v5811_v22 = vld [vmem:[%s8278_s27] ss:$0 sm:$0xff] }
0x1520   :  { %p7103_p4 = por %p7102_p3, %p7101_p2 }
0x1522   :  { %p7104_p5 = pnand %p7103_p4, %p7097_p1 }
0x15d3   :  { %v5397_v3 = vpop.f32.mrb[84].mxu1 }
0x15d4   :  { %v5398_v29 = vadd.f32 %v5811_v22, %v5397_v3  ;;  %v6614_v39 = vpop.f32.mrb[85].mxu1 }
0x15d6   :  { %5401 = vst.msk [vmem:[#allocation8] sm:$0xff] %vm2185_vm4, %v5398_v29 }
0x15d7   :  { %7107 = shalt.err (!%p7104_p5)
}
0x15d8   :  { %s7108_s12 = scalar_lea.hbm %s7440_s4, 128 }
0x15d9   :  { %p7109_p6 = scmp.ne.s32.totalorder %s7440_s4, %s7108_s12  ;;  %p7112_p7 = scmp.lt.u32.totalorder %s7108_s12, %s7440_s4 }
0x15db   :  { %p7114_p8 = pnand %p7112_p7, %p7109_p6 }
0x15dd   :  { %7117 = shalt.err (!%p7114_p8)
}
0x15de   :  { %5421 = dma.vmem_to_hbm [thread:$0]  %s5419_s16, 128, %s7440_s4, [#allocation9]  }
0x15df   :  { %s7118_s26 = scalar_lea.vmem %s5429_s22, 128  ;;  %p7123_p10 = scmp.lt.s32.totalorder %s5429_s22, %s5429_s22 }
0x15e0   :  { %p7119_p9 = scmp.ne.s32.totalorder %s5429_s22, %s7118_s26  ;;  %p7124_p11 = scmp.lt.s32.totalorder %s7118_s26, %s7118_s26 }
0x15e2   :  { %p7125_p12 = por %p7124_p11, %p7123_p10 }
0x15e4   :  { %p7126_p13 = pnand %p7125_p12, %p7119_p9 }
0x15e6   :  { %7129 = shalt.err (!%p7126_p13)
}
0x15e7   :  { %s7130_s0 = scalar_lea.hbm %s7445_s13, 128 }
0x15e8   :  { %p7131_p0 = scmp.ne.s32.totalorder %s7445_s13, %s7130_s0  ;;  %p7134_p1 = scmp.lt.u32.totalorder %s7130_s0, %s7445_s13 }
0x15ea   :  { %p7136_p2 = pnand %p7134_p1, %p7131_p0 }
0x15ec   :  { %7139 = shalt.err (!%p7136_p2)
}
0x15ed   :  { %5431 = dma.vmem_to_hbm [thread:$0]  %s5429_s22, 128, %s7445_s13, [#allocation9]  }
0x15ee   :  { %7144 = dma.done.wait [#allocation4], 128  }
0x15ef   :  { %7145 = vsyncadd [#allocation4], 4294967168 }
0x15f0   :  { %7146 = dma.done.wait [#allocation9], 256  }
0x15f1   :  { %7147 = vsyncadd [#allocation9], 4294967040 }
0x15f2   :  { %7148 = dma.done.wait [#allocation12], 128  }
0x15f3   :  { %7149 = vsyncadd [#allocation12], 4294967168 }
0x15f4   :  { %5454 = vsyncpa [#allocation3], 1 }
0x15f5   :  { %5455 = vsyncpa [#allocation4], 1 }
0x15f6   :  { %5456 = vsyncpa [#allocation9], 1 }
0x15f7   :  { %5457 = vsyncpa [#allocation12], 1 }
0x15f8   :  { %5458 = vsyncpa [#allocation5], 1 }

</bundles_post_ra>
